<compile_context>
chip_gen: v5e
topology: v5e:2x2
jax: 0.10.0
libtpu: 0.0.40
codegen_flags: <defaults>
</compile_context>

<pallas_src>
import jax
import jax.numpy as jnp
import numpy as np
from jax import lax
from jax.experimental import pallas as pl
from jax.experimental.pallas import tpu as pltpu

LEAKY_SLOPE = 0.2
C_PAD = 128                    # lane-dense channel width carried end-to-end
MXU_DTYPE = jnp.bfloat16       # matmul operand dtype (f32 accumulation)


# ----------------------------------------------------------------------------
# In-kernel helpers
# ----------------------------------------------------------------------------
def _lrelu(v):
    return jnp.where(v >= 0, v, LEAKY_SLOPE * v)


def _conv_same(x, w_ref, b_ref, K, pad_ref=None, stride=1):
    """Same-padded 1-D conv over time as ONE im2col matmul.

    x       : [T, C_PAD] f32 value
    w_ref   : [K*C_PAD, C_PAD] bf16 ref, row index = k*C_PAD + c_in
    b_ref   : [1, C_PAD] f32 ref
    pad_ref : [T + 2*(K//2), C_PAD] f32 VMEM scratch (needed when K > 1)
    stride  : 1 or 2; strided taps are read straight from the scratch so only
              the kept output windows are ever computed.
    """
    T, C = x.shape
    P = K // 2
    T_out = (T + 2 * P - K) // stride + 1
    if K == 1 and stride == 1:
        cols = x
    else:
        # zero halo rows, place x in the middle (all VMEM, never leaves chip)
        pad_ref[pl.ds(0, P), :] = jnp.zeros((P, C), jnp.float32)
        pad_ref[pl.ds(T + P, P), :] = jnp.zeros((P, C), jnp.float32)
        pad_ref[pl.ds(P, T), :] = x
        if stride == 1:
            taps = [pad_ref[pl.ds(k, T_out), :] for k in range(K)]
        else:
            taps = [pad_ref[pl.ds(k, T_out, stride=stride), :] for k in range(K)]
        cols = jnp.concatenate(taps, axis=1)          # [T_out, K*C_PAD]
    w = w_ref[...]
    y = jnp.dot(cols.astype(w.dtype), w, preferred_element_type=jnp.float32)
    return y + b_ref[...]


# ----------------------------------------------------------------------------
# Fused block kernels
# ----------------------------------------------------------------------------
def _make_input_proj_kernel(K):
    def kernel(x_ref, w_ref, b_ref, o_ref, pad_ref):
        o_ref[0] = _conv_same(x_ref[0], w_ref, b_ref, K, pad_ref)
    return kernel


def _make_down_block_kernel(K):
    """conv1 -> lrelu, 1x1 residual, conv2 + res -> lrelu (skip),
    stride-2 down conv -- all in one kernel, intermediates stay in VMEM."""
    def kernel(x_ref, w1, b1, wr, br, w2, b2, wd, bd,
               skip_ref, xd_ref, pad_ref):
        x = x_ref[0]
        h = _lrelu(_conv_same(x, w1, b1, K, pad_ref))
        r = _conv_same(x, wr, br, 1)
        skip = _lrelu(_conv_same(h, w2, b2, K, pad_ref) + r)
        skip_ref[0] = skip
        # stride-2 conv computed directly (only even windows gathered)
        xd_ref[0] = _conv_same(skip, wd, bd, K, pad_ref, stride=2)
    return kernel


def _make_bottleneck_kernel(K):
    def kernel(x_ref, w1, b1, w2, b2, o_ref, pad_ref):
        x = x_ref[0]
        h = _lrelu(_conv_same(x, w1, b1, K, pad_ref))
        o_ref[0] = _lrelu(_conv_same(h, w2, b2, K, pad_ref) + x)
    return kernel


def _make_up_block_kernel(K, T_half):
    """Nearest-x2 upsample + skip add + conv1 -> lrelu + 1x1 residual +
    conv2 + res -> lrelu, fused."""
    T = 2 * T_half

    def kernel(x_ref, skip_ref, w1, b1, wr, br, w2, b2, o_ref, pad_ref):
        x = x_ref[0]                                   # [T_half, C]
        skip = skip_ref[0]                             # [T, C]
        # nearest-x2 upsample as a 0/1 interleave matrix on the MXU
        t_idx = lax.broadcasted_iota(jnp.int32, (T, T_half), 0)
        j_idx = lax.broadcasted_iota(jnp.int32, (T, T_half), 1)
        d = t_idx - 2 * j_idx
        up = jnp.where((d == 0) | (d == 1), 1.0, 0.0).astype(jnp.float32)
        h0 = jnp.dot(up, x, preferred_element_type=jnp.float32) + skip
        h = _lrelu(_conv_same(h0, w1, b1, K, pad_ref))
        r = _conv_same(h0, wr, br, 1)
        o_ref[0] = _lrelu(_conv_same(h, w2, b2, K, pad_ref) + r)

    return kernel


def _make_head_kernel(T, hop):
    """pre_output 1x1 convs + ConvTranspose1d(C,1,2*hop,stride=hop) as
    frame matmuls + 50% overlap-add on the output ref + tanh."""
    def kernel(x_ref, w1, b1, w2, b2, wu1, wu2, bu, o_ref):
        x = x_ref[0]
        h = _lrelu(_conv_same(x, w1, b1, 1))           # 1x1 conv + LeakyReLU
        h = _conv_same(h, w2, b2, 1)                   # 1x1 conv
        hb = h.astype(MXU_DTYPE)
        a1 = jnp.dot(hb, wu1[...], preferred_element_type=jnp.float32)  # [T, hop]
        a2 = jnp.dot(hb, wu2[...], preferred_element_type=jnp.float32)  # [T, hop]
        # overlap-add: row r = a1[r] + a2[r-1]
        o_ref[0, pl.ds(0, T), :] = a1
        o_ref[0, pl.ds(T, 1), :] = jnp.zeros((1, hop), jnp.float32)
        o_ref[0, pl.ds(1, T), :] = o_ref[0, pl.ds(1, T), :] + a2
        o_ref[0] = jnp.tanh(o_ref[0] + bu[0, 0])       # scalar ConvT bias + tanh
    return kernel


# ----------------------------------------------------------------------------
# pallas_call wrappers
# ----------------------------------------------------------------------------
_PPARAMS = pltpu.CompilerParams(dimension_semantics=("parallel",))


def _act_spec(T, C=C_PAD):
    return pl.BlockSpec((1, T, C), lambda i: (i, 0, 0))


def _full_spec(shape):
    nd = len(shape)
    return pl.BlockSpec(shape, lambda i: (0,) * nd)


def _pad_scratch(T, K):
    return pltpu.VMEM((T + 2 * (K // 2), C_PAD), jnp.float32)


def _input_proj(x, p, K):
    B, T, _ = x.shape
    return pl.pallas_call(
        _make_input_proj_kernel(K),
        out_shape=jax.ShapeDtypeStruct((B, T, C_PAD), jnp.float32),
        grid=(B,),
        in_specs=[_act_spec(T), _full_spec(p["w"].shape), _full_spec(p["b"].shape)],
        out_specs=_act_spec(T),
        scratch_shapes=[_pad_scratch(T, K)],
        compiler_params=_PPARAMS,
    )(x, p["w"], p["b"])


def _down_block(x, p, K):
    B, T, _ = x.shape
    T_half = T // 2
    skip, xd = pl.pallas_call(
        _make_down_block_kernel(K),
        out_shape=(jax.ShapeDtypeStruct((B, T, C_PAD), jnp.float32),
                   jax.ShapeDtypeStruct((B, T_half, C_PAD), jnp.float32)),
        grid=(B,),
        in_specs=[_act_spec(T),
                  _full_spec(p["conv1"]["w"].shape), _full_spec(p["conv1"]["b"].shape),
                  _full_spec(p["res"]["w"].shape), _full_spec(p["res"]["b"].shape),
                  _full_spec(p["conv2"]["w"].shape), _full_spec(p["conv2"]["b"].shape),
                  _full_spec(p["down"]["w"].shape), _full_spec(p["down"]["b"].shape)],
        out_specs=(_act_spec(T), _act_spec(T_half)),
        scratch_shapes=[_pad_scratch(T, K)],
        compiler_params=_PPARAMS,
    )(x, p["conv1"]["w"], p["conv1"]["b"], p["res"]["w"], p["res"]["b"],
      p["conv2"]["w"], p["conv2"]["b"], p["down"]["w"], p["down"]["b"])
    return skip, xd


def _bottleneck(x, p, K):
    B, T, _ = x.shape
    return pl.pallas_call(
        _make_bottleneck_kernel(K),
        out_shape=jax.ShapeDtypeStruct((B, T, C_PAD), jnp.float32),
        grid=(B,),
        in_specs=[_act_spec(T),
                  _full_spec(p["conv1"]["w"].shape), _full_spec(p["conv1"]["b"].shape),
                  _full_spec(p["conv2"]["w"].shape), _full_spec(p["conv2"]["b"].shape)],
        out_specs=_act_spec(T),
        scratch_shapes=[_pad_scratch(T, K)],
        compiler_params=_PPARAMS,
    )(x, p["conv1"]["w"], p["conv1"]["b"], p["conv2"]["w"], p["conv2"]["b"])


def _up_block(x, skip, p, K):
    B, T_half, _ = x.shape
    T = skip.shape[1]
    assert T == 2 * T_half
    return pl.pallas_call(
        _make_up_block_kernel(K, T_half),
        out_shape=jax.ShapeDtypeStruct((B, T, C_PAD), jnp.float32),
        grid=(B,),
        in_specs=[_act_spec(T_half), _act_spec(T),
                  _full_spec(p["conv1"]["w"].shape), _full_spec(p["conv1"]["b"].shape),
                  _full_spec(p["res"]["w"].shape), _full_spec(p["res"]["b"].shape),
                  _full_spec(p["conv2"]["w"].shape), _full_spec(p["conv2"]["b"].shape)],
        out_specs=_act_spec(T),
        scratch_shapes=[_pad_scratch(T, K)],
        compiler_params=_PPARAMS,
    )(x, skip, p["conv1"]["w"], p["conv1"]["b"], p["res"]["w"], p["res"]["b"],
      p["conv2"]["w"], p["conv2"]["b"])


def _output_head(x, p_pre, p_up, hop):
    B, T, _ = x.shape
    return pl.pallas_call(
        _make_head_kernel(T, hop),
        out_shape=jax.ShapeDtypeStruct((B, T + 1, hop), jnp.float32),
        grid=(B,),
        in_specs=[_act_spec(T),
                  _full_spec(p_pre["c1"]["w"].shape), _full_spec(p_pre["c1"]["b"].shape),
                  _full_spec(p_pre["c2"]["w"].shape), _full_spec(p_pre["c2"]["b"].shape),
                  _full_spec(p_up["w1"].shape), _full_spec(p_up["w2"].shape),
                  pl.BlockSpec(memory_space=pltpu.MemorySpace.SMEM)],
        out_specs=pl.BlockSpec((1, T + 1, hop), lambda i: (i, 0, 0)),
        compiler_params=_PPARAMS,
    )(x, p_pre["c1"]["w"], p_pre["c1"]["b"], p_pre["c2"]["w"], p_pre["c2"]["b"],
      p_up["w1"], p_up["w2"], p_up["b"])


# ----------------------------------------------------------------------------
# Parameters (deterministic synthetic init, PyTorch-like uniform fan-in bound)
# ----------------------------------------------------------------------------
def _conv_params(key, c_in, c_out, k):
    kw, kb = jax.random.split(key)
    bound = 1.0 / np.sqrt(c_in * k)
    w = jax.random.uniform(kw, (k, c_in, c_out), jnp.float32, -bound, bound)
    b = jax.random.uniform(kb, (c_out,), jnp.float32, -bound, bound)
    return {"w": w, "b": b}


def init_params(key, mel_bins, hop, enc, dec, ksize):
    keys = iter(jax.random.split(key, 64))
    p = {}
    p["input_proj"] = _conv_params(next(keys), mel_bins + 1, enc[0], ksize)
    p["down"] = []
    for i in range(len(enc) - 1):
        p["down"].append({
            "conv1": _conv_params(next(keys), enc[i], enc[i + 1], ksize),
            "conv2": _conv_params(next(keys), enc[i + 1], enc[i + 1], ksize),
            "res":   _conv_params(next(keys), enc[i], enc[i + 1], 1),
            "down":  _conv_params(next(keys), enc[i + 1], enc[i + 1], ksize),
        })
    p["bottleneck"] = {
        "conv1": _conv_params(next(keys), enc[-1], enc[-1], ksize),
        "conv2": _conv_params(next(keys), enc[-1], enc[-1], ksize),
    }
    p["up"] = []
    for i in range(len(dec)):
        c_in, c_out = enc[-i - 1], dec[i]
        p["up"].append({
            "conv1": _conv_params(next(keys), c_in, c_out, ksize),
            "conv2": _conv_params(next(keys), c_out, c_out, ksize),
            "res":   _conv_params(next(keys), c_in, c_out, 1),
        })
    p["pre_output"] = {
        "c1": _conv_params(next(keys), dec[-1], dec[-1], 1),
        "c2": _conv_params(next(keys), dec[-1], dec[-1], 1),
    }
    # ConvTranspose1d(dec[-1], 1, 2*hop): torch weight [Cin, 1, 2*hop] -> [Cin, 2*hop]
    kw, kb = jax.random.split(next(keys))
    bound = 1.0 / np.sqrt(dec[-1] * 2 * hop)
    p["upsampler"] = {
        "w": jax.random.uniform(kw, (dec[-1], 2 * hop), jnp.float32, -bound, bound),
        "b": jax.random.uniform(kb, (1,), jnp.float32, -bound, bound),
    }
    return p


def _pad_conv(p):
    """[K, Cin, Cout] -> lane-dense im2col weight [K*C_PAD, C_PAD] bf16
    plus [1, C_PAD] f32 bias (zero padding keeps padded channels exactly 0)."""
    w, b = p["w"], p["b"]
    K, ci, co = w.shape
    wp = jnp.zeros((K, C_PAD, C_PAD), jnp.float32).at[:, :ci, :co].set(w)
    bp = jnp.zeros((1, C_PAD), jnp.float32).at[0, :co].set(b)
    return {"w": wp.reshape(K * C_PAD, C_PAD).astype(MXU_DTYPE), "b": bp}


def prepare_params(params, hop):
    """One-time prep: zero-pad channels to C_PAD, flatten im2col weights,
    pre-cast MXU operands to bf16 (biases stay f32)."""
    out = {
        "input_proj": _pad_conv(params["input_proj"]),
        "down": [{k: _pad_conv(v) for k, v in blk.items()} for blk in params["down"]],
        "bottleneck": {k: _pad_conv(v) for k, v in params["bottleneck"].items()},
        "up": [{k: _pad_conv(v) for k, v in blk.items()} for blk in params["up"]],
        "pre_output": {k: _pad_conv(v) for k, v in params["pre_output"].items()},
    }
    wu = params["upsampler"]["w"]                       # [Cin, 2*hop]
    wu_pad = jnp.zeros((C_PAD, 2 * hop), jnp.float32).at[:wu.shape[0]].set(wu)
    out["upsampler"] = {
        "w1": wu_pad[:, :hop].astype(MXU_DTYPE),        # first half of each frame
        "w2": wu_pad[:, hop:].astype(MXU_DTYPE),        # second half (overlap)
        "b": params["upsampler"]["b"].reshape(1, 1),    # scalar bias (out_channels=1)
    }
    return out


# ----------------------------------------------------------------------------
# Forward pass (non-autoregressive, no F0 conditioning)
# ----------------------------------------------------------------------------
def unet_vocoder_forward(params, mel, noise, *, hop, ksize, enc, dec,
                         f0=None, use_f0=False):
    B, T, M = mel.shape
    Bn, Tn, Cn = noise.shape
    if Tn != T:
        if Tn % T == 0:
            factor = Tn // T
            noise = noise.reshape(Bn, T, factor, Cn).mean(axis=2)
        else:
            # TODO(synk): F.interpolate(mode='linear') noise-resampling branch not implemented
            raise NotImplementedError("linear-interp noise resampling")

    num_down = len(enc) - 1
    assert T % (2 ** num_down) == 0, "T must be divisible by 2**num_down"

    feats = [mel, noise]
    if use_f0:
        if f0 is None:
            raise ValueError("F0 conditioning enabled but f0 not provided")
        feats.append(f0)
    x = jnp.concatenate(feats, axis=-1)                       # [B, T, Cin]
    x = jnp.pad(x, ((0, 0), (0, 0), (0, C_PAD - x.shape[-1])))  # lane-dense

    x = _input_proj(x, params["input_proj"], ksize)

    # ---- encoder (fused ResidualDownBlock kernels) ----
    skips = []
    for i in range(num_down):
        skip, x = _down_block(x, params["down"][i], ksize)
        skips.append(skip)
    # TODO(synk): autoregressive GRU path (use_autoregressive=True) not implemented.

    # ---- bottleneck ----
    x = _bottleneck(x, params["bottleneck"], ksize)

    # ---- decoder: zip(up_blocks, reversed(skip_connections)), fused ----
    for i, skip in enumerate(reversed(skips)):
        x = _up_block(x, skip, params["up"][i], ksize)
    # TODO(synk): lazily-created non_adjacent_skips 1x1 convs (only active when
    # len(decoder_channels) >= 3) are not implemented; inactive for this config.

    # ---- pre-output 1x1 convs + ConvTranspose1d upsampler + tanh (fused) ----
    frames = _output_head(x, params["pre_output"], params["upsampler"], hop)
    wav = frames.reshape(B, (T + 1) * hop)[:, hop // 2: hop // 2 + T * hop]
    return wav[:, :, None]


# ----------------------------------------------------------------------------
if __name__ == "__main__":
    MEL_BINS = 10
    HOP = 8
    ENC = [16, 32, 48]   # encoder_channels
    DEC = [32, 16]       # decoder_channels (mirrors encoder[:-1] -> consistent wiring)
    KSIZE = 5
    B, T = 2, 16

    key = jax.random.PRNGKey(0)
    k_mel, k_noise, k_par = jax.random.split(key, 3)
    mel = jax.random.normal(k_mel, (B, T, MEL_BINS), jnp.float32)    # [B, T, M]
    noise = jax.random.normal(k_noise, (B, T, 1), jnp.float32)       # [B, T, 1]
    params = init_params(k_par, MEL_BINS, HOP, ENC, DEC, KSIZE)
    prepared = prepare_params(params, HOP)

    @jax.jit
    def run(p, mel_in, noise_in):
        return unet_vocoder_forward(p, mel_in, noise_in,
                                    hop=HOP, ksize=KSIZE, enc=ENC, dec=DEC)

    wav = jax.block_until_ready(run(prepared, mel, noise))
    assert wav.shape == (B, T * HOP, 1), wav.shape
    assert bool(jnp.all(jnp.isfinite(wav)))
    print("KERNEL_OK")
</pallas_src>

<mosaic_0001>
module attributes {stable_mosaic.version = 11 : i64} {
  func.func @kernel(%arg0: i32, %arg1: memref<1x16x128xf32, #tpu.memory_space<vmem>>, %arg2: memref<640x128xbf16, #tpu.memory_space<vmem>>, %arg3: memref<1x128xf32, #tpu.memory_space<vmem>>, %arg4: memref<1x16x128xf32, #tpu.memory_space<vmem>>, %arg5: memref<20x128xf32, #tpu.memory_space<vmem>>) attributes {dimension_semantics = [#tpu.dimension_semantics<parallel>], iteration_bounds = array<i64: 2>, scalar_prefetch = 0 : i64, scratch_operands = 1 : i64, tpu.core_type = #tpu.core_type<tc>, window_params = [{transform_indices = @transform_0, window_bounds = array<i64: 1, 16, 128>}, {pipeline_mode = #tpu.pipeline_mode<synchronous>, transform_indices = @transform_1, window_bounds = array<i64: 640, 128>}, {pipeline_mode = #tpu.pipeline_mode<synchronous>, transform_indices = @transform_2, window_bounds = array<i64: 1, 128>}, {transform_indices = @transform_3, window_bounds = array<i64: 1, 16, 128>}]} {
    %c0 = arith.constant 0 : index
    %c0_0 = arith.constant 0 : index
    %c0_1 = arith.constant 0 : index
    %0 = vector.load %arg1[%c0, %c0_0, %c0_1] : memref<1x16x128xf32, #tpu.memory_space<vmem>>, vector<1x16x128xf32>
    %1 = vector.shape_cast %0 : vector<1x16x128xf32> to vector<16x128xf32>
    %cst = arith.constant 0.000000e+00 : f32
    %2 = vector.broadcast %cst : f32 to vector<2x128xf32>
    %c0_2 = arith.constant 0 : index
    %c0_3 = arith.constant 0 : index
    %3 = vector.load %arg5[%c0_2, %c0_3] : memref<20x128xf32, #tpu.memory_space<vmem>>, vector<2x128xf32>
    tpu.vector_store %arg5[%c0_2, %c0_3], %2 {strides = array<i32>} : memref<20x128xf32, #tpu.memory_space<vmem>>, vector<2x128xf32>,
    %cst_4 = arith.constant 0.000000e+00 : f32
    %4 = vector.broadcast %cst_4 : f32 to vector<2x128xf32>
    %c18 = arith.constant 18 : index
    %c0_5 = arith.constant 0 : index
    %5 = vector.load %arg5[%c18, %c0_5] : memref<20x128xf32, #tpu.memory_space<vmem>>, vector<2x128xf32>
    tpu.vector_store %arg5[%c18, %c0_5], %4 {strides = array<i32>} : memref<20x128xf32, #tpu.memory_space<vmem>>, vector<2x128xf32>,
    %c2 = arith.constant 2 : index
    %c0_6 = arith.constant 0 : index
    %6 = vector.load %arg5[%c2, %c0_6] : memref<20x128xf32, #tpu.memory_space<vmem>>, vector<16x128xf32>
    tpu.vector_store %arg5[%c2, %c0_6], %1 {strides = array<i32>} : memref<20x128xf32, #tpu.memory_space<vmem>>, vector<16x128xf32>,
    %c0_7 = arith.constant 0 : index
    %c0_8 = arith.constant 0 : index
    %7 = vector.load %arg5[%c0_7, %c0_8] : memref<20x128xf32, #tpu.memory_space<vmem>>, vector<16x128xf32>
    %c1 = arith.constant 1 : index
    %c0_9 = arith.constant 0 : index
    %8 = vector.load %arg5[%c1, %c0_9] : memref<20x128xf32, #tpu.memory_space<vmem>>, vector<16x128xf32>
    %c2_10 = arith.constant 2 : index
    %c0_11 = arith.constant 0 : index
    %9 = vector.load %arg5[%c2_10, %c0_11] : memref<20x128xf32, #tpu.memory_space<vmem>>, vector<16x128xf32>
    %c3 = arith.constant 3 : index
    %c0_12 = arith.constant 0 : index
    %10 = vector.load %arg5[%c3, %c0_12] : memref<20x128xf32, #tpu.memory_space<vmem>>, vector<16x128xf32>
    %c4 = arith.constant 4 : index
    %c0_13 = arith.constant 0 : index
    %11 = vector.load %arg5[%c4, %c0_13] : memref<20x128xf32, #tpu.memory_space<vmem>>, vector<16x128xf32>
    %12 = tpu.concatenate %7, %8, %9, %10, %11 in 1 : vector<16x128xf32>, vector<16x128xf32>, vector<16x128xf32>, vector<16x128xf32>, vector<16x128xf32> -> vector<16x640xf32>
    %c0_14 = arith.constant 0 : index
    %c0_15 = arith.constant 0 : index
    %13 = vector.load %arg2[%c0_14, %c0_15] : memref<640x128xbf16, #tpu.memory_space<vmem>>, vector<640x128xbf16>
    %14 = arith.truncf %12 : vector<16x640xf32> to vector<16x640xbf16>
    %cst_16 = arith.constant dense<0.000000e+00> : vector<16x128xf32>
    %15 = tpu.matmul %14, %13, %cst_16 {dimension_numbers = #tpu.dot_dimension_numbers<[1], [0], [0], [1], [0, 0, 1, 1], [], []>} : vector<16x640xbf16>, vector<640x128xbf16>, vector<16x128xf32> -> vector<16x128xf32>
    %c0_17 = arith.constant 0 : index
    %c0_18 = arith.constant 0 : index
    %16 = vector.load %arg3[%c0_17, %c0_18] : memref<1x128xf32, #tpu.memory_space<vmem>>, vector<1x128xf32>
    %17 = vector.broadcast %16 : vector<1x128xf32> to vector<16x128xf32>
    %18 = arith.addf %15, %17 : vector<16x128xf32>
    %c0_19 = arith.constant 0 : index
    %c0_20 = arith.constant 0 : index
    %c0_21 = arith.constant 0 : index
    %19 = vector.load %arg4[%c0_19, %c0_20, %c0_21] : memref<1x16x128xf32, #tpu.memory_space<vmem>>, vector<1x16x128xf32>
    %20 = vector.shape_cast %19 : vector<1x16x128xf32> to vector<16x128xf32>
    %21 = vector.shape_cast %18 : vector<16x128xf32> to vector<1x16x128xf32>
    tpu.vector_store %arg4[%c0_19, %c0_20, %c0_21], %21 {strides = array<i32>} : memref<1x16x128xf32, #tpu.memory_space<vmem>>, vector<1x16x128xf32>,
    return
  }
  func.func @transform_0(%arg0: i32) -> (i32, i32, i32) {
    %c0_i32 = arith.constant 0 : i32
    %c0_i32_0 = arith.constant 0 : i32
    %c0_i32_1 = arith.constant 0 : i32
    return %arg0, %c0_i32, %c0_i32_0 : i32, i32, i32
  }
  func.func @transform_1(%arg0: i32) -> (i32, i32) {
    %c0_i32 = arith.constant 0 : i32
    %c0_i32_0 = arith.constant 0 : i32
    %c0_i32_1 = arith.constant 0 : i32
    return %c0_i32, %c0_i32_0 : i32, i32
  }
  func.func @transform_2(%arg0: i32) -> (i32, i32) {
    %c0_i32 = arith.constant 0 : i32
    %c0_i32_0 = arith.constant 0 : i32
    %c0_i32_1 = arith.constant 0 : i32
    return %c0_i32, %c0_i32_0 : i32, i32
  }
  func.func @transform_3(%arg0: i32) -> (i32, i32, i32) {
    %c0_i32 = arith.constant 0 : i32
    %c0_i32_0 = arith.constant 0 : i32
    %c0_i32_1 = arith.constant 0 : i32
    return %arg0, %c0_i32, %c0_i32_0 : i32, i32, i32
  }
}

module attributes {stable_mosaic.version = 11 : i64} {
  func.func @kernel(%arg0: i32, %arg1: memref<1x8x128xf32, #tpu.memory_space<vmem>>, %arg2: memref<640x128xbf16, #tpu.memory_space<vmem>>, %arg3: memref<1x128xf32, #tpu.memory_space<vmem>>, %arg4: memref<128x128xbf16, #tpu.memory_space<vmem>>, %arg5: memref<1x128xf32, #tpu.memory_space<vmem>>, %arg6: memref<640x128xbf16, #tpu.memory_space<vmem>>, %arg7: memref<1x128xf32, #tpu.memory_space<vmem>>, %arg8: memref<640x128xbf16, #tpu.memory_space<vmem>>, %arg9: memref<1x128xf32, #tpu.memory_space<vmem>>, %arg10: memref<1x8x128xf32, #tpu.memory_space<vmem>>, %arg11: memref<1x4x128xf32, #tpu.memory_space<vmem>>, %arg12: memref<12x128xf32, #tpu.memory_space<vmem>>) attributes {dimension_semantics = [#tpu.dimension_semantics<parallel>], iteration_bounds = array<i64: 2>, scalar_prefetch = 0 : i64, scratch_operands = 1 : i64, tpu.core_type = #tpu.core_type<tc>, window_params = [{transform_indices = @transform_0, window_bounds = array<i64: 1, 8, 128>}, {pipeline_mode = #tpu.pipeline_mode<synchronous>, transform_indices = @transform_1, window_bounds = array<i64: 640, 128>}, {pipeline_mode = #tpu.pipeline_mode<synchronous>, transform_indices = @transform_2, window_bounds = array<i64: 1, 128>}, {pipeline_mode = #tpu.pipeline_mode<synchronous>, transform_indices = @transform_3, window_bounds = array<i64: 128, 128>}, {pipeline_mode = #tpu.pipeline_mode<synchronous>, transform_indices = @transform_4, window_bounds = array<i64: 1, 128>}, {pipeline_mode = #tpu.pipeline_mode<synchronous>, transform_indices = @transform_5, window_bounds = array<i64: 640, 128>}, {pipeline_mode = #tpu.pipeline_mode<synchronous>, transform_indices = @transform_6, window_bounds = array<i64: 1, 128>}, {pipeline_mode = #tpu.pipeline_mode<synchronous>, transform_indices = @transform_7, window_bounds = array<i64: 640, 128>}, {pipeline_mode = #tpu.pipeline_mode<synchronous>, transform_indices = @transform_8, window_bounds = array<i64: 1, 128>}, {transform_indices = @transform_9, window_bounds = array<i64: 1, 8, 128>}, {transform_indices = @transform_10, window_bounds = array<i64: 1, 4, 128>}]} {
    %c0 = arith.constant 0 : index
    %c0_0 = arith.constant 0 : index
    %c0_1 = arith.constant 0 : index
    %0 = vector.load %arg1[%c0, %c0_0, %c0_1] : memref<1x8x128xf32, #tpu.memory_space<vmem>>, vector<1x8x128xf32>
    %1 = vector.shape_cast %0 : vector<1x8x128xf32> to vector<8x128xf32>
    %cst = arith.constant 0.000000e+00 : f32
    %2 = vector.broadcast %cst : f32 to vector<2x128xf32>
    %c0_2 = arith.constant 0 : index
    %c0_3 = arith.constant 0 : index
    %3 = vector.load %arg12[%c0_2, %c0_3] : memref<12x128xf32, #tpu.memory_space<vmem>>, vector<2x128xf32>
    tpu.vector_store %arg12[%c0_2, %c0_3], %2 {strides = array<i32>} : memref<12x128xf32, #tpu.memory_space<vmem>>, vector<2x128xf32>,
    %cst_4 = arith.constant 0.000000e+00 : f32
    %4 = vector.broadcast %cst_4 : f32 to vector<2x128xf32>
    %c10 = arith.constant 10 : index
    %c0_5 = arith.constant 0 : index
    %5 = vector.load %arg12[%c10, %c0_5] : memref<12x128xf32, #tpu.memory_space<vmem>>, vector<2x128xf32>
    tpu.vector_store %arg12[%c10, %c0_5], %4 {strides = array<i32>} : memref<12x128xf32, #tpu.memory_space<vmem>>, vector<2x128xf32>,
    %c2 = arith.constant 2 : index
    %c0_6 = arith.constant 0 : index
    %6 = vector.load %arg12[%c2, %c0_6] : memref<12x128xf32, #tpu.memory_space<vmem>>, vector<8x128xf32>
    tpu.vector_store %arg12[%c2, %c0_6], %1 {strides = array<i32>} : memref<12x128xf32, #tpu.memory_space<vmem>>, vector<8x128xf32>,
    %c0_7 = arith.constant 0 : index
    %c0_8 = arith.constant 0 : index
    %7 = vector.load %arg12[%c0_7, %c0_8] : memref<12x128xf32, #tpu.memory_space<vmem>>, vector<8x128xf32>
    %c1 = arith.constant 1 : index
    %c0_9 = arith.constant 0 : index
    %8 = vector.load %arg12[%c1, %c0_9] : memref<12x128xf32, #tpu.memory_space<vmem>>, vector<8x128xf32>
    %c2_10 = arith.constant 2 : index
    %c0_11 = arith.constant 0 : index
    %9 = vector.load %arg12[%c2_10, %c0_11] : memref<12x128xf32, #tpu.memory_space<vmem>>, vector<8x128xf32>
    %c3 = arith.constant 3 : index
    %c0_12 = arith.constant 0 : index
    %10 = vector.load %arg12[%c3, %c0_12] : memref<12x128xf32, #tpu.memory_space<vmem>>, vector<8x128xf32>
    %c4 = arith.constant 4 : index
    %c0_13 = arith.constant 0 : index
    %11 = vector.load %arg12[%c4, %c0_13] : memref<12x128xf32, #tpu.memory_space<vmem>>, vector<8x128xf32>
    %12 = tpu.concatenate %7, %8, %9, %10, %11 in 1 : vector<8x128xf32>, vector<8x128xf32>, vector<8x128xf32>, vector<8x128xf32>, vector<8x128xf32> -> vector<8x640xf32>
    %c0_14 = arith.constant 0 : index
    %c0_15 = arith.constant 0 : index
    %13 = vector.load %arg2[%c0_14, %c0_15] : memref<640x128xbf16, #tpu.memory_space<vmem>>, vector<640x128xbf16>
    %14 = arith.truncf %12 : vector<8x640xf32> to vector<8x640xbf16>
    %cst_16 = arith.constant dense<0.000000e+00> : vector<8x128xf32>
    %15 = tpu.matmul %14, %13, %cst_16 {dimension_numbers = #tpu.dot_dimension_numbers<[1], [0], [0], [1], [0, 0, 1, 1], [], []>} : vector<8x640xbf16>, vector<640x128xbf16>, vector<8x128xf32> -> vector<8x128xf32>
    %c0_17 = arith.constant 0 : index
    %c0_18 = arith.constant 0 : index
    %16 = vector.load %arg3[%c0_17, %c0_18] : memref<1x128xf32, #tpu.memory_space<vmem>>, vector<1x128xf32>
    %17 = vector.broadcast %16 : vector<1x128xf32> to vector<8x128xf32>
    %18 = arith.addf %15, %17 : vector<8x128xf32>
    %cst_19 = arith.constant 0.000000e+00 : f32
    %19 = vector.broadcast %cst_19 : f32 to vector<8x128xf32>
    %20 = arith.cmpf oge, %18, %19 : vector<8x128xf32>
    %cst_20 = arith.constant 2.000000e-01 : f32
    %21 = vector.broadcast %cst_20 : f32 to vector<8x128xf32>
    %22 = arith.mulf %21, %18 : vector<8x128xf32>
    %23 = arith.select %20, %18, %22 : vector<8x128xi1>, vector<8x128xf32>
    %c0_21 = arith.constant 0 : index
    %c0_22 = arith.constant 0 : index
    %24 = vector.load %arg4[%c0_21, %c0_22] : memref<128x128xbf16, #tpu.memory_space<vmem>>, vector<128x128xbf16>
    %25 = arith.truncf %1 : vector<8x128xf32> to vector<8x128xbf16>
    %cst_23 = arith.constant dense<0.000000e+00> : vector<8x128xf32>
    %26 = tpu.matmul %25, %24, %cst_23 {dimension_numbers = #tpu.dot_dimension_numbers<[1], [0], [0], [1], [0, 0, 1, 1], [], []>} : vector<8x128xbf16>, vector<128x128xbf16>, vector<8x128xf32> -> vector<8x128xf32>
    %c0_24 = arith.constant 0 : index
    %c0_25 = arith.constant 0 : index
    %27 = vector.load %arg5[%c0_24, %c0_25] : memref<1x128xf32, #tpu.memory_space<vmem>>, vector<1x128xf32>
    %28 = vector.broadcast %27 : vector<1x128xf32> to vector<8x128xf32>
    %29 = arith.addf %26, %28 : vector<8x128xf32>
    %cst_26 = arith.constant 0.000000e+00 : f32
    %30 = vector.broadcast %cst_26 : f32 to vector<2x128xf32>
    %c0_27 = arith.constant 0 : index
    %c0_28 = arith.constant 0 : index
    %31 = vector.load %arg12[%c0_27, %c0_28] : memref<12x128xf32, #tpu.memory_space<vmem>>, vector<2x128xf32>
    tpu.vector_store %arg12[%c0_27, %c0_28], %30 {strides = array<i32>} : memref<12x128xf32, #tpu.memory_space<vmem>>, vector<2x128xf32>,
    %cst_29 = arith.constant 0.000000e+00 : f32
    %32 = vector.broadcast %cst_29 : f32 to vector<2x128xf32>
    %c10_30 = arith.constant 10 : index
    %c0_31 = arith.constant 0 : index
    %33 = vector.load %arg12[%c10_30, %c0_31] : memref<12x128xf32, #tpu.memory_space<vmem>>, vector<2x128xf32>
    tpu.vector_store %arg12[%c10_30, %c0_31], %32 {strides = array<i32>} : memref<12x128xf32, #tpu.memory_space<vmem>>, vector<2x128xf32>,
    %c2_32 = arith.constant 2 : index
    %c0_33 = arith.constant 0 : index
    %34 = vector.load %arg12[%c2_32, %c0_33] : memref<12x128xf32, #tpu.memory_space<vmem>>, vector<8x128xf32>
    tpu.vector_store %arg12[%c2_32, %c0_33], %23 {strides = array<i32>} : memref<12x128xf32, #tpu.memory_space<vmem>>, vector<8x128xf32>,
    %c0_34 = arith.constant 0 : index
    %c0_35 = arith.constant 0 : index
    %35 = vector.load %arg12[%c0_34, %c0_35] : memref<12x128xf32, #tpu.memory_space<vmem>>, vector<8x128xf32>
    %c1_36 = arith.constant 1 : index
    %c0_37 = arith.constant 0 : index
    %36 = vector.load %arg12[%c1_36, %c0_37] : memref<12x128xf32, #tpu.memory_space<vmem>>, vector<8x128xf32>
    %c2_38 = arith.constant 2 : index
    %c0_39 = arith.constant 0 : index
    %37 = vector.load %arg12[%c2_38, %c0_39] : memref<12x128xf32, #tpu.memory_space<vmem>>, vector<8x128xf32>
    %c3_40 = arith.constant 3 : index
    %c0_41 = arith.constant 0 : index
    %38 = vector.load %arg12[%c3_40, %c0_41] : memref<12x128xf32, #tpu.memory_space<vmem>>, vector<8x128xf32>
    %c4_42 = arith.constant 4 : index
    %c0_43 = arith.constant 0 : index
    %39 = vector.load %arg12[%c4_42, %c0_43] : memref<12x128xf32, #tpu.memory_space<vmem>>, vector<8x128xf32>
    %40 = tpu.concatenate %35, %36, %37, %38, %39 in 1 : vector<8x128xf32>, vector<8x128xf32>, vector<8x128xf32>, vector<8x128xf32>, vector<8x128xf32> -> vector<8x640xf32>
    %c0_44 = arith.constant 0 : index
    %c0_45 = arith.constant 0 : index
    %41 = vector.load %arg6[%c0_44, %c0_45] : memref<640x128xbf16, #tpu.memory_space<vmem>>, vector<640x128xbf16>
    %42 = arith.truncf %40 : vector<8x640xf32> to vector<8x640xbf16>
    %cst_46 = arith.constant dense<0.000000e+00> : vector<8x128xf32>
    %43 = tpu.matmul %42, %41, %cst_46 {dimension_numbers = #tpu.dot_dimension_numbers<[1], [0], [0], [1], [0, 0, 1, 1], [], []>} : vector<8x640xbf16>, vector<640x128xbf16>, vector<8x128xf32> -> vector<8x128xf32>
    %c0_47 = arith.constant 0 : index
    %c0_48 = arith.constant 0 : index
    %44 = vector.load %arg7[%c0_47, %c0_48] : memref<1x128xf32, #tpu.memory_space<vmem>>, vector<1x128xf32>
    %45 = vector.broadcast %44 : vector<1x128xf32> to vector<8x128xf32>
    %46 = arith.addf %43, %45 : vector<8x128xf32>
    %47 = arith.addf %46, %29 : vector<8x128xf32>
    %cst_49 = arith.constant 0.000000e+00 : f32
    %48 = vector.broadcast %cst_49 : f32 to vector<8x128xf32>
    %49 = arith.cmpf oge, %47, %48 : vector<8x128xf32>
    %cst_50 = arith.constant 2.000000e-01 : f32
    %50 = vector.broadcast %cst_50 : f32 to vector<8x128xf32>
    %51 = arith.mulf %50, %47 : vector<8x128xf32>
    %52 = arith.select %49, %47, %51 : vector<8x128xi1>, vector<8x128xf32>
    %c0_51 = arith.constant 0 : index
    %c0_52 = arith.constant 0 : index
    %c0_53 = arith.constant 0 : index
    %53 = vector.load %arg10[%c0_51, %c0_52, %c0_53] : memref<1x8x128xf32, #tpu.memory_space<vmem>>, vector<1x8x128xf32>
    %54 = vector.shape_cast %53 : vector<1x8x128xf32> to vector<8x128xf32>
    %55 = vector.shape_cast %52 : vector<8x128xf32> to vector<1x8x128xf32>
    tpu.vector_store %arg10[%c0_51, %c0_52, %c0_53], %55 {strides = array<i32>} : memref<1x8x128xf32, #tpu.memory_space<vmem>>, vector<1x8x128xf32>,
    %cst_54 = arith.constant 0.000000e+00 : f32
    %56 = vector.broadcast %cst_54 : f32 to vector<2x128xf32>
    %c0_55 = arith.constant 0 : index
    %c0_56 = arith.constant 0 : index
    %57 = vector.load %arg12[%c0_55, %c0_56] : memref<12x128xf32, #tpu.memory_space<vmem>>, vector<2x128xf32>
    tpu.vector_store %arg12[%c0_55, %c0_56], %56 {strides = array<i32>} : memref<12x128xf32, #tpu.memory_space<vmem>>, vector<2x128xf32>,
    %cst_57 = arith.constant 0.000000e+00 : f32
    %58 = vector.broadcast %cst_57 : f32 to vector<2x128xf32>
    %c10_58 = arith.constant 10 : index
    %c0_59 = arith.constant 0 : index
    %59 = vector.load %arg12[%c10_58, %c0_59] : memref<12x128xf32, #tpu.memory_space<vmem>>, vector<2x128xf32>
    tpu.vector_store %arg12[%c10_58, %c0_59], %58 {strides = array<i32>} : memref<12x128xf32, #tpu.memory_space<vmem>>, vector<2x128xf32>,
    %c2_60 = arith.constant 2 : index
    %c0_61 = arith.constant 0 : index
    %60 = vector.load %arg12[%c2_60, %c0_61] : memref<12x128xf32, #tpu.memory_space<vmem>>, vector<8x128xf32>
    tpu.vector_store %arg12[%c2_60, %c0_61], %52 {strides = array<i32>} : memref<12x128xf32, #tpu.memory_space<vmem>>, vector<8x128xf32>,
    %c0_62 = arith.constant 0 : index
    %c0_63 = arith.constant 0 : index
    %61 = tpu.strided_load %arg12[%c0_62, %c0_63] {strides = array<i32: 2, 1>} : memref<12x128xf32, #tpu.memory_space<vmem>>, vector<4x128xf32>
    %c1_64 = arith.constant 1 : index
    %c0_65 = arith.constant 0 : index
    %62 = tpu.strided_load %arg12[%c1_64, %c0_65] {strides = array<i32: 2, 1>} : memref<12x128xf32, #tpu.memory_space<vmem>>, vector<4x128xf32>
    %c2_66 = arith.constant 2 : index
    %c0_67 = arith.constant 0 : index
    %63 = tpu.strided_load %arg12[%c2_66, %c0_67] {strides = array<i32: 2, 1>} : memref<12x128xf32, #tpu.memory_space<vmem>>, vector<4x128xf32>
    %c3_68 = arith.constant 3 : index
    %c0_69 = arith.constant 0 : index
    %64 = tpu.strided_load %arg12[%c3_68, %c0_69] {strides = array<i32: 2, 1>} : memref<12x128xf32, #tpu.memory_space<vmem>>, vector<4x128xf32>
    %c4_70 = arith.constant 4 : index
    %c0_71 = arith.constant 0 : index
    %65 = tpu.strided_load %arg12[%c4_70, %c0_71] {strides = array<i32: 2, 1>} : memref<12x128xf32, #tpu.memory_space<vmem>>, vector<4x128xf32>
    %66 = tpu.concatenate %61, %62, %63, %64, %65 in 1 : vector<4x128xf32>, vector<4x128xf32>, vector<4x128xf32>, vector<4x128xf32>, vector<4x128xf32> -> vector<4x640xf32>
    %c0_72 = arith.constant 0 : index
    %c0_73 = arith.constant 0 : index
    %67 = vector.load %arg8[%c0_72, %c0_73] : memref<640x128xbf16, #tpu.memory_space<vmem>>, vector<640x128xbf16>
    %68 = arith.truncf %66 : vector<4x640xf32> to vector<4x640xbf16>
    %cst_74 = arith.constant dense<0.000000e+00> : vector<4x128xf32>
    %69 = tpu.matmul %68, %67, %cst_74 {dimension_numbers = #tpu.dot_dimension_numbers<[1], [0], [0], [1], [0, 0, 1, 1], [], []>} : vector<4x640xbf16>, vector<640x128xbf16>, vector<4x128xf32> -> vector<4x128xf32>
    %c0_75 = arith.constant 0 : index
    %c0_76 = arith.constant 0 : index
    %70 = vector.load %arg9[%c0_75, %c0_76] : memref<1x128xf32, #tpu.memory_space<vmem>>, vector<1x128xf32>
    %71 = vector.broadcast %70 : vector<1x128xf32> to vector<4x128xf32>
    %72 = arith.addf %69, %71 : vector<4x128xf32>
    %c0_77 = arith.constant 0 : index
    %c0_78 = arith.constant 0 : index
    %c0_79 = arith.constant 0 : index
    %73 = vector.load %arg11[%c0_77, %c0_78, %c0_79] : memref<1x4x128xf32, #tpu.memory_space<vmem>>, vector<1x4x128xf32>
    %74 = vector.shape_cast %73 : vector<1x4x128xf32> to vector<4x128xf32>
    %75 = vector.shape_cast %72 : vector<4x128xf32> to vector<1x4x128xf32>
    tpu.vector_store %arg11[%c0_77, %c0_78, %c0_79], %75 {strides = array<i32>} : memref<1x4x128xf32, #tpu.memory_space<vmem>>, vector<1x4x128xf32>,
    return
  }
  func.func @transform_0(%arg0: i32) -> (i32, i32, i32) {
    %c0_i32 = arith.constant 0 : i32
    %c0_i32_0 = arith.constant 0 : i32
    %c0_i32_1 = arith.constant 0 : i32
    return %arg0, %c0_i32, %c0_i32_0 : i32, i32, i32
  }
  func.func @transform_1(%arg0: i32) -> (i32, i32) {
    %c0_i32 = arith.constant 0 : i32
    %c0_i32_0 = arith.constant 0 : i32
    %c0_i32_1 = arith.constant 0 : i32
    return %c0_i32, %c0_i32_0 : i32, i32
  }
  func.func @transform_2(%arg0: i32) -> (i32, i32) {
    %c0_i32 = arith.constant 0 : i32
    %c0_i32_0 = arith.constant 0 : i32
    %c0_i32_1 = arith.constant 0 : i32
    return %c0_i32, %c0_i32_0 : i32, i32
  }
  func.func @transform_3(%arg0: i32) -> (i32, i32) {
    %c0_i32 = arith.constant 0 : i32
    %c0_i32_0 = arith.constant 0 : i32
    %c0_i32_1 = arith.constant 0 : i32
    return %c0_i32, %c0_i32_0 : i32, i32
  }
  func.func @transform_4(%arg0: i32) -> (i32, i32) {
    %c0_i32 = arith.constant 0 : i32
    %c0_i32_0 = arith.constant 0 : i32
    %c0_i32_1 = arith.constant 0 : i32
    return %c0_i32, %c0_i32_0 : i32, i32
  }
  func.func @transform_5(%arg0: i32) -> (i32, i32) {
    %c0_i32 = arith.constant 0 : i32
    %c0_i32_0 = arith.constant 0 : i32
    %c0_i32_1 = arith.constant 0 : i32
    return %c0_i32, %c0_i32_0 : i32, i32
  }
  func.func @transform_6(%arg0: i32) -> (i32, i32) {
    %c0_i32 = arith.constant 0 : i32
    %c0_i32_0 = arith.constant 0 : i32
    %c0_i32_1 = arith.constant 0 : i32
    return %c0_i32, %c0_i32_0 : i32, i32
  }
  func.func @transform_7(%arg0: i32) -> (i32, i32) {
    %c0_i32 = arith.constant 0 : i32
    %c0_i32_0 = arith.constant 0 : i32
    %c0_i32_1 = arith.constant 0 : i32
    return %c0_i32, %c0_i32_0 : i32, i32
  }
  func.func @transform_8(%arg0: i32) -> (i32, i32) {
    %c0_i32 = arith.constant 0 : i32
    %c0_i32_0 = arith.constant 0 : i32
    %c0_i32_1 = arith.constant 0 : i32
    return %c0_i32, %c0_i32_0 : i32, i32
  }
  func.func @transform_9(%arg0: i32) -> (i32, i32, i32) {
    %c0_i32 = arith.constant 0 : i32
    %c0_i32_0 = arith.constant 0 : i32
    %c0_i32_1 = arith.constant 0 : i32
    return %arg0, %c0_i32, %c0_i32_0 : i32, i32, i32
  }
  func.func @transform_10(%arg0: i32) -> (i32, i32, i32) {
    %c0_i32 = arith.constant 0 : i32
    %c0_i32_0 = arith.constant 0 : i32
    %c0_i32_1 = arith.constant 0 : i32
    return %arg0, %c0_i32, %c0_i32_0 : i32, i32, i32
  }
}

module attributes {stable_mosaic.version = 11 : i64} {
  func.func @kernel(%arg0: i32, %arg1: memref<1x4x128xf32, #tpu.memory_space<vmem>>, %arg2: memref<640x128xbf16, #tpu.memory_space<vmem>>, %arg3: memref<1x128xf32, #tpu.memory_space<vmem>>, %arg4: memref<640x128xbf16, #tpu.memory_space<vmem>>, %arg5: memref<1x128xf32, #tpu.memory_space<vmem>>, %arg6: memref<1x4x128xf32, #tpu.memory_space<vmem>>, %arg7: memref<8x128xf32, #tpu.memory_space<vmem>>) attributes {dimension_semantics = [#tpu.dimension_semantics<parallel>], iteration_bounds = array<i64: 2>, scalar_prefetch = 0 : i64, scratch_operands = 1 : i64, tpu.core_type = #tpu.core_type<tc>, window_params = [{transform_indices = @transform_0, window_bounds = array<i64: 1, 4, 128>}, {pipeline_mode = #tpu.pipeline_mode<synchronous>, transform_indices = @transform_1, window_bounds = array<i64: 640, 128>}, {pipeline_mode = #tpu.pipeline_mode<synchronous>, transform_indices = @transform_2, window_bounds = array<i64: 1, 128>}, {pipeline_mode = #tpu.pipeline_mode<synchronous>, transform_indices = @transform_3, window_bounds = array<i64: 640, 128>}, {pipeline_mode = #tpu.pipeline_mode<synchronous>, transform_indices = @transform_4, window_bounds = array<i64: 1, 128>}, {transform_indices = @transform_5, window_bounds = array<i64: 1, 4, 128>}]} {
    %c0 = arith.constant 0 : index
    %c0_0 = arith.constant 0 : index
    %c0_1 = arith.constant 0 : index
    %0 = vector.load %arg1[%c0, %c0_0, %c0_1] : memref<1x4x128xf32, #tpu.memory_space<vmem>>, vector<1x4x128xf32>
    %1 = vector.shape_cast %0 : vector<1x4x128xf32> to vector<4x128xf32>
    %cst = arith.constant 0.000000e+00 : f32
    %2 = vector.broadcast %cst : f32 to vector<2x128xf32>
    %c0_2 = arith.constant 0 : index
    %c0_3 = arith.constant 0 : index
    %3 = vector.load %arg7[%c0_2, %c0_3] : memref<8x128xf32, #tpu.memory_space<vmem>>, vector<2x128xf32>
    tpu.vector_store %arg7[%c0_2, %c0_3], %2 {strides = array<i32>} : memref<8x128xf32, #tpu.memory_space<vmem>>, vector<2x128xf32>,
    %cst_4 = arith.constant 0.000000e+00 : f32
    %4 = vector.broadcast %cst_4 : f32 to vector<2x128xf32>
    %c6 = arith.constant 6 : index
    %c0_5 = arith.constant 0 : index
    %5 = vector.load %arg7[%c6, %c0_5] : memref<8x128xf32, #tpu.memory_space<vmem>>, vector<2x128xf32>
    tpu.vector_store %arg7[%c6, %c0_5], %4 {strides = array<i32>} : memref<8x128xf32, #tpu.memory_space<vmem>>, vector<2x128xf32>,
    %c2 = arith.constant 2 : index
    %c0_6 = arith.constant 0 : index
    %6 = vector.load %arg7[%c2, %c0_6] : memref<8x128xf32, #tpu.memory_space<vmem>>, vector<4x128xf32>
    tpu.vector_store %arg7[%c2, %c0_6], %1 {strides = array<i32>} : memref<8x128xf32, #tpu.memory_space<vmem>>, vector<4x128xf32>,
    %c0_7 = arith.constant 0 : index
    %c0_8 = arith.constant 0 : index
    %7 = vector.load %arg7[%c0_7, %c0_8] : memref<8x128xf32, #tpu.memory_space<vmem>>, vector<4x128xf32>
    %c1 = arith.constant 1 : index
    %c0_9 = arith.constant 0 : index
    %8 = vector.load %arg7[%c1, %c0_9] : memref<8x128xf32, #tpu.memory_space<vmem>>, vector<4x128xf32>
    %c2_10 = arith.constant 2 : index
    %c0_11 = arith.constant 0 : index
    %9 = vector.load %arg7[%c2_10, %c0_11] : memref<8x128xf32, #tpu.memory_space<vmem>>, vector<4x128xf32>
    %c3 = arith.constant 3 : index
    %c0_12 = arith.constant 0 : index
    %10 = vector.load %arg7[%c3, %c0_12] : memref<8x128xf32, #tpu.memory_space<vmem>>, vector<4x128xf32>
    %c4 = arith.constant 4 : index
    %c0_13 = arith.constant 0 : index
    %11 = vector.load %arg7[%c4, %c0_13] : memref<8x128xf32, #tpu.memory_space<vmem>>, vector<4x128xf32>
    %12 = tpu.concatenate %7, %8, %9, %10, %11 in 1 : vector<4x128xf32>, vector<4x128xf32>, vector<4x128xf32>, vector<4x128xf32>, vector<4x128xf32> -> vector<4x640xf32>
    %c0_14 = arith.constant 0 : index
    %c0_15 = arith.constant 0 : index
    %13 = vector.load %arg2[%c0_14, %c0_15] : memref<640x128xbf16, #tpu.memory_space<vmem>>, vector<640x128xbf16>
    %14 = arith.truncf %12 : vector<4x640xf32> to vector<4x640xbf16>
    %cst_16 = arith.constant dense<0.000000e+00> : vector<4x128xf32>
    %15 = tpu.matmul %14, %13, %cst_16 {dimension_numbers = #tpu.dot_dimension_numbers<[1], [0], [0], [1], [0, 0, 1, 1], [], []>} : vector<4x640xbf16>, vector<640x128xbf16>, vector<4x128xf32> -> vector<4x128xf32>
    %c0_17 = arith.constant 0 : index
    %c0_18 = arith.constant 0 : index
    %16 = vector.load %arg3[%c0_17, %c0_18] : memref<1x128xf32, #tpu.memory_space<vmem>>, vector<1x128xf32>
    %17 = vector.broadcast %16 : vector<1x128xf32> to vector<4x128xf32>
    %18 = arith.addf %15, %17 : vector<4x128xf32>
    %cst_19 = arith.constant 0.000000e+00 : f32
    %19 = vector.broadcast %cst_19 : f32 to vector<4x128xf32>
    %20 = arith.cmpf oge, %18, %19 : vector<4x128xf32>
    %cst_20 = arith.constant 2.000000e-01 : f32
    %21 = vector.broadcast %cst_20 : f32 to vector<4x128xf32>
    %22 = arith.mulf %21, %18 : vector<4x128xf32>
    %23 = arith.select %20, %18, %22 : vector<4x128xi1>, vector<4x128xf32>
    %cst_21 = arith.constant 0.000000e+00 : f32
    %24 = vector.broadcast %cst_21 : f32 to vector<2x128xf32>
    %c0_22 = arith.constant 0 : index
    %c0_23 = arith.constant 0 : index
    %25 = vector.load %arg7[%c0_22, %c0_23] : memref<8x128xf32, #tpu.memory_space<vmem>>, vector<2x128xf32>
    tpu.vector_store %arg7[%c0_22, %c0_23], %24 {strides = array<i32>} : memref<8x128xf32, #tpu.memory_space<vmem>>, vector<2x128xf32>,
    %cst_24 = arith.constant 0.000000e+00 : f32
    %26 = vector.broadcast %cst_24 : f32 to vector<2x128xf32>
    %c6_25 = arith.constant 6 : index
    %c0_26 = arith.constant 0 : index
    %27 = vector.load %arg7[%c6_25, %c0_26] : memref<8x128xf32, #tpu.memory_space<vmem>>, vector<2x128xf32>
    tpu.vector_store %arg7[%c6_25, %c0_26], %26 {strides = array<i32>} : memref<8x128xf32, #tpu.memory_space<vmem>>, vector<2x128xf32>,
    %c2_27 = arith.constant 2 : index
    %c0_28 = arith.constant 0 : index
    %28 = vector.load %arg7[%c2_27, %c0_28] : memref<8x128xf32, #tpu.memory_space<vmem>>, vector<4x128xf32>
    tpu.vector_store %arg7[%c2_27, %c0_28], %23 {strides = array<i32>} : memref<8x128xf32, #tpu.memory_space<vmem>>, vector<4x128xf32>,
    %c0_29 = arith.constant 0 : index
    %c0_30 = arith.constant 0 : index
    %29 = vector.load %arg7[%c0_29, %c0_30] : memref<8x128xf32, #tpu.memory_space<vmem>>, vector<4x128xf32>
    %c1_31 = arith.constant 1 : index
    %c0_32 = arith.constant 0 : index
    %30 = vector.load %arg7[%c1_31, %c0_32] : memref<8x128xf32, #tpu.memory_space<vmem>>, vector<4x128xf32>
    %c2_33 = arith.constant 2 : index
    %c0_34 = arith.constant 0 : index
    %31 = vector.load %arg7[%c2_33, %c0_34] : memref<8x128xf32, #tpu.memory_space<vmem>>, vector<4x128xf32>
    %c3_35 = arith.constant 3 : index
    %c0_36 = arith.constant 0 : index
    %32 = vector.load %arg7[%c3_35, %c0_36] : memref<8x128xf32, #tpu.memory_space<vmem>>, vector<4x128xf32>
    %c4_37 = arith.constant 4 : index
    %c0_38 = arith.constant 0 : index
    %33 = vector.load %arg7[%c4_37, %c0_38] : memref<8x128xf32, #tpu.memory_space<vmem>>, vector<4x128xf32>
    %34 = tpu.concatenate %29, %30, %31, %32, %33 in 1 : vector<4x128xf32>, vector<4x128xf32>, vector<4x128xf32>, vector<4x128xf32>, vector<4x128xf32> -> vector<4x640xf32>
    %c0_39 = arith.constant 0 : index
    %c0_40 = arith.constant 0 : index
    %35 = vector.load %arg4[%c0_39, %c0_40] : memref<640x128xbf16, #tpu.memory_space<vmem>>, vector<640x128xbf16>
    %36 = arith.truncf %34 : vector<4x640xf32> to vector<4x640xbf16>
    %cst_41 = arith.constant dense<0.000000e+00> : vector<4x128xf32>
    %37 = tpu.matmul %36, %35, %cst_41 {dimension_numbers = #tpu.dot_dimension_numbers<[1], [0], [0], [1], [0, 0, 1, 1], [], []>} : vector<4x640xbf16>, vector<640x128xbf16>, vector<4x128xf32> -> vector<4x128xf32>
    %c0_42 = arith.constant 0 : index
    %c0_43 = arith.constant 0 : index
    %38 = vector.load %arg5[%c0_42, %c0_43] : memref<1x128xf32, #tpu.memory_space<vmem>>, vector<1x128xf32>
    %39 = vector.broadcast %38 : vector<1x128xf32> to vector<4x128xf32>
    %40 = arith.addf %37, %39 : vector<4x128xf32>
    %41 = arith.addf %40, %1 : vector<4x128xf32>
    %cst_44 = arith.constant 0.000000e+00 : f32
    %42 = vector.broadcast %cst_44 : f32 to vector<4x128xf32>
    %43 = arith.cmpf oge, %41, %42 : vector<4x128xf32>
    %cst_45 = arith.constant 2.000000e-01 : f32
    %44 = vector.broadcast %cst_45 : f32 to vector<4x128xf32>
    %45 = arith.mulf %44, %41 : vector<4x128xf32>
    %46 = arith.select %43, %41, %45 : vector<4x128xi1>, vector<4x128xf32>
    %c0_46 = arith.constant 0 : index
    %c0_47 = arith.constant 0 : index
    %c0_48 = arith.constant 0 : index
    %47 = vector.load %arg6[%c0_46, %c0_47, %c0_48] : memref<1x4x128xf32, #tpu.memory_space<vmem>>, vector<1x4x128xf32>
    %48 = vector.shape_cast %47 : vector<1x4x128xf32> to vector<4x128xf32>
    %49 = vector.shape_cast %46 : vector<4x128xf32> to vector<1x4x128xf32>
    tpu.vector_store %arg6[%c0_46, %c0_47, %c0_48], %49 {strides = array<i32>} : memref<1x4x128xf32, #tpu.memory_space<vmem>>, vector<1x4x128xf32>,
    return
  }
  func.func @transform_0(%arg0: i32) -> (i32, i32, i32) {
    %c0_i32 = arith.constant 0 : i32
    %c0_i32_0 = arith.constant 0 : i32
    %c0_i32_1 = arith.constant 0 : i32
    return %arg0, %c0_i32, %c0_i32_0 : i32, i32, i32
  }
  func.func @transform_1(%arg0: i32) -> (i32, i32) {
    %c0_i32 = arith.constant 0 : i32
    %c0_i32_0 = arith.constant 0 : i32
    %c0_i32_1 = arith.constant 0 : i32
    return %c0_i32, %c0_i32_0 : i32, i32
  }
  func.func @transform_2(%arg0: i32) -> (i32, i32) {
    %c0_i32 = arith.constant 0 : i32
    %c0_i32_0 = arith.constant 0 : i32
    %c0_i32_1 = arith.constant 0 : i32
    return %c0_i32, %c0_i32_0 : i32, i32
  }
  func.func @transform_3(%arg0: i32) -> (i32, i32) {
    %c0_i32 = arith.constant 0 : i32
    %c0_i32_0 = arith.constant 0 : i32
    %c0_i32_1 = arith.constant 0 : i32
    return %c0_i32, %c0_i32_0 : i32, i32
  }
  func.func @transform_4(%arg0: i32) -> (i32, i32) {
    %c0_i32 = arith.constant 0 : i32
    %c0_i32_0 = arith.constant 0 : i32
    %c0_i32_1 = arith.constant 0 : i32
    return %c0_i32, %c0_i32_0 : i32, i32
  }
  func.func @transform_5(%arg0: i32) -> (i32, i32, i32) {
    %c0_i32 = arith.constant 0 : i32
    %c0_i32_0 = arith.constant 0 : i32
    %c0_i32_1 = arith.constant 0 : i32
    return %arg0, %c0_i32, %c0_i32_0 : i32, i32, i32
  }
}

module attributes {stable_mosaic.version = 11 : i64} {
  func.func @kernel(%arg0: i32, %arg1: memref<1x16x128xf32, #tpu.memory_space<vmem>>, %arg2: memref<640x128xbf16, #tpu.memory_space<vmem>>, %arg3: memref<1x128xf32, #tpu.memory_space<vmem>>, %arg4: memref<128x128xbf16, #tpu.memory_space<vmem>>, %arg5: memref<1x128xf32, #tpu.memory_space<vmem>>, %arg6: memref<640x128xbf16, #tpu.memory_space<vmem>>, %arg7: memref<1x128xf32, #tpu.memory_space<vmem>>, %arg8: memref<640x128xbf16, #tpu.memory_space<vmem>>, %arg9: memref<1x128xf32, #tpu.memory_space<vmem>>, %arg10: memref<1x16x128xf32, #tpu.memory_space<vmem>>, %arg11: memref<1x8x128xf32, #tpu.memory_space<vmem>>, %arg12: memref<20x128xf32, #tpu.memory_space<vmem>>) attributes {dimension_semantics = [#tpu.dimension_semantics<parallel>], iteration_bounds = array<i64: 2>, scalar_prefetch = 0 : i64, scratch_operands = 1 : i64, tpu.core_type = #tpu.core_type<tc>, window_params = [{transform_indices = @transform_0, window_bounds = array<i64: 1, 16, 128>}, {pipeline_mode = #tpu.pipeline_mode<synchronous>, transform_indices = @transform_1, window_bounds = array<i64: 640, 128>}, {pipeline_mode = #tpu.pipeline_mode<synchronous>, transform_indices = @transform_2, window_bounds = array<i64: 1, 128>}, {pipeline_mode = #tpu.pipeline_mode<synchronous>, transform_indices = @transform_3, window_bounds = array<i64: 128, 128>}, {pipeline_mode = #tpu.pipeline_mode<synchronous>, transform_indices = @transform_4, window_bounds = array<i64: 1, 128>}, {pipeline_mode = #tpu.pipeline_mode<synchronous>, transform_indices = @transform_5, window_bounds = array<i64: 640, 128>}, {pipeline_mode = #tpu.pipeline_mode<synchronous>, transform_indices = @transform_6, window_bounds = array<i64: 1, 128>}, {pipeline_mode = #tpu.pipeline_mode<synchronous>, transform_indices = @transform_7, window_bounds = array<i64: 640, 128>}, {pipeline_mode = #tpu.pipeline_mode<synchronous>, transform_indices = @transform_8, window_bounds = array<i64: 1, 128>}, {transform_indices = @transform_9, window_bounds = array<i64: 1, 16, 128>}, {transform_indices = @transform_10, window_bounds = array<i64: 1, 8, 128>}]} {
    %c0 = arith.constant 0 : index
    %c0_0 = arith.constant 0 : index
    %c0_1 = arith.constant 0 : index
    %0 = vector.load %arg1[%c0, %c0_0, %c0_1] : memref<1x16x128xf32, #tpu.memory_space<vmem>>, vector<1x16x128xf32>
    %1 = vector.shape_cast %0 : vector<1x16x128xf32> to vector<16x128xf32>
    %cst = arith.constant 0.000000e+00 : f32
    %2 = vector.broadcast %cst : f32 to vector<2x128xf32>
    %c0_2 = arith.constant 0 : index
    %c0_3 = arith.constant 0 : index
    %3 = vector.load %arg12[%c0_2, %c0_3] : memref<20x128xf32, #tpu.memory_space<vmem>>, vector<2x128xf32>
    tpu.vector_store %arg12[%c0_2, %c0_3], %2 {strides = array<i32>} : memref<20x128xf32, #tpu.memory_space<vmem>>, vector<2x128xf32>,
    %cst_4 = arith.constant 0.000000e+00 : f32
    %4 = vector.broadcast %cst_4 : f32 to vector<2x128xf32>
    %c18 = arith.constant 18 : index
    %c0_5 = arith.constant 0 : index
    %5 = vector.load %arg12[%c18, %c0_5] : memref<20x128xf32, #tpu.memory_space<vmem>>, vector<2x128xf32>
    tpu.vector_store %arg12[%c18, %c0_5], %4 {strides = array<i32>} : memref<20x128xf32, #tpu.memory_space<vmem>>, vector<2x128xf32>,
    %c2 = arith.constant 2 : index
    %c0_6 = arith.constant 0 : index
    %6 = vector.load %arg12[%c2, %c0_6] : memref<20x128xf32, #tpu.memory_space<vmem>>, vector<16x128xf32>
    tpu.vector_store %arg12[%c2, %c0_6], %1 {strides = array<i32>} : memref<20x128xf32, #tpu.memory_space<vmem>>, vector<16x128xf32>,
    %c0_7 = arith.constant 0 : index
    %c0_8 = arith.constant 0 : index
    %7 = vector.load %arg12[%c0_7, %c0_8] : memref<20x128xf32, #tpu.memory_space<vmem>>, vector<16x128xf32>
    %c1 = arith.constant 1 : index
    %c0_9 = arith.constant 0 : index
    %8 = vector.load %arg12[%c1, %c0_9] : memref<20x128xf32, #tpu.memory_space<vmem>>, vector<16x128xf32>
    %c2_10 = arith.constant 2 : index
    %c0_11 = arith.constant 0 : index
    %9 = vector.load %arg12[%c2_10, %c0_11] : memref<20x128xf32, #tpu.memory_space<vmem>>, vector<16x128xf32>
    %c3 = arith.constant 3 : index
    %c0_12 = arith.constant 0 : index
    %10 = vector.load %arg12[%c3, %c0_12] : memref<20x128xf32, #tpu.memory_space<vmem>>, vector<16x128xf32>
    %c4 = arith.constant 4 : index
    %c0_13 = arith.constant 0 : index
    %11 = vector.load %arg12[%c4, %c0_13] : memref<20x128xf32, #tpu.memory_space<vmem>>, vector<16x128xf32>
    %12 = tpu.concatenate %7, %8, %9, %10, %11 in 1 : vector<16x128xf32>, vector<16x128xf32>, vector<16x128xf32>, vector<16x128xf32>, vector<16x128xf32> -> vector<16x640xf32>
    %c0_14 = arith.constant 0 : index
    %c0_15 = arith.constant 0 : index
    %13 = vector.load %arg2[%c0_14, %c0_15] : memref<640x128xbf16, #tpu.memory_space<vmem>>, vector<640x128xbf16>
    %14 = arith.truncf %12 : vector<16x640xf32> to vector<16x640xbf16>
    %cst_16 = arith.constant dense<0.000000e+00> : vector<16x128xf32>
    %15 = tpu.matmul %14, %13, %cst_16 {dimension_numbers = #tpu.dot_dimension_numbers<[1], [0], [0], [1], [0, 0, 1, 1], [], []>} : vector<16x640xbf16>, vector<640x128xbf16>, vector<16x128xf32> -> vector<16x128xf32>
    %c0_17 = arith.constant 0 : index
    %c0_18 = arith.constant 0 : index
    %16 = vector.load %arg3[%c0_17, %c0_18] : memref<1x128xf32, #tpu.memory_space<vmem>>, vector<1x128xf32>
    %17 = vector.broadcast %16 : vector<1x128xf32> to vector<16x128xf32>
    %18 = arith.addf %15, %17 : vector<16x128xf32>
    %cst_19 = arith.constant 0.000000e+00 : f32
    %19 = vector.broadcast %cst_19 : f32 to vector<16x128xf32>
    %20 = arith.cmpf oge, %18, %19 : vector<16x128xf32>
    %cst_20 = arith.constant 2.000000e-01 : f32
    %21 = vector.broadcast %cst_20 : f32 to vector<16x128xf32>
    %22 = arith.mulf %21, %18 : vector<16x128xf32>
    %23 = arith.select %20, %18, %22 : vector<16x128xi1>, vector<16x128xf32>
    %c0_21 = arith.constant 0 : index
    %c0_22 = arith.constant 0 : index
    %24 = vector.load %arg4[%c0_21, %c0_22] : memref<128x128xbf16, #tpu.memory_space<vmem>>, vector<128x128xbf16>
    %25 = arith.truncf %1 : vector<16x128xf32> to vector<16x128xbf16>
    %cst_23 = arith.constant dense<0.000000e+00> : vector<16x128xf32>
    %26 = tpu.matmul %25, %24, %cst_23 {dimension_numbers = #tpu.dot_dimension_numbers<[1], [0], [0], [1], [0, 0, 1, 1], [], []>} : vector<16x128xbf16>, vector<128x128xbf16>, vector<16x128xf32> -> vector<16x128xf32>
    %c0_24 = arith.constant 0 : index
    %c0_25 = arith.constant 0 : index
    %27 = vector.load %arg5[%c0_24, %c0_25] : memref<1x128xf32, #tpu.memory_space<vmem>>, vector<1x128xf32>
    %28 = vector.broadcast %27 : vector<1x128xf32> to vector<16x128xf32>
    %29 = arith.addf %26, %28 : vector<16x128xf32>
    %cst_26 = arith.constant 0.000000e+00 : f32
    %30 = vector.broadcast %cst_26 : f32 to vector<2x128xf32>
    %c0_27 = arith.constant 0 : index
    %c0_28 = arith.constant 0 : index
    %31 = vector.load %arg12[%c0_27, %c0_28] : memref<20x128xf32, #tpu.memory_space<vmem>>, vector<2x128xf32>
    tpu.vector_store %arg12[%c0_27, %c0_28], %30 {strides = array<i32>} : memref<20x128xf32, #tpu.memory_space<vmem>>, vector<2x128xf32>,
    %cst_29 = arith.constant 0.000000e+00 : f32
    %32 = vector.broadcast %cst_29 : f32 to vector<2x128xf32>
    %c18_30 = arith.constant 18 : index
    %c0_31 = arith.constant 0 : index
    %33 = vector.load %arg12[%c18_30, %c0_31] : memref<20x128xf32, #tpu.memory_space<vmem>>, vector<2x128xf32>
    tpu.vector_store %arg12[%c18_30, %c0_31], %32 {strides = array<i32>} : memref<20x128xf32, #tpu.memory_space<vmem>>, vector<2x128xf32>,
    %c2_32 = arith.constant 2 : index
    %c0_33 = arith.constant 0 : index
    %34 = vector.load %arg12[%c2_32, %c0_33] : memref<20x128xf32, #tpu.memory_space<vmem>>, vector<16x128xf32>
    tpu.vector_store %arg12[%c2_32, %c0_33], %23 {strides = array<i32>} : memref<20x128xf32, #tpu.memory_space<vmem>>, vector<16x128xf32>,
    %c0_34 = arith.constant 0 : index
    %c0_35 = arith.constant 0 : index
    %35 = vector.load %arg12[%c0_34, %c0_35] : memref<20x128xf32, #tpu.memory_space<vmem>>, vector<16x128xf32>
    %c1_36 = arith.constant 1 : index
    %c0_37 = arith.constant 0 : index
    %36 = vector.load %arg12[%c1_36, %c0_37] : memref<20x128xf32, #tpu.memory_space<vmem>>, vector<16x128xf32>
    %c2_38 = arith.constant 2 : index
    %c0_39 = arith.constant 0 : index
    %37 = vector.load %arg12[%c2_38, %c0_39] : memref<20x128xf32, #tpu.memory_space<vmem>>, vector<16x128xf32>
    %c3_40 = arith.constant 3 : index
    %c0_41 = arith.constant 0 : index
    %38 = vector.load %arg12[%c3_40, %c0_41] : memref<20x128xf32, #tpu.memory_space<vmem>>, vector<16x128xf32>
    %c4_42 = arith.constant 4 : index
    %c0_43 = arith.constant 0 : index
    %39 = vector.load %arg12[%c4_42, %c0_43] : memref<20x128xf32, #tpu.memory_space<vmem>>, vector<16x128xf32>
    %40 = tpu.concatenate %35, %36, %37, %38, %39 in 1 : vector<16x128xf32>, vector<16x128xf32>, vector<16x128xf32>, vector<16x128xf32>, vector<16x128xf32> -> vector<16x640xf32>
    %c0_44 = arith.constant 0 : index
    %c0_45 = arith.constant 0 : index
    %41 = vector.load %arg6[%c0_44, %c0_45] : memref<640x128xbf16, #tpu.memory_space<vmem>>, vector<640x128xbf16>
    %42 = arith.truncf %40 : vector<16x640xf32> to vector<16x640xbf16>
    %cst_46 = arith.constant dense<0.000000e+00> : vector<16x128xf32>
    %43 = tpu.matmul %42, %41, %cst_46 {dimension_numbers = #tpu.dot_dimension_numbers<[1], [0], [0], [1], [0, 0, 1, 1], [], []>} : vector<16x640xbf16>, vector<640x128xbf16>, vector<16x128xf32> -> vector<16x128xf32>
    %c0_47 = arith.constant 0 : index
    %c0_48 = arith.constant 0 : index
    %44 = vector.load %arg7[%c0_47, %c0_48] : memref<1x128xf32, #tpu.memory_space<vmem>>, vector<1x128xf32>
    %45 = vector.broadcast %44 : vector<1x128xf32> to vector<16x128xf32>
    %46 = arith.addf %43, %45 : vector<16x128xf32>
    %47 = arith.addf %46, %29 : vector<16x128xf32>
    %cst_49 = arith.constant 0.000000e+00 : f32
    %48 = vector.broadcast %cst_49 : f32 to vector<16x128xf32>
    %49 = arith.cmpf oge, %47, %48 : vector<16x128xf32>
    %cst_50 = arith.constant 2.000000e-01 : f32
    %50 = vector.broadcast %cst_50 : f32 to vector<16x128xf32>
    %51 = arith.mulf %50, %47 : vector<16x128xf32>
    %52 = arith.select %49, %47, %51 : vector<16x128xi1>, vector<16x128xf32>
    %c0_51 = arith.constant 0 : index
    %c0_52 = arith.constant 0 : index
    %c0_53 = arith.constant 0 : index
    %53 = vector.load %arg10[%c0_51, %c0_52, %c0_53] : memref<1x16x128xf32, #tpu.memory_space<vmem>>, vector<1x16x128xf32>
    %54 = vector.shape_cast %53 : vector<1x16x128xf32> to vector<16x128xf32>
    %55 = vector.shape_cast %52 : vector<16x128xf32> to vector<1x16x128xf32>
    tpu.vector_store %arg10[%c0_51, %c0_52, %c0_53], %55 {strides = array<i32>} : memref<1x16x128xf32, #tpu.memory_space<vmem>>, vector<1x16x128xf32>,
    %cst_54 = arith.constant 0.000000e+00 : f32
    %56 = vector.broadcast %cst_54 : f32 to vector<2x128xf32>
    %c0_55 = arith.constant 0 : index
    %c0_56 = arith.constant 0 : index
    %57 = vector.load %arg12[%c0_55, %c0_56] : memref<20x128xf32, #tpu.memory_space<vmem>>, vector<2x128xf32>
    tpu.vector_store %arg12[%c0_55, %c0_56], %56 {strides = array<i32>} : memref<20x128xf32, #tpu.memory_space<vmem>>, vector<2x128xf32>,
    %cst_57 = arith.constant 0.000000e+00 : f32
    %58 = vector.broadcast %cst_57 : f32 to vector<2x128xf32>
    %c18_58 = arith.constant 18 : index
    %c0_59 = arith.constant 0 : index
    %59 = vector.load %arg12[%c18_58, %c0_59] : memref<20x128xf32, #tpu.memory_space<vmem>>, vector<2x128xf32>
    tpu.vector_store %arg12[%c18_58, %c0_59], %58 {strides = array<i32>} : memref<20x128xf32, #tpu.memory_space<vmem>>, vector<2x128xf32>,
    %c2_60 = arith.constant 2 : index
    %c0_61 = arith.constant 0 : index
    %60 = vector.load %arg12[%c2_60, %c0_61] : memref<20x128xf32, #tpu.memory_space<vmem>>, vector<16x128xf32>
    tpu.vector_store %arg12[%c2_60, %c0_61], %52 {strides = array<i32>} : memref<20x128xf32, #tpu.memory_space<vmem>>, vector<16x128xf32>,
    %c0_62 = arith.constant 0 : index
    %c0_63 = arith.constant 0 : index
    %61 = tpu.strided_load %arg12[%c0_62, %c0_63] {strides = array<i32: 2, 1>} : memref<20x128xf32, #tpu.memory_space<vmem>>, vector<8x128xf32>
    %c1_64 = arith.constant 1 : index
    %c0_65 = arith.constant 0 : index
    %62 = tpu.strided_load %arg12[%c1_64, %c0_65] {strides = array<i32: 2, 1>} : memref<20x128xf32, #tpu.memory_space<vmem>>, vector<8x128xf32>
    %c2_66 = arith.constant 2 : index
    %c0_67 = arith.constant 0 : index
    %63 = tpu.strided_load %arg12[%c2_66, %c0_67] {strides = array<i32: 2, 1>} : memref<20x128xf32, #tpu.memory_space<vmem>>, vector<8x128xf32>
    %c3_68 = arith.constant 3 : index
    %c0_69 = arith.constant 0 : index
    %64 = tpu.strided_load %arg12[%c3_68, %c0_69] {strides = array<i32: 2, 1>} : memref<20x128xf32, #tpu.memory_space<vmem>>, vector<8x128xf32>
    %c4_70 = arith.constant 4 : index
    %c0_71 = arith.constant 0 : index
    %65 = tpu.strided_load %arg12[%c4_70, %c0_71] {strides = array<i32: 2, 1>} : memref<20x128xf32, #tpu.memory_space<vmem>>, vector<8x128xf32>
    %66 = tpu.concatenate %61, %62, %63, %64, %65 in 1 : vector<8x128xf32>, vector<8x128xf32>, vector<8x128xf32>, vector<8x128xf32>, vector<8x128xf32> -> vector<8x640xf32>
    %c0_72 = arith.constant 0 : index
    %c0_73 = arith.constant 0 : index
    %67 = vector.load %arg8[%c0_72, %c0_73] : memref<640x128xbf16, #tpu.memory_space<vmem>>, vector<640x128xbf16>
    %68 = arith.truncf %66 : vector<8x640xf32> to vector<8x640xbf16>
    %cst_74 = arith.constant dense<0.000000e+00> : vector<8x128xf32>
    %69 = tpu.matmul %68, %67, %cst_74 {dimension_numbers = #tpu.dot_dimension_numbers<[1], [0], [0], [1], [0, 0, 1, 1], [], []>} : vector<8x640xbf16>, vector<640x128xbf16>, vector<8x128xf32> -> vector<8x128xf32>
    %c0_75 = arith.constant 0 : index
    %c0_76 = arith.constant 0 : index
    %70 = vector.load %arg9[%c0_75, %c0_76] : memref<1x128xf32, #tpu.memory_space<vmem>>, vector<1x128xf32>
    %71 = vector.broadcast %70 : vector<1x128xf32> to vector<8x128xf32>
    %72 = arith.addf %69, %71 : vector<8x128xf32>
    %c0_77 = arith.constant 0 : index
    %c0_78 = arith.constant 0 : index
    %c0_79 = arith.constant 0 : index
    %73 = vector.load %arg11[%c0_77, %c0_78, %c0_79] : memref<1x8x128xf32, #tpu.memory_space<vmem>>, vector<1x8x128xf32>
    %74 = vector.shape_cast %73 : vector<1x8x128xf32> to vector<8x128xf32>
    %75 = vector.shape_cast %72 : vector<8x128xf32> to vector<1x8x128xf32>
    tpu.vector_store %arg11[%c0_77, %c0_78, %c0_79], %75 {strides = array<i32>} : memref<1x8x128xf32, #tpu.memory_space<vmem>>, vector<1x8x128xf32>,
    return
  }
  func.func @transform_0(%arg0: i32) -> (i32, i32, i32) {
    %c0_i32 = arith.constant 0 : i32
    %c0_i32_0 = arith.constant 0 : i32
    %c0_i32_1 = arith.constant 0 : i32
    return %arg0, %c0_i32, %c0_i32_0 : i32, i32, i32
  }
  func.func @transform_1(%arg0: i32) -> (i32, i32) {
    %c0_i32 = arith.constant 0 : i32
    %c0_i32_0 = arith.constant 0 : i32
    %c0_i32_1 = arith.constant 0 : i32
    return %c0_i32, %c0_i32_0 : i32, i32
  }
  func.func @transform_2(%arg0: i32) -> (i32, i32) {
    %c0_i32 = arith.constant 0 : i32
    %c0_i32_0 = arith.constant 0 : i32
    %c0_i32_1 = arith.constant 0 : i32
    return %c0_i32, %c0_i32_0 : i32, i32
  }
  func.func @transform_3(%arg0: i32) -> (i32, i32) {
    %c0_i32 = arith.constant 0 : i32
    %c0_i32_0 = arith.constant 0 : i32
    %c0_i32_1 = arith.constant 0 : i32
    return %c0_i32, %c0_i32_0 : i32, i32
  }
  func.func @transform_4(%arg0: i32) -> (i32, i32) {
    %c0_i32 = arith.constant 0 : i32
    %c0_i32_0 = arith.constant 0 : i32
    %c0_i32_1 = arith.constant 0 : i32
    return %c0_i32, %c0_i32_0 : i32, i32
  }
  func.func @transform_5(%arg0: i32) -> (i32, i32) {
    %c0_i32 = arith.constant 0 : i32
    %c0_i32_0 = arith.constant 0 : i32
    %c0_i32_1 = arith.constant 0 : i32
    return %c0_i32, %c0_i32_0 : i32, i32
  }
  func.func @transform_6(%arg0: i32) -> (i32, i32) {
    %c0_i32 = arith.constant 0 : i32
    %c0_i32_0 = arith.constant 0 : i32
    %c0_i32_1 = arith.constant 0 : i32
    return %c0_i32, %c0_i32_0 : i32, i32
  }
  func.func @transform_7(%arg0: i32) -> (i32, i32) {
    %c0_i32 = arith.constant 0 : i32
    %c0_i32_0 = arith.constant 0 : i32
    %c0_i32_1 = arith.constant 0 : i32
    return %c0_i32, %c0_i32_0 : i32, i32
  }
  func.func @transform_8(%arg0: i32) -> (i32, i32) {
    %c0_i32 = arith.constant 0 : i32
    %c0_i32_0 = arith.constant 0 : i32
    %c0_i32_1 = arith.constant 0 : i32
    return %c0_i32, %c0_i32_0 : i32, i32
  }
  func.func @transform_9(%arg0: i32) -> (i32, i32, i32) {
    %c0_i32 = arith.constant 0 : i32
    %c0_i32_0 = arith.constant 0 : i32
    %c0_i32_1 = arith.constant 0 : i32
    return %arg0, %c0_i32, %c0_i32_0 : i32, i32, i32
  }
  func.func @transform_10(%arg0: i32) -> (i32, i32, i32) {
    %c0_i32 = arith.constant 0 : i32
    %c0_i32_0 = arith.constant 0 : i32
    %c0_i32_1 = arith.constant 0 : i32
    return %arg0, %c0_i32, %c0_i32_0 : i32, i32, i32
  }
}

module attributes {stable_mosaic.version = 11 : i64} {
  func.func @kernel(%arg0: i32, %arg1: memref<1x4x128xf32, #tpu.memory_space<vmem>>, %arg2: memref<1x8x128xf32, #tpu.memory_space<vmem>>, %arg3: memref<640x128xbf16, #tpu.memory_space<vmem>>, %arg4: memref<1x128xf32, #tpu.memory_space<vmem>>, %arg5: memref<128x128xbf16, #tpu.memory_space<vmem>>, %arg6: memref<1x128xf32, #tpu.memory_space<vmem>>, %arg7: memref<640x128xbf16, #tpu.memory_space<vmem>>, %arg8: memref<1x128xf32, #tpu.memory_space<vmem>>, %arg9: memref<1x8x128xf32, #tpu.memory_space<vmem>>, %arg10: memref<12x128xf32, #tpu.memory_space<vmem>>) attributes {dimension_semantics = [#tpu.dimension_semantics<parallel>], iteration_bounds = array<i64: 2>, scalar_prefetch = 0 : i64, scratch_operands = 1 : i64, tpu.core_type = #tpu.core_type<tc>, window_params = [{transform_indices = @transform_0, window_bounds = array<i64: 1, 4, 128>}, {transform_indices = @transform_1, window_bounds = array<i64: 1, 8, 128>}, {pipeline_mode = #tpu.pipeline_mode<synchronous>, transform_indices = @transform_2, window_bounds = array<i64: 640, 128>}, {pipeline_mode = #tpu.pipeline_mode<synchronous>, transform_indices = @transform_3, window_bounds = array<i64: 1, 128>}, {pipeline_mode = #tpu.pipeline_mode<synchronous>, transform_indices = @transform_4, window_bounds = array<i64: 128, 128>}, {pipeline_mode = #tpu.pipeline_mode<synchronous>, transform_indices = @transform_5, window_bounds = array<i64: 1, 128>}, {pipeline_mode = #tpu.pipeline_mode<synchronous>, transform_indices = @transform_6, window_bounds = array<i64: 640, 128>}, {pipeline_mode = #tpu.pipeline_mode<synchronous>, transform_indices = @transform_7, window_bounds = array<i64: 1, 128>}, {transform_indices = @transform_8, window_bounds = array<i64: 1, 8, 128>}]} {
    %c0 = arith.constant 0 : index
    %c0_0 = arith.constant 0 : index
    %c0_1 = arith.constant 0 : index
    %0 = vector.load %arg1[%c0, %c0_0, %c0_1] : memref<1x4x128xf32, #tpu.memory_space<vmem>>, vector<1x4x128xf32>
    %1 = vector.shape_cast %0 : vector<1x4x128xf32> to vector<4x128xf32>
    %c0_2 = arith.constant 0 : index
    %c0_3 = arith.constant 0 : index
    %c0_4 = arith.constant 0 : index
    %2 = vector.load %arg2[%c0_2, %c0_3, %c0_4] : memref<1x8x128xf32, #tpu.memory_space<vmem>>, vector<1x8x128xf32>
    %3 = vector.shape_cast %2 : vector<1x8x128xf32> to vector<8x128xf32>
    %4 = tpu.iota {dimensions = array<i32: 0>} : vector<8x4xi32>
    %5 = tpu.iota {dimensions = array<i32: 1>} : vector<8x4xi32>
    %c2_i32 = arith.constant 2 : i32
    %6 = vector.broadcast %c2_i32 : i32 to vector<8x4xi32>
    %7 = arith.muli %6, %5 : vector<8x4xi32>
    %8 = arith.subi %4, %7 : vector<8x4xi32>
    %c0_i32 = arith.constant 0 : i32
    %9 = vector.broadcast %c0_i32 : i32 to vector<8x4xi32>
    %10 = arith.cmpi eq, %8, %9 : vector<8x4xi32>
    %c1_i32 = arith.constant 1 : i32
    %11 = vector.broadcast %c1_i32 : i32 to vector<8x4xi32>
    %12 = arith.cmpi eq, %8, %11 : vector<8x4xi32>
    %13 = arith.ori %10, %12 : vector<8x4xi1>
    %cst = arith.constant 1.000000e+00 : f32
    %cst_5 = arith.constant 0.000000e+00 : f32
    %14 = vector.broadcast %cst : f32 to vector<8x4xf32>
    %15 = vector.broadcast %cst_5 : f32 to vector<8x4xf32>
    %16 = arith.select %13, %14, %15 : vector<8x4xi1>, vector<8x4xf32>
    %cst_6 = arith.constant dense<0.000000e+00> : vector<8x128xf32>
    %17 = tpu.matmul %16, %1, %cst_6 {dimension_numbers = #tpu.dot_dimension_numbers<[1], [0], [0], [1], [0, 0, 1, 1], [], []>} : vector<8x4xf32>, vector<4x128xf32>, vector<8x128xf32> -> vector<8x128xf32>
    %18 = arith.addf %17, %3 : vector<8x128xf32>
    %cst_7 = arith.constant 0.000000e+00 : f32
    %19 = vector.broadcast %cst_7 : f32 to vector<2x128xf32>
    %c0_8 = arith.constant 0 : index
    %c0_9 = arith.constant 0 : index
    %20 = vector.load %arg10[%c0_8, %c0_9] : memref<12x128xf32, #tpu.memory_space<vmem>>, vector<2x128xf32>
    tpu.vector_store %arg10[%c0_8, %c0_9], %19 {strides = array<i32>} : memref<12x128xf32, #tpu.memory_space<vmem>>, vector<2x128xf32>,
    %cst_10 = arith.constant 0.000000e+00 : f32
    %21 = vector.broadcast %cst_10 : f32 to vector<2x128xf32>
    %c10 = arith.constant 10 : index
    %c0_11 = arith.constant 0 : index
    %22 = vector.load %arg10[%c10, %c0_11] : memref<12x128xf32, #tpu.memory_space<vmem>>, vector<2x128xf32>
    tpu.vector_store %arg10[%c10, %c0_11], %21 {strides = array<i32>} : memref<12x128xf32, #tpu.memory_space<vmem>>, vector<2x128xf32>,
    %c2 = arith.constant 2 : index
    %c0_12 = arith.constant 0 : index
    %23 = vector.load %arg10[%c2, %c0_12] : memref<12x128xf32, #tpu.memory_space<vmem>>, vector<8x128xf32>
    tpu.vector_store %arg10[%c2, %c0_12], %18 {strides = array<i32>} : memref<12x128xf32, #tpu.memory_space<vmem>>, vector<8x128xf32>,
    %c0_13 = arith.constant 0 : index
    %c0_14 = arith.constant 0 : index
    %24 = vector.load %arg10[%c0_13, %c0_14] : memref<12x128xf32, #tpu.memory_space<vmem>>, vector<8x128xf32>
    %c1 = arith.constant 1 : index
    %c0_15 = arith.constant 0 : index
    %25 = vector.load %arg10[%c1, %c0_15] : memref<12x128xf32, #tpu.memory_space<vmem>>, vector<8x128xf32>
    %c2_16 = arith.constant 2 : index
    %c0_17 = arith.constant 0 : index
    %26 = vector.load %arg10[%c2_16, %c0_17] : memref<12x128xf32, #tpu.memory_space<vmem>>, vector<8x128xf32>
    %c3 = arith.constant 3 : index
    %c0_18 = arith.constant 0 : index
    %27 = vector.load %arg10[%c3, %c0_18] : memref<12x128xf32, #tpu.memory_space<vmem>>, vector<8x128xf32>
    %c4 = arith.constant 4 : index
    %c0_19 = arith.constant 0 : index
    %28 = vector.load %arg10[%c4, %c0_19] : memref<12x128xf32, #tpu.memory_space<vmem>>, vector<8x128xf32>
    %29 = tpu.concatenate %24, %25, %26, %27, %28 in 1 : vector<8x128xf32>, vector<8x128xf32>, vector<8x128xf32>, vector<8x128xf32>, vector<8x128xf32> -> vector<8x640xf32>
    %c0_20 = arith.constant 0 : index
    %c0_21 = arith.constant 0 : index
    %30 = vector.load %arg3[%c0_20, %c0_21] : memref<640x128xbf16, #tpu.memory_space<vmem>>, vector<640x128xbf16>
    %31 = arith.truncf %29 : vector<8x640xf32> to vector<8x640xbf16>
    %cst_22 = arith.constant dense<0.000000e+00> : vector<8x128xf32>
    %32 = tpu.matmul %31, %30, %cst_22 {dimension_numbers = #tpu.dot_dimension_numbers<[1], [0], [0], [1], [0, 0, 1, 1], [], []>} : vector<8x640xbf16>, vector<640x128xbf16>, vector<8x128xf32> -> vector<8x128xf32>
    %c0_23 = arith.constant 0 : index
    %c0_24 = arith.constant 0 : index
    %33 = vector.load %arg4[%c0_23, %c0_24] : memref<1x128xf32, #tpu.memory_space<vmem>>, vector<1x128xf32>
    %34 = vector.broadcast %33 : vector<1x128xf32> to vector<8x128xf32>
    %35 = arith.addf %32, %34 : vector<8x128xf32>
    %cst_25 = arith.constant 0.000000e+00 : f32
    %36 = vector.broadcast %cst_25 : f32 to vector<8x128xf32>
    %37 = arith.cmpf oge, %35, %36 : vector<8x128xf32>
    %cst_26 = arith.constant 2.000000e-01 : f32
    %38 = vector.broadcast %cst_26 : f32 to vector<8x128xf32>
    %39 = arith.mulf %38, %35 : vector<8x128xf32>
    %40 = arith.select %37, %35, %39 : vector<8x128xi1>, vector<8x128xf32>
    %c0_27 = arith.constant 0 : index
    %c0_28 = arith.constant 0 : index
    %41 = vector.load %arg5[%c0_27, %c0_28] : memref<128x128xbf16, #tpu.memory_space<vmem>>, vector<128x128xbf16>
    %42 = arith.truncf %18 : vector<8x128xf32> to vector<8x128xbf16>
    %cst_29 = arith.constant dense<0.000000e+00> : vector<8x128xf32>
    %43 = tpu.matmul %42, %41, %cst_29 {dimension_numbers = #tpu.dot_dimension_numbers<[1], [0], [0], [1], [0, 0, 1, 1], [], []>} : vector<8x128xbf16>, vector<128x128xbf16>, vector<8x128xf32> -> vector<8x128xf32>
    %c0_30 = arith.constant 0 : index
    %c0_31 = arith.constant 0 : index
    %44 = vector.load %arg6[%c0_30, %c0_31] : memref<1x128xf32, #tpu.memory_space<vmem>>, vector<1x128xf32>
    %45 = vector.broadcast %44 : vector<1x128xf32> to vector<8x128xf32>
    %46 = arith.addf %43, %45 : vector<8x128xf32>
    %cst_32 = arith.constant 0.000000e+00 : f32
    %47 = vector.broadcast %cst_32 : f32 to vector<2x128xf32>
    %c0_33 = arith.constant 0 : index
    %c0_34 = arith.constant 0 : index
    %48 = vector.load %arg10[%c0_33, %c0_34] : memref<12x128xf32, #tpu.memory_space<vmem>>, vector<2x128xf32>
    tpu.vector_store %arg10[%c0_33, %c0_34], %47 {strides = array<i32>} : memref<12x128xf32, #tpu.memory_space<vmem>>, vector<2x128xf32>,
    %cst_35 = arith.constant 0.000000e+00 : f32
    %49 = vector.broadcast %cst_35 : f32 to vector<2x128xf32>
    %c10_36 = arith.constant 10 : index
    %c0_37 = arith.constant 0 : index
    %50 = vector.load %arg10[%c10_36, %c0_37] : memref<12x128xf32, #tpu.memory_space<vmem>>, vector<2x128xf32>
    tpu.vector_store %arg10[%c10_36, %c0_37], %49 {strides = array<i32>} : memref<12x128xf32, #tpu.memory_space<vmem>>, vector<2x128xf32>,
    %c2_38 = arith.constant 2 : index
    %c0_39 = arith.constant 0 : index
    %51 = vector.load %arg10[%c2_38, %c0_39] : memref<12x128xf32, #tpu.memory_space<vmem>>, vector<8x128xf32>
    tpu.vector_store %arg10[%c2_38, %c0_39], %40 {strides = array<i32>} : memref<12x128xf32, #tpu.memory_space<vmem>>, vector<8x128xf32>,
    %c0_40 = arith.constant 0 : index
    %c0_41 = arith.constant 0 : index
    %52 = vector.load %arg10[%c0_40, %c0_41] : memref<12x128xf32, #tpu.memory_space<vmem>>, vector<8x128xf32>
    %c1_42 = arith.constant 1 : index
    %c0_43 = arith.constant 0 : index
    %53 = vector.load %arg10[%c1_42, %c0_43] : memref<12x128xf32, #tpu.memory_space<vmem>>, vector<8x128xf32>
    %c2_44 = arith.constant 2 : index
    %c0_45 = arith.constant 0 : index
    %54 = vector.load %arg10[%c2_44, %c0_45] : memref<12x128xf32, #tpu.memory_space<vmem>>, vector<8x128xf32>
    %c3_46 = arith.constant 3 : index
    %c0_47 = arith.constant 0 : index
    %55 = vector.load %arg10[%c3_46, %c0_47] : memref<12x128xf32, #tpu.memory_space<vmem>>, vector<8x128xf32>
    %c4_48 = arith.constant 4 : index
    %c0_49 = arith.constant 0 : index
    %56 = vector.load %arg10[%c4_48, %c0_49] : memref<12x128xf32, #tpu.memory_space<vmem>>, vector<8x128xf32>
    %57 = tpu.concatenate %52, %53, %54, %55, %56 in 1 : vector<8x128xf32>, vector<8x128xf32>, vector<8x128xf32>, vector<8x128xf32>, vector<8x128xf32> -> vector<8x640xf32>
    %c0_50 = arith.constant 0 : index
    %c0_51 = arith.constant 0 : index
    %58 = vector.load %arg7[%c0_50, %c0_51] : memref<640x128xbf16, #tpu.memory_space<vmem>>, vector<640x128xbf16>
    %59 = arith.truncf %57 : vector<8x640xf32> to vector<8x640xbf16>
    %cst_52 = arith.constant dense<0.000000e+00> : vector<8x128xf32>
    %60 = tpu.matmul %59, %58, %cst_52 {dimension_numbers = #tpu.dot_dimension_numbers<[1], [0], [0], [1], [0, 0, 1, 1], [], []>} : vector<8x640xbf16>, vector<640x128xbf16>, vector<8x128xf32> -> vector<8x128xf32>
    %c0_53 = arith.constant 0 : index
    %c0_54 = arith.constant 0 : index
    %61 = vector.load %arg8[%c0_53, %c0_54] : memref<1x128xf32, #tpu.memory_space<vmem>>, vector<1x128xf32>
    %62 = vector.broadcast %61 : vector<1x128xf32> to vector<8x128xf32>
    %63 = arith.addf %60, %62 : vector<8x128xf32>
    %64 = arith.addf %63, %46 : vector<8x128xf32>
    %cst_55 = arith.constant 0.000000e+00 : f32
    %65 = vector.broadcast %cst_55 : f32 to vector<8x128xf32>
    %66 = arith.cmpf oge, %64, %65 : vector<8x128xf32>
    %cst_56 = arith.constant 2.000000e-01 : f32
    %67 = vector.broadcast %cst_56 : f32 to vector<8x128xf32>
    %68 = arith.mulf %67, %64 : vector<8x128xf32>
    %69 = arith.select %66, %64, %68 : vector<8x128xi1>, vector<8x128xf32>
    %c0_57 = arith.constant 0 : index
    %c0_58 = arith.constant 0 : index
    %c0_59 = arith.constant 0 : index
    %70 = vector.load %arg9[%c0_57, %c0_58, %c0_59] : memref<1x8x128xf32, #tpu.memory_space<vmem>>, vector<1x8x128xf32>
    %71 = vector.shape_cast %70 : vector<1x8x128xf32> to vector<8x128xf32>
    %72 = vector.shape_cast %69 : vector<8x128xf32> to vector<1x8x128xf32>
    tpu.vector_store %arg9[%c0_57, %c0_58, %c0_59], %72 {strides = array<i32>} : memref<1x8x128xf32, #tpu.memory_space<vmem>>, vector<1x8x128xf32>,
    return
  }
  func.func @transform_0(%arg0: i32) -> (i32, i32, i32) {
    %c0_i32 = arith.constant 0 : i32
    %c0_i32_0 = arith.constant 0 : i32
    %c0_i32_1 = arith.constant 0 : i32
    return %arg0, %c0_i32, %c0_i32_0 : i32, i32, i32
  }
  func.func @transform_1(%arg0: i32) -> (i32, i32, i32) {
    %c0_i32 = arith.constant 0 : i32
    %c0_i32_0 = arith.constant 0 : i32
    %c0_i32_1 = arith.constant 0 : i32
    return %arg0, %c0_i32, %c0_i32_0 : i32, i32, i32
  }
  func.func @transform_2(%arg0: i32) -> (i32, i32) {
    %c0_i32 = arith.constant 0 : i32
    %c0_i32_0 = arith.constant 0 : i32
    %c0_i32_1 = arith.constant 0 : i32
    return %c0_i32, %c0_i32_0 : i32, i32
  }
  func.func @transform_3(%arg0: i32) -> (i32, i32) {
    %c0_i32 = arith.constant 0 : i32
    %c0_i32_0 = arith.constant 0 : i32
    %c0_i32_1 = arith.constant 0 : i32
    return %c0_i32, %c0_i32_0 : i32, i32
  }
  func.func @transform_4(%arg0: i32) -> (i32, i32) {
    %c0_i32 = arith.constant 0 : i32
    %c0_i32_0 = arith.constant 0 : i32
    %c0_i32_1 = arith.constant 0 : i32
    return %c0_i32, %c0_i32_0 : i32, i32
  }
  func.func @transform_5(%arg0: i32) -> (i32, i32) {
    %c0_i32 = arith.constant 0 : i32
    %c0_i32_0 = arith.constant 0 : i32
    %c0_i32_1 = arith.constant 0 : i32
    return %c0_i32, %c0_i32_0 : i32, i32
  }
  func.func @transform_6(%arg0: i32) -> (i32, i32) {
    %c0_i32 = arith.constant 0 : i32
    %c0_i32_0 = arith.constant 0 : i32
    %c0_i32_1 = arith.constant 0 : i32
    return %c0_i32, %c0_i32_0 : i32, i32
  }
  func.func @transform_7(%arg0: i32) -> (i32, i32) {
    %c0_i32 = arith.constant 0 : i32
    %c0_i32_0 = arith.constant 0 : i32
    %c0_i32_1 = arith.constant 0 : i32
    return %c0_i32, %c0_i32_0 : i32, i32
  }
  func.func @transform_8(%arg0: i32) -> (i32, i32, i32) {
    %c0_i32 = arith.constant 0 : i32
    %c0_i32_0 = arith.constant 0 : i32
    %c0_i32_1 = arith.constant 0 : i32
    return %arg0, %c0_i32, %c0_i32_0 : i32, i32, i32
  }
}

module attributes {stable_mosaic.version = 11 : i64} {
  func.func @kernel(%arg0: i32, %arg1: memref<1x8x128xf32, #tpu.memory_space<vmem>>, %arg2: memref<1x16x128xf32, #tpu.memory_space<vmem>>, %arg3: memref<640x128xbf16, #tpu.memory_space<vmem>>, %arg4: memref<1x128xf32, #tpu.memory_space<vmem>>, %arg5: memref<128x128xbf16, #tpu.memory_space<vmem>>, %arg6: memref<1x128xf32, #tpu.memory_space<vmem>>, %arg7: memref<640x128xbf16, #tpu.memory_space<vmem>>, %arg8: memref<1x128xf32, #tpu.memory_space<vmem>>, %arg9: memref<1x16x128xf32, #tpu.memory_space<vmem>>, %arg10: memref<20x128xf32, #tpu.memory_space<vmem>>) attributes {dimension_semantics = [#tpu.dimension_semantics<parallel>], iteration_bounds = array<i64: 2>, scalar_prefetch = 0 : i64, scratch_operands = 1 : i64, tpu.core_type = #tpu.core_type<tc>, window_params = [{transform_indices = @transform_0, window_bounds = array<i64: 1, 8, 128>}, {transform_indices = @transform_1, window_bounds = array<i64: 1, 16, 128>}, {pipeline_mode = #tpu.pipeline_mode<synchronous>, transform_indices = @transform_2, window_bounds = array<i64: 640, 128>}, {pipeline_mode = #tpu.pipeline_mode<synchronous>, transform_indices = @transform_3, window_bounds = array<i64: 1, 128>}, {pipeline_mode = #tpu.pipeline_mode<synchronous>, transform_indices = @transform_4, window_bounds = array<i64: 128, 128>}, {pipeline_mode = #tpu.pipeline_mode<synchronous>, transform_indices = @transform_5, window_bounds = array<i64: 1, 128>}, {pipeline_mode = #tpu.pipeline_mode<synchronous>, transform_indices = @transform_6, window_bounds = array<i64: 640, 128>}, {pipeline_mode = #tpu.pipeline_mode<synchronous>, transform_indices = @transform_7, window_bounds = array<i64: 1, 128>}, {transform_indices = @transform_8, window_bounds = array<i64: 1, 16, 128>}]} {
    %c0 = arith.constant 0 : index
    %c0_0 = arith.constant 0 : index
    %c0_1 = arith.constant 0 : index
    %0 = vector.load %arg1[%c0, %c0_0, %c0_1] : memref<1x8x128xf32, #tpu.memory_space<vmem>>, vector<1x8x128xf32>
    %1 = vector.shape_cast %0 : vector<1x8x128xf32> to vector<8x128xf32>
    %c0_2 = arith.constant 0 : index
    %c0_3 = arith.constant 0 : index
    %c0_4 = arith.constant 0 : index
    %2 = vector.load %arg2[%c0_2, %c0_3, %c0_4] : memref<1x16x128xf32, #tpu.memory_space<vmem>>, vector<1x16x128xf32>
    %3 = vector.shape_cast %2 : vector<1x16x128xf32> to vector<16x128xf32>
    %4 = tpu.iota {dimensions = array<i32: 0>} : vector<16x8xi32>
    %5 = tpu.iota {dimensions = array<i32: 1>} : vector<16x8xi32>
    %c2_i32 = arith.constant 2 : i32
    %6 = vector.broadcast %c2_i32 : i32 to vector<16x8xi32>
    %7 = arith.muli %6, %5 : vector<16x8xi32>
    %8 = arith.subi %4, %7 : vector<16x8xi32>
    %c0_i32 = arith.constant 0 : i32
    %9 = vector.broadcast %c0_i32 : i32 to vector<16x8xi32>
    %10 = arith.cmpi eq, %8, %9 : vector<16x8xi32>
    %c1_i32 = arith.constant 1 : i32
    %11 = vector.broadcast %c1_i32 : i32 to vector<16x8xi32>
    %12 = arith.cmpi eq, %8, %11 : vector<16x8xi32>
    %13 = arith.ori %10, %12 : vector<16x8xi1>
    %cst = arith.constant 1.000000e+00 : f32
    %cst_5 = arith.constant 0.000000e+00 : f32
    %14 = vector.broadcast %cst : f32 to vector<16x8xf32>
    %15 = vector.broadcast %cst_5 : f32 to vector<16x8xf32>
    %16 = arith.select %13, %14, %15 : vector<16x8xi1>, vector<16x8xf32>
    %cst_6 = arith.constant dense<0.000000e+00> : vector<16x128xf32>
    %17 = tpu.matmul %16, %1, %cst_6 {dimension_numbers = #tpu.dot_dimension_numbers<[1], [0], [0], [1], [0, 0, 1, 1], [], []>} : vector<16x8xf32>, vector<8x128xf32>, vector<16x128xf32> -> vector<16x128xf32>
    %18 = arith.addf %17, %3 : vector<16x128xf32>
    %cst_7 = arith.constant 0.000000e+00 : f32
    %19 = vector.broadcast %cst_7 : f32 to vector<2x128xf32>
    %c0_8 = arith.constant 0 : index
    %c0_9 = arith.constant 0 : index
    %20 = vector.load %arg10[%c0_8, %c0_9] : memref<20x128xf32, #tpu.memory_space<vmem>>, vector<2x128xf32>
    tpu.vector_store %arg10[%c0_8, %c0_9], %19 {strides = array<i32>} : memref<20x128xf32, #tpu.memory_space<vmem>>, vector<2x128xf32>,
    %cst_10 = arith.constant 0.000000e+00 : f32
    %21 = vector.broadcast %cst_10 : f32 to vector<2x128xf32>
    %c18 = arith.constant 18 : index
    %c0_11 = arith.constant 0 : index
    %22 = vector.load %arg10[%c18, %c0_11] : memref<20x128xf32, #tpu.memory_space<vmem>>, vector<2x128xf32>
    tpu.vector_store %arg10[%c18, %c0_11], %21 {strides = array<i32>} : memref<20x128xf32, #tpu.memory_space<vmem>>, vector<2x128xf32>,
    %c2 = arith.constant 2 : index
    %c0_12 = arith.constant 0 : index
    %23 = vector.load %arg10[%c2, %c0_12] : memref<20x128xf32, #tpu.memory_space<vmem>>, vector<16x128xf32>
    tpu.vector_store %arg10[%c2, %c0_12], %18 {strides = array<i32>} : memref<20x128xf32, #tpu.memory_space<vmem>>, vector<16x128xf32>,
    %c0_13 = arith.constant 0 : index
    %c0_14 = arith.constant 0 : index
    %24 = vector.load %arg10[%c0_13, %c0_14] : memref<20x128xf32, #tpu.memory_space<vmem>>, vector<16x128xf32>
    %c1 = arith.constant 1 : index
    %c0_15 = arith.constant 0 : index
    %25 = vector.load %arg10[%c1, %c0_15] : memref<20x128xf32, #tpu.memory_space<vmem>>, vector<16x128xf32>
    %c2_16 = arith.constant 2 : index
    %c0_17 = arith.constant 0 : index
    %26 = vector.load %arg10[%c2_16, %c0_17] : memref<20x128xf32, #tpu.memory_space<vmem>>, vector<16x128xf32>
    %c3 = arith.constant 3 : index
    %c0_18 = arith.constant 0 : index
    %27 = vector.load %arg10[%c3, %c0_18] : memref<20x128xf32, #tpu.memory_space<vmem>>, vector<16x128xf32>
    %c4 = arith.constant 4 : index
    %c0_19 = arith.constant 0 : index
    %28 = vector.load %arg10[%c4, %c0_19] : memref<20x128xf32, #tpu.memory_space<vmem>>, vector<16x128xf32>
    %29 = tpu.concatenate %24, %25, %26, %27, %28 in 1 : vector<16x128xf32>, vector<16x128xf32>, vector<16x128xf32>, vector<16x128xf32>, vector<16x128xf32> -> vector<16x640xf32>
    %c0_20 = arith.constant 0 : index
    %c0_21 = arith.constant 0 : index
    %30 = vector.load %arg3[%c0_20, %c0_21] : memref<640x128xbf16, #tpu.memory_space<vmem>>, vector<640x128xbf16>
    %31 = arith.truncf %29 : vector<16x640xf32> to vector<16x640xbf16>
    %cst_22 = arith.constant dense<0.000000e+00> : vector<16x128xf32>
    %32 = tpu.matmul %31, %30, %cst_22 {dimension_numbers = #tpu.dot_dimension_numbers<[1], [0], [0], [1], [0, 0, 1, 1], [], []>} : vector<16x640xbf16>, vector<640x128xbf16>, vector<16x128xf32> -> vector<16x128xf32>
    %c0_23 = arith.constant 0 : index
    %c0_24 = arith.constant 0 : index
    %33 = vector.load %arg4[%c0_23, %c0_24] : memref<1x128xf32, #tpu.memory_space<vmem>>, vector<1x128xf32>
    %34 = vector.broadcast %33 : vector<1x128xf32> to vector<16x128xf32>
    %35 = arith.addf %32, %34 : vector<16x128xf32>
    %cst_25 = arith.constant 0.000000e+00 : f32
    %36 = vector.broadcast %cst_25 : f32 to vector<16x128xf32>
    %37 = arith.cmpf oge, %35, %36 : vector<16x128xf32>
    %cst_26 = arith.constant 2.000000e-01 : f32
    %38 = vector.broadcast %cst_26 : f32 to vector<16x128xf32>
    %39 = arith.mulf %38, %35 : vector<16x128xf32>
    %40 = arith.select %37, %35, %39 : vector<16x128xi1>, vector<16x128xf32>
    %c0_27 = arith.constant 0 : index
    %c0_28 = arith.constant 0 : index
    %41 = vector.load %arg5[%c0_27, %c0_28] : memref<128x128xbf16, #tpu.memory_space<vmem>>, vector<128x128xbf16>
    %42 = arith.truncf %18 : vector<16x128xf32> to vector<16x128xbf16>
    %cst_29 = arith.constant dense<0.000000e+00> : vector<16x128xf32>
    %43 = tpu.matmul %42, %41, %cst_29 {dimension_numbers = #tpu.dot_dimension_numbers<[1], [0], [0], [1], [0, 0, 1, 1], [], []>} : vector<16x128xbf16>, vector<128x128xbf16>, vector<16x128xf32> -> vector<16x128xf32>
    %c0_30 = arith.constant 0 : index
    %c0_31 = arith.constant 0 : index
    %44 = vector.load %arg6[%c0_30, %c0_31] : memref<1x128xf32, #tpu.memory_space<vmem>>, vector<1x128xf32>
    %45 = vector.broadcast %44 : vector<1x128xf32> to vector<16x128xf32>
    %46 = arith.addf %43, %45 : vector<16x128xf32>
    %cst_32 = arith.constant 0.000000e+00 : f32
    %47 = vector.broadcast %cst_32 : f32 to vector<2x128xf32>
    %c0_33 = arith.constant 0 : index
    %c0_34 = arith.constant 0 : index
    %48 = vector.load %arg10[%c0_33, %c0_34] : memref<20x128xf32, #tpu.memory_space<vmem>>, vector<2x128xf32>
    tpu.vector_store %arg10[%c0_33, %c0_34], %47 {strides = array<i32>} : memref<20x128xf32, #tpu.memory_space<vmem>>, vector<2x128xf32>,
    %cst_35 = arith.constant 0.000000e+00 : f32
    %49 = vector.broadcast %cst_35 : f32 to vector<2x128xf32>
    %c18_36 = arith.constant 18 : index
    %c0_37 = arith.constant 0 : index
    %50 = vector.load %arg10[%c18_36, %c0_37] : memref<20x128xf32, #tpu.memory_space<vmem>>, vector<2x128xf32>
    tpu.vector_store %arg10[%c18_36, %c0_37], %49 {strides = array<i32>} : memref<20x128xf32, #tpu.memory_space<vmem>>, vector<2x128xf32>,
    %c2_38 = arith.constant 2 : index
    %c0_39 = arith.constant 0 : index
    %51 = vector.load %arg10[%c2_38, %c0_39] : memref<20x128xf32, #tpu.memory_space<vmem>>, vector<16x128xf32>
    tpu.vector_store %arg10[%c2_38, %c0_39], %40 {strides = array<i32>} : memref<20x128xf32, #tpu.memory_space<vmem>>, vector<16x128xf32>,
    %c0_40 = arith.constant 0 : index
    %c0_41 = arith.constant 0 : index
    %52 = vector.load %arg10[%c0_40, %c0_41] : memref<20x128xf32, #tpu.memory_space<vmem>>, vector<16x128xf32>
    %c1_42 = arith.constant 1 : index
    %c0_43 = arith.constant 0 : index
    %53 = vector.load %arg10[%c1_42, %c0_43] : memref<20x128xf32, #tpu.memory_space<vmem>>, vector<16x128xf32>
    %c2_44 = arith.constant 2 : index
    %c0_45 = arith.constant 0 : index
    %54 = vector.load %arg10[%c2_44, %c0_45] : memref<20x128xf32, #tpu.memory_space<vmem>>, vector<16x128xf32>
    %c3_46 = arith.constant 3 : index
    %c0_47 = arith.constant 0 : index
    %55 = vector.load %arg10[%c3_46, %c0_47] : memref<20x128xf32, #tpu.memory_space<vmem>>, vector<16x128xf32>
    %c4_48 = arith.constant 4 : index
    %c0_49 = arith.constant 0 : index
    %56 = vector.load %arg10[%c4_48, %c0_49] : memref<20x128xf32, #tpu.memory_space<vmem>>, vector<16x128xf32>
    %57 = tpu.concatenate %52, %53, %54, %55, %56 in 1 : vector<16x128xf32>, vector<16x128xf32>, vector<16x128xf32>, vector<16x128xf32>, vector<16x128xf32> -> vector<16x640xf32>
    %c0_50 = arith.constant 0 : index
    %c0_51 = arith.constant 0 : index
    %58 = vector.load %arg7[%c0_50, %c0_51] : memref<640x128xbf16, #tpu.memory_space<vmem>>, vector<640x128xbf16>
    %59 = arith.truncf %57 : vector<16x640xf32> to vector<16x640xbf16>
    %cst_52 = arith.constant dense<0.000000e+00> : vector<16x128xf32>
    %60 = tpu.matmul %59, %58, %cst_52 {dimension_numbers = #tpu.dot_dimension_numbers<[1], [0], [0], [1], [0, 0, 1, 1], [], []>} : vector<16x640xbf16>, vector<640x128xbf16>, vector<16x128xf32> -> vector<16x128xf32>
    %c0_53 = arith.constant 0 : index
    %c0_54 = arith.constant 0 : index
    %61 = vector.load %arg8[%c0_53, %c0_54] : memref<1x128xf32, #tpu.memory_space<vmem>>, vector<1x128xf32>
    %62 = vector.broadcast %61 : vector<1x128xf32> to vector<16x128xf32>
    %63 = arith.addf %60, %62 : vector<16x128xf32>
    %64 = arith.addf %63, %46 : vector<16x128xf32>
    %cst_55 = arith.constant 0.000000e+00 : f32
    %65 = vector.broadcast %cst_55 : f32 to vector<16x128xf32>
    %66 = arith.cmpf oge, %64, %65 : vector<16x128xf32>
    %cst_56 = arith.constant 2.000000e-01 : f32
    %67 = vector.broadcast %cst_56 : f32 to vector<16x128xf32>
    %68 = arith.mulf %67, %64 : vector<16x128xf32>
    %69 = arith.select %66, %64, %68 : vector<16x128xi1>, vector<16x128xf32>
    %c0_57 = arith.constant 0 : index
    %c0_58 = arith.constant 0 : index
    %c0_59 = arith.constant 0 : index
    %70 = vector.load %arg9[%c0_57, %c0_58, %c0_59] : memref<1x16x128xf32, #tpu.memory_space<vmem>>, vector<1x16x128xf32>
    %71 = vector.shape_cast %70 : vector<1x16x128xf32> to vector<16x128xf32>
    %72 = vector.shape_cast %69 : vector<16x128xf32> to vector<1x16x128xf32>
    tpu.vector_store %arg9[%c0_57, %c0_58, %c0_59], %72 {strides = array<i32>} : memref<1x16x128xf32, #tpu.memory_space<vmem>>, vector<1x16x128xf32>,
    return
  }
  func.func @transform_0(%arg0: i32) -> (i32, i32, i32) {
    %c0_i32 = arith.constant 0 : i32
    %c0_i32_0 = arith.constant 0 : i32
    %c0_i32_1 = arith.constant 0 : i32
    return %arg0, %c0_i32, %c0_i32_0 : i32, i32, i32
  }
  func.func @transform_1(%arg0: i32) -> (i32, i32, i32) {
    %c0_i32 = arith.constant 0 : i32
    %c0_i32_0 = arith.constant 0 : i32
    %c0_i32_1 = arith.constant 0 : i32
    return %arg0, %c0_i32, %c0_i32_0 : i32, i32, i32
  }
  func.func @transform_2(%arg0: i32) -> (i32, i32) {
    %c0_i32 = arith.constant 0 : i32
    %c0_i32_0 = arith.constant 0 : i32
    %c0_i32_1 = arith.constant 0 : i32
    return %c0_i32, %c0_i32_0 : i32, i32
  }
  func.func @transform_3(%arg0: i32) -> (i32, i32) {
    %c0_i32 = arith.constant 0 : i32
    %c0_i32_0 = arith.constant 0 : i32
    %c0_i32_1 = arith.constant 0 : i32
    return %c0_i32, %c0_i32_0 : i32, i32
  }
  func.func @transform_4(%arg0: i32) -> (i32, i32) {
    %c0_i32 = arith.constant 0 : i32
    %c0_i32_0 = arith.constant 0 : i32
    %c0_i32_1 = arith.constant 0 : i32
    return %c0_i32, %c0_i32_0 : i32, i32
  }
  func.func @transform_5(%arg0: i32) -> (i32, i32) {
    %c0_i32 = arith.constant 0 : i32
    %c0_i32_0 = arith.constant 0 : i32
    %c0_i32_1 = arith.constant 0 : i32
    return %c0_i32, %c0_i32_0 : i32, i32
  }
  func.func @transform_6(%arg0: i32) -> (i32, i32) {
    %c0_i32 = arith.constant 0 : i32
    %c0_i32_0 = arith.constant 0 : i32
    %c0_i32_1 = arith.constant 0 : i32
    return %c0_i32, %c0_i32_0 : i32, i32
  }
  func.func @transform_7(%arg0: i32) -> (i32, i32) {
    %c0_i32 = arith.constant 0 : i32
    %c0_i32_0 = arith.constant 0 : i32
    %c0_i32_1 = arith.constant 0 : i32
    return %c0_i32, %c0_i32_0 : i32, i32
  }
  func.func @transform_8(%arg0: i32) -> (i32, i32, i32) {
    %c0_i32 = arith.constant 0 : i32
    %c0_i32_0 = arith.constant 0 : i32
    %c0_i32_1 = arith.constant 0 : i32
    return %arg0, %c0_i32, %c0_i32_0 : i32, i32, i32
  }
}

module attributes {stable_mosaic.version = 11 : i64} {
  func.func @kernel(%arg0: i32, %arg1: memref<1x16x128xf32, #tpu.memory_space<vmem>>, %arg2: memref<128x128xbf16, #tpu.memory_space<vmem>>, %arg3: memref<1x128xf32, #tpu.memory_space<vmem>>, %arg4: memref<128x128xbf16, #tpu.memory_space<vmem>>, %arg5: memref<1x128xf32, #tpu.memory_space<vmem>>, %arg6: memref<128x8xbf16, #tpu.memory_space<vmem>>, %arg7: memref<128x8xbf16, #tpu.memory_space<vmem>>, %arg8: memref<1x1xf32, #tpu.memory_space<smem>>, %arg9: memref<1x17x8xf32, #tpu.memory_space<vmem>>) attributes {dimension_semantics = [#tpu.dimension_semantics<parallel>], iteration_bounds = array<i64: 2>, scalar_prefetch = 0 : i64, scratch_operands = 0 : i64, tpu.core_type = #tpu.core_type<tc>, window_params = [{transform_indices = @transform_0, window_bounds = array<i64: 1, 16, 128>}, {pipeline_mode = #tpu.pipeline_mode<synchronous>, transform_indices = @transform_1, window_bounds = array<i64: 128, 128>}, {pipeline_mode = #tpu.pipeline_mode<synchronous>, transform_indices = @transform_2, window_bounds = array<i64: 1, 128>}, {pipeline_mode = #tpu.pipeline_mode<synchronous>, transform_indices = @transform_3, window_bounds = array<i64: 128, 128>}, {pipeline_mode = #tpu.pipeline_mode<synchronous>, transform_indices = @transform_4, window_bounds = array<i64: 1, 128>}, {pipeline_mode = #tpu.pipeline_mode<synchronous>, transform_indices = @transform_5, window_bounds = array<i64: 128, 8>}, {pipeline_mode = #tpu.pipeline_mode<synchronous>, transform_indices = @transform_6, window_bounds = array<i64: 128, 8>}, {transform_indices = @transform_7, window_bounds = array<i64: 1, 1>}, {transform_indices = @transform_8, window_bounds = array<i64: 1, 17, 8>}]} {
    %c0 = arith.constant 0 : index
    %c0_0 = arith.constant 0 : index
    %c0_1 = arith.constant 0 : index
    %0 = vector.load %arg1[%c0, %c0_0, %c0_1] : memref<1x16x128xf32, #tpu.memory_space<vmem>>, vector<1x16x128xf32>
    %1 = vector.shape_cast %0 : vector<1x16x128xf32> to vector<16x128xf32>
    %c0_2 = arith.constant 0 : index
    %c0_3 = arith.constant 0 : index
    %2 = vector.load %arg2[%c0_2, %c0_3] : memref<128x128xbf16, #tpu.memory_space<vmem>>, vector<128x128xbf16>
    %3 = arith.truncf %1 : vector<16x128xf32> to vector<16x128xbf16>
    %cst = arith.constant dense<0.000000e+00> : vector<16x128xf32>
    %4 = tpu.matmul %3, %2, %cst {dimension_numbers = #tpu.dot_dimension_numbers<[1], [0], [0], [1], [0, 0, 1, 1], [], []>} : vector<16x128xbf16>, vector<128x128xbf16>, vector<16x128xf32> -> vector<16x128xf32>
    %c0_4 = arith.constant 0 : index
    %c0_5 = arith.constant 0 : index
    %5 = vector.load %arg3[%c0_4, %c0_5] : memref<1x128xf32, #tpu.memory_space<vmem>>, vector<1x128xf32>
    %6 = vector.broadcast %5 : vector<1x128xf32> to vector<16x128xf32>
    %7 = arith.addf %4, %6 : vector<16x128xf32>
    %cst_6 = arith.constant 0.000000e+00 : f32
    %8 = vector.broadcast %cst_6 : f32 to vector<16x128xf32>
    %9 = arith.cmpf oge, %7, %8 : vector<16x128xf32>
    %cst_7 = arith.constant 2.000000e-01 : f32
    %10 = vector.broadcast %cst_7 : f32 to vector<16x128xf32>
    %11 = arith.mulf %10, %7 : vector<16x128xf32>
    %12 = arith.select %9, %7, %11 : vector<16x128xi1>, vector<16x128xf32>
    %c0_8 = arith.constant 0 : index
    %c0_9 = arith.constant 0 : index
    %13 = vector.load %arg4[%c0_8, %c0_9] : memref<128x128xbf16, #tpu.memory_space<vmem>>, vector<128x128xbf16>
    %14 = arith.truncf %12 : vector<16x128xf32> to vector<16x128xbf16>
    %cst_10 = arith.constant dense<0.000000e+00> : vector<16x128xf32>
    %15 = tpu.matmul %14, %13, %cst_10 {dimension_numbers = #tpu.dot_dimension_numbers<[1], [0], [0], [1], [0, 0, 1, 1], [], []>} : vector<16x128xbf16>, vector<128x128xbf16>, vector<16x128xf32> -> vector<16x128xf32>
    %c0_11 = arith.constant 0 : index
    %c0_12 = arith.constant 0 : index
    %16 = vector.load %arg5[%c0_11, %c0_12] : memref<1x128xf32, #tpu.memory_space<vmem>>, vector<1x128xf32>
    %17 = vector.broadcast %16 : vector<1x128xf32> to vector<16x128xf32>
    %18 = arith.addf %15, %17 : vector<16x128xf32>
    %19 = arith.truncf %18 : vector<16x128xf32> to vector<16x128xbf16>
    %c0_13 = arith.constant 0 : index
    %c0_14 = arith.constant 0 : index
    %20 = vector.load %arg6[%c0_13, %c0_14] : memref<128x8xbf16, #tpu.memory_space<vmem>>, vector<128x8xbf16>
    %cst_15 = arith.constant dense<0.000000e+00> : vector<16x8xf32>
    %21 = tpu.matmul %19, %20, %cst_15 {dimension_numbers = #tpu.dot_dimension_numbers<[1], [0], [0], [1], [0, 0, 1, 1], [], []>} : vector<16x128xbf16>, vector<128x8xbf16>, vector<16x8xf32> -> vector<16x8xf32>
    %c0_16 = arith.constant 0 : index
    %c0_17 = arith.constant 0 : index
    %22 = vector.load %arg7[%c0_16, %c0_17] : memref<128x8xbf16, #tpu.memory_space<vmem>>, vector<128x8xbf16>
    %cst_18 = arith.constant dense<0.000000e+00> : vector<16x8xf32>
    %23 = tpu.matmul %19, %22, %cst_18 {dimension_numbers = #tpu.dot_dimension_numbers<[1], [0], [0], [1], [0, 0, 1, 1], [], []>} : vector<16x128xbf16>, vector<128x8xbf16>, vector<16x8xf32> -> vector<16x8xf32>
    %c0_19 = arith.constant 0 : index
    %c0_20 = arith.constant 0 : index
    %c0_21 = arith.constant 0 : index
    %24 = vector.load %arg9[%c0_19, %c0_20, %c0_21] : memref<1x17x8xf32, #tpu.memory_space<vmem>>, vector<1x16x8xf32>
    %25 = vector.shape_cast %24 : vector<1x16x8xf32> to vector<16x8xf32>
    %26 = vector.shape_cast %21 : vector<16x8xf32> to vector<1x16x8xf32>
    tpu.vector_store %arg9[%c0_19, %c0_20, %c0_21], %26 {strides = array<i32>} : memref<1x17x8xf32, #tpu.memory_space<vmem>>, vector<1x16x8xf32>,
    %cst_22 = arith.constant 0.000000e+00 : f32
    %27 = vector.broadcast %cst_22 : f32 to vector<1x8xf32>
    %c0_23 = arith.constant 0 : index
    %c16 = arith.constant 16 : index
    %c0_24 = arith.constant 0 : index
    %28 = vector.load %arg9[%c0_23, %c16, %c0_24] : memref<1x17x8xf32, #tpu.memory_space<vmem>>, vector<1x1x8xf32>
    %29 = vector.shape_cast %28 : vector<1x1x8xf32> to vector<1x8xf32>
    %30 = vector.shape_cast %27 : vector<1x8xf32> to vector<1x1x8xf32>
    tpu.vector_store %arg9[%c0_23, %c16, %c0_24], %30 {strides = array<i32>} : memref<1x17x8xf32, #tpu.memory_space<vmem>>, vector<1x1x8xf32>,
    %c0_25 = arith.constant 0 : index
    %c1 = arith.constant 1 : index
    %c0_26 = arith.constant 0 : index
    %31 = vector.load %arg9[%c0_25, %c1, %c0_26] : memref<1x17x8xf32, #tpu.memory_space<vmem>>, vector<1x16x8xf32>
    %32 = vector.shape_cast %31 : vector<1x16x8xf32> to vector<16x8xf32>
    %33 = arith.addf %32, %23 : vector<16x8xf32>
    %c0_27 = arith.constant 0 : index
    %c1_28 = arith.constant 1 : index
    %c0_29 = arith.constant 0 : index
    %34 = vector.load %arg9[%c0_27, %c1_28, %c0_29] : memref<1x17x8xf32, #tpu.memory_space<vmem>>, vector<1x16x8xf32>
    %35 = vector.shape_cast %34 : vector<1x16x8xf32> to vector<16x8xf32>
    %36 = vector.shape_cast %33 : vector<16x8xf32> to vector<1x16x8xf32>
    tpu.vector_store %arg9[%c0_27, %c1_28, %c0_29], %36 {strides = array<i32>} : memref<1x17x8xf32, #tpu.memory_space<vmem>>, vector<1x16x8xf32>,
    %c0_30 = arith.constant 0 : index
    %c0_31 = arith.constant 0 : index
    %c0_32 = arith.constant 0 : index
    %37 = vector.load %arg9[%c0_30, %c0_31, %c0_32] : memref<1x17x8xf32, #tpu.memory_space<vmem>>, vector<1x17x8xf32>
    %38 = vector.shape_cast %37 : vector<1x17x8xf32> to vector<17x8xf32>
    %c0_33 = arith.constant 0 : index
    %c0_34 = arith.constant 0 : index
    %39 = memref.load %arg8[%c0_33, %c0_34] : memref<1x1xf32, #tpu.memory_space<smem>>
    %40 = vector.broadcast %39 : f32 to vector<17x8xf32>
    %41 = arith.addf %38, %40 : vector<17x8xf32>
    %42 = math.tanh %41 : vector<17x8xf32>
    %c0_35 = arith.constant 0 : index
    %c0_36 = arith.constant 0 : index
    %c0_37 = arith.constant 0 : index
    %43 = vector.load %arg9[%c0_35, %c0_36, %c0_37] : memref<1x17x8xf32, #tpu.memory_space<vmem>>, vector<1x17x8xf32>
    %44 = vector.shape_cast %43 : vector<1x17x8xf32> to vector<17x8xf32>
    %45 = vector.shape_cast %42 : vector<17x8xf32> to vector<1x17x8xf32>
    tpu.vector_store %arg9[%c0_35, %c0_36, %c0_37], %45 {strides = array<i32>} : memref<1x17x8xf32, #tpu.memory_space<vmem>>, vector<1x17x8xf32>,
    return
  }
  func.func @transform_0(%arg0: i32) -> (i32, i32, i32) {
    %c0_i32 = arith.constant 0 : i32
    %c0_i32_0 = arith.constant 0 : i32
    %c0_i32_1 = arith.constant 0 : i32
    return %arg0, %c0_i32, %c0_i32_0 : i32, i32, i32
  }
  func.func @transform_1(%arg0: i32) -> (i32, i32) {
    %c0_i32 = arith.constant 0 : i32
    %c0_i32_0 = arith.constant 0 : i32
    %c0_i32_1 = arith.constant 0 : i32
    return %c0_i32, %c0_i32_0 : i32, i32
  }
  func.func @transform_2(%arg0: i32) -> (i32, i32) {
    %c0_i32 = arith.constant 0 : i32
    %c0_i32_0 = arith.constant 0 : i32
    %c0_i32_1 = arith.constant 0 : i32
    return %c0_i32, %c0_i32_0 : i32, i32
  }
  func.func @transform_3(%arg0: i32) -> (i32, i32) {
    %c0_i32 = arith.constant 0 : i32
    %c0_i32_0 = arith.constant 0 : i32
    %c0_i32_1 = arith.constant 0 : i32
    return %c0_i32, %c0_i32_0 : i32, i32
  }
  func.func @transform_4(%arg0: i32) -> (i32, i32) {
    %c0_i32 = arith.constant 0 : i32
    %c0_i32_0 = arith.constant 0 : i32
    %c0_i32_1 = arith.constant 0 : i32
    return %c0_i32, %c0_i32_0 : i32, i32
  }
  func.func @transform_5(%arg0: i32) -> (i32, i32) {
    %c0_i32 = arith.constant 0 : i32
    %c0_i32_0 = arith.constant 0 : i32
    %c0_i32_1 = arith.constant 0 : i32
    return %c0_i32, %c0_i32_0 : i32, i32
  }
  func.func @transform_6(%arg0: i32) -> (i32, i32) {
    %c0_i32 = arith.constant 0 : i32
    %c0_i32_0 = arith.constant 0 : i32
    %c0_i32_1 = arith.constant 0 : i32
    return %c0_i32, %c0_i32_0 : i32, i32
  }
  func.func @transform_7(%arg0: i32) -> (i32, i32) {
    %c0_i32 = arith.constant 0 : i32
    %c0_i32_0 = arith.constant 0 : i32
    %c0_i32_1 = arith.constant 0 : i32
    return %c0_i32, %c0_i32_0 : i32, i32
  }
  func.func @transform_8(%arg0: i32) -> (i32, i32, i32) {
    %c0_i32 = arith.constant 0 : i32
    %c0_i32_0 = arith.constant 0 : i32
    %c0_i32_1 = arith.constant 0 : i32
    return %arg0, %c0_i32, %c0_i32_0 : i32, i32, i32
  }
}

</mosaic_0001>

<bundles_post_ra>
// kernel: run.7
= control target key start
LH: loop header
LB: loop body
LE: loop exit
PB: predicated region body
PF: predicated region fallthrough
CT: control target
= control target key end

     0   :  { %8 = vsyncpa [#allocation4], 0  ;;  %s976_s12 = smov 0   ;;  %s1006_s0 = inlined_call_operand.vmem [shape: f32[2,16,128], index: 0, kind: input, shape index: {}]   ;;  %s1007_s1 = inlined_call_operand.hbm [shape: bf16[640,128], index: 1, kind: input, shape index: {}]   ;;  %s1008_s2 = inlined_call_operand.vmem [shape: f32[1,128], index: 2, kind: input, shape index: {}]   ;;  %s1009_s3 = inlined_call_operand.vmem [shape: f32[2,16,128], index: 3, kind: output, shape index: {}]  }
   0x1 LB: > { %s124_s15 = sshll.u32 %s1007_s1, 4  ;;  %s672_s16 = sadd.s32 4294967295, %s950_s12   ;;  %s950_s12 = sphi %s976_s12, %s14_s12   ;;  %s125_s15 = int_to_ptr.hbm [resolvable:$true] %s124_s15 }
   0x2   : > { %p674_p0 = scmp.ge.s32.totalorder %s950_s12, 1  ;;  %p113_p1 = scmp.lt.s32.totalorder %s950_s12, 3 }
   0x3   : > { %p895_p2 = scmp.eq.s32.totalorder %s672_s16, 0  ;;  %s952_s17 = smov [#allocation3]  }
   0x4   : > { %p114_p3 = pnand %p674_p0, %p113_p1  ;;  %s126_s18 = sshll.u32 %s952_s17, 4  ;;  %s127_s18 = int_to_ptr.vmem [resolvable:$true] %s126_s18 }
   0x5   : > { %s953_s19 = smov 64   ;;  %s954_s20 = smov 4  }
   0x6   : > { %p891_p4 = pneg %p114_p3  ;;  %153 = sbr.rel (%p114_p3) target bundleno = 213 (0xd5), region = 32 }
   0x8   : > { %p892_p5 = pnand %p895_p2, %p891_p4 }
   0xa   : > { %894 = dma.hbm_to_vmem [thread:$0]  (!%p892_p5), %s125_s15, 5120, %s127_s18, [#allocation4], %s953_s19, %s953_s19, %s954_s20  }
   0xb   : > { %945 = dma.done.wait (%p895_p2), [#allocation4], 5120  }
   0xc   : > { %947 = vsyncadd (%p895_p2), [#allocation4], 4294962176  ;;  %v955_v0 = vmov 0.0   ;;  %p178_p6 = scmp.lt.s32.totalorder %s672_s16, 1  ;;  %v854_v1 = vld [vmem:[#allocation3 + $0x38] sm:$0xff]  ;;  %v853_v5 = vld [vmem:[#allocation3 + $0x30] sm:$0xff] }
   0xd   : > { %190 = vst [vmem:[#allocation2] sm:$0x3] %v955_v0  ;;  %v870_v2 = vld [vmem:[#allocation3 + $0xb8] sm:$0xff]  ;;  %533 = vmatpush.bf16.msra.mxu0 %v854_v1  ;;  %v869_v6 = vld [vmem:[#allocation3 + $0xb0] sm:$0xff]  ;;  %v852_v9 = vld [vmem:[#allocation3 + $0x28] sm:$0xff] }
   0xe   : > { %191 = vst [vmem:[#allocation2 + $0x12] sm:$0x3] %v955_v0  ;;  %v878_v3 = vld [vmem:[#allocation3 + $0xf8] sm:$0xff]  ;;  %s1011_s16 = smov (!%p178_p6, %s672_s16), 1  ;;  %561 = vmatpush.bf16.msra.mxu2 %v870_v2  ;;  %v877_v7 = vld [vmem:[#allocation3 + $0xf0] sm:$0xff]  ;;  %v868_v10 = vld [vmem:[#allocation3 + $0xa8] sm:$0xff] }
   0xf   : > { %v862_v4 = vld [vmem:[#allocation3 + $0x78] sm:$0xff]  ;;  %575 = vmatpush.bf16.msra.mxu3 %v878_v3  ;;  %v861_v8 = vld [vmem:[#allocation3 + $0x70] sm:$0xff]  ;;  %s845_s21 = sshll.u32 %s1011_s16, 4  ;;  %v876_v11 = vld [vmem:[#allocation3 + $0xe8] sm:$0xff] }
  0x10   : > { %547 = vmatpush.bf16.msra.mxu1 %v862_v4  ;;  %v860_v12 = vld [vmem:[#allocation3 + $0x68] sm:$0xff]  ;;  %s182_s24 = scalar_lea.vmem %s1006_s0, %s845_s21  ;;  %v851_v13 = vld [vmem:[#allocation3 + $0x20] sm:$0xff]  ;;  %v850_v19 = vld [vmem:[#allocation3 + $0x18] sm:$0xff]  ;;  %s187_s29 = scalar_lea.vmem %s1009_s3, %s845_s21 }
  0x11   : > { %534 = vmatpush.bf16.msra.mxu0 %v853_v5  ;;  %v867_v14 = vld [vmem:[#allocation3 + $0xa0] sm:$0xff]  ;;  %v188_v17 = vld [vmem:[%s182_s24] sm:$0xff]  ;;  %v189_v18 = vld [vmem:[%s182_s24 + $0x8] sm:$0xff] }
  0x12   : > { %562 = vmatpush.bf16.msra.mxu2 %v869_v6  ;;  %v875_v15 = vld [vmem:[#allocation3 + $0xe0] sm:$0xff]  ;;  %192 = vst [vmem:[#allocation2 + $0x2] sm:$0xff] %v188_v17  ;;  %v866_v20 = vld [vmem:[#allocation3 + $0x98] sm:$0xff]  ;;  %v849_v23 = vld [vmem:[#allocation3 + $0x10] sm:$0xff]  ;;  %v286_v42 = vpack.c.bf16 %v189_v18, %v188_v17 }
  0x13   : > { %576 = vmatpush.bf16.msra.mxu3 %v877_v7  ;;  %v859_v16 = vld [vmem:[#allocation3 + $0x60] sm:$0xff]  ;;  %193 = vst [vmem:[#allocation2 + $0xa] sm:$0xff] %v189_v18  ;;  %v874_v21 = vld [vmem:[#allocation3 + $0xd8] sm:$0xff]  ;;  %v865_v24 = vld [vmem:[#allocation3 + $0x90] sm:$0xff] }
  0x14   : > { %548 = vmatpush.bf16.msra.mxu1 %v861_v8  ;;  %v858_v22 = vld [vmem:[#allocation3 + $0x58] sm:$0xff]  ;;  %v873_v25 = vld [vmem:[#allocation3 + $0xd0] sm:$0xff]  ;;  %v848_v27 = vld [vmem:[#allocation3 + $0x8] sm:$0xff] }
  0x15   : > { %535 = vmatpush.bf16.msra.mxu0 %v852_v9  ;;  %v857_v26 = vld [vmem:[#allocation3 + $0x50] sm:$0xff]  ;;  %v864_v28 = vld [vmem:[#allocation3 + $0x88] sm:$0xff]  ;;  %v847_v31 = vld [vmem:[#allocation3] sm:$0xff] }
  0x16   : > { %563 = vmatpush.bf16.msra.mxu2 %v868_v10  ;;  %v872_v29 = vld [vmem:[#allocation3 + $0xc8] sm:$0xff]  ;;  %v886_v32 = vld [vmem:[#allocation3 + $0x138] sm:$0xff]  ;;  %v863_v33 = vld [vmem:[#allocation3 + $0x80] sm:$0xff] }
  0x17   : > { %577 = vmatpush.bf16.msra.mxu3 %v876_v11  ;;  %v856_v30 = vld [vmem:[#allocation3 + $0x48] sm:$0xff]  ;;  %v871_v36 = vld [vmem:[#allocation3 + $0xc0] sm:$0xff]  ;;  %v885_v45 = vld [vmem:[#allocation3 + $0x130] sm:$0xff] }
  0x18   : > { %549 = vmatpush.bf16.msra.mxu1 %v860_v12  ;;  %v855_v39 = vld [vmem:[#allocation3 + $0x40] sm:$0xff]  ;;  %v884_v47 = vld [vmem:[#allocation3 + $0x128] sm:$0xff]  ;;  %v882_v49 = vld [vmem:[#allocation3 + $0x118] sm:$0xff] }
  0x19   : > { %536 = vmatpush.bf16.msra.mxu0 %v851_v13  ;;  %v194_v34 = vld [vmem:[#allocation2] sm:$0xff]  ;;  %v883_v48 = vld [vmem:[#allocation3 + $0x120] sm:$0xff]  ;;  %v881_v50 = vld [vmem:[#allocation3 + $0x110] sm:$0xff] }
  0x1a   : > { %564 = vmatpush.bf16.msra.mxu2 %v867_v14  ;;  %v195_v35 = vld [vmem:[#allocation2 + $0x8] sm:$0xff]  ;;  %v880_v51 = vld [vmem:[#allocation3 + $0x108] sm:$0xff]  ;;  %v879_v52 = vld [vmem:[#allocation3 + $0x100] sm:$0xff] }
  0x1b   : > { %578 = vmatpush.bf16.msra.mxu3 %v875_v15  ;;  %v200_v37 = vld [vmem:[#allocation2 + $0x3] sm:$0xff]  ;;  %v201_v38 = vld [vmem:[#allocation2 + $0xb] sm:$0xff]  ;;  %v284_v43 = vpack.c.bf16 %v195_v35, %v194_v34  ;;  %v909_v57 = vld [vmem:[%s1008_s2] ss:$0 sm:$0xff] }
  0x1c   : > { %550 = vmatpush.bf16.msra.mxu1 %v859_v16  ;;  %v196_v40 = vld [vmem:[#allocation2 + $0x1] sm:$0xff]  ;;  %v197_v41 = vld [vmem:[#allocation2 + $0x9] sm:$0xff]  ;;  %v287_v44 = vpack.c.bf16 %v201_v38, %v200_v37 }
  0x1d   : > { %537 = vmatpush.bf16.msra.mxu0 %v850_v19  ;;  %v285_v46 = vpack.c.bf16 %v197_v41, %v196_v40  ;;  %v202_v53 = vld [vmem:[#allocation2 + $0x4] sm:$0xff]  ;;  %v203_v54 = vld [vmem:[#allocation2 + $0xc] sm:$0xff] }
  0x1e   : > { %565 = vmatpush.bf16.msra.mxu2 %v866_v20  ;;  %v288_v55 = vpack.c.bf16 %v203_v54, %v202_v53 }
  0x1f   : > { %579 = vmatpush.bf16.msra.mxu3 %v874_v21 }
  0x20   : > { %551 = vmatpush.bf16.msra.mxu1 %v858_v22 }
  0x21   : > { %538 = vmatpush.bf16.msra.mxu0 %v849_v23 }
  0x22   : > { %566 = vmatpush.bf16.msra.mxu2 %v865_v24 }
  0x23   : > { %580 = vmatpush.bf16.msra.mxu3 %v873_v25 }
  0x24   : > { %552 = vmatpush.bf16.msra.mxu1 %v857_v26 }
  0x25   : > { %539 = vmatpush.bf16.msra.mxu0 %v848_v27 }
  0x26   : > { %567 = vmatpush.bf16.msra.mxu2 %v864_v28 }
  0x27   : > { %581 = vmatpush.bf16.msra.mxu3 %v872_v29 }
  0x28   : > { %553 = vmatpush.bf16.msra.mxu1 %v856_v30 }
  0x29   : > { %540 = vmatpush.bf16.msra.mxu0 %v847_v31 }
  0x2a   : > { %568 = vmatpush.bf16.msra.mxu2 %v863_v33 }
  0x2b   : > { %582 = vmatpush.bf16.msra.mxu3 %v871_v36 }
  0x2c   : > { %554 = vmatpush.bf16.msra.mxu1 %v855_v39  ;;  %541 = vmatmul.bf16.vlgmr.msra.gmra.mxu0 %v284_v43 }
  0x2d   : > { %589 = vmatpush.bf16.msrb.mxu0 %v886_v32  ;;  %569 = vmatmul.bf16.vlgmr.msra.gmra.mxu2 %v286_v42 }
  0x2e   : > { %583 = vmatmul.bf16.vlgmr.msra.gmra.mxu3 %v287_v44 }
  0x2f   : > { %555 = vmatmul.bf16.vlgmr.msra.gmra.mxu1 %v285_v46 }
  0x31   : > { %590 = vmatpush.bf16.msrb.mxu0 %v885_v45 }
  0x35   : > { %591 = vmatpush.bf16.msrb.mxu0 %v884_v47 }
  0x39   : > { %592 = vmatpush.bf16.msrb.mxu0 %v883_v48 }
  0x3d   : > { %593 = vmatpush.bf16.msrb.mxu0 %v882_v49 }
  0x41   : > { %594 = vmatpush.bf16.msrb.mxu0 %v881_v50 }
  0x45   : > { %595 = vmatpush.bf16.msrb.mxu0 %v880_v51 }
  0x49   : > { %596 = vmatpush.bf16.msrb.mxu0 %v879_v52 }
  0x4c   : > { %597 = vmatmul.bf16.vlgmr.msrb.gmra.mxu0 %v288_v55 }
  0xa9   : > { %v542_v56 = vpop.f32.mrf.mxu0 }
  0xaa   : > { %v543_v59 = vadd.f32 %v909_v57, %v542_v56 }
  0xac   : > { %v556_v58 = vpop.f32.mrf.mxu1 }
  0xad   : > { %v557_v61 = vadd.f32 %v556_v58, %v543_v59 }
  0xb0   : > { %v570_v60 = vpop.f32.mrf.mxu2 }
  0xb1   : > { %v544_v62 = vpop.f32.mrf.mxu0  ;;  %v584_v63 = vpop.f32.mrf.mxu3  ;;  %v571_v0 = vadd.f32 %v570_v60, %v557_v61 }
  0xb2   : > { %v545_v1 = vadd.f32 %v909_v57, %v544_v62 }
  0xb3   : > { %v585_v3 = vadd.f32 %v584_v63, %v571_v0 }
  0xb4   : > { %v558_v2 = vpop.f32.mrf.mxu1 }
  0xb5   : > { %v559_v4 = vadd.f32 %v558_v2, %v545_v1 }
  0xb8   : > { %v572_v5 = vpop.f32.mrf.mxu2 }
  0xb9   : > { %v573_v8 = vadd.f32 %v572_v5, %v559_v4  ;;  %v586_v9 = vpop.f32.mrf.mxu3 }
  0xbb   : > { %v587_v10 = vadd.f32 %v586_v9, %v573_v8 }
  0xc9   : > { %v598_v6 = vpop.f32.mrf.mxu0 }
  0xca   : > { %v599_v7 = vadd.f32 %v598_v6, %v585_v3 }
  0xcc   : > { %603 = vst [vmem:[%s187_s29] sm:$0xff] %v599_v7 }
  0xd1   : > { %v600_v11 = vpop.f32.mrf.mxu0 }
  0xd2   : > { %v601_v12 = vadd.f32 %v600_v11, %v587_v10 }
  0xd4   : > { %604 = vst [vmem:[%s187_s29 + $0x8] sm:$0xff] %v601_v12 }
  0xd5 PF: > { %s14_s12 = sadd.s32 1, %s950_s12  }
  0xd6   : > { %p11_p7 = scmp.ge.s32.totalorder %s14_s12, 4  }
  0xd8   :  { %13 = sbr.rel (!%p11_p7) target bundleno = 1 (0x1), region = 67 }
  0xdd   :  { %626 = vsyncpa [#allocation4], 1 }
  0xde   :  { %628 = vsyncpa [#allocation4 + $0x1], 1 }

// kernel: run.10
= control target key start
LH: loop header
LB: loop body
LE: loop exit
PB: predicated region body
PF: predicated region fallthrough
CT: control target
= control target key end

     0   :  { %10 = vsyncpa [#allocation4], 0  ;;  %s1757_s0 = inlined_call_operand.vmem [shape: f32[2,4,128], index: 0, kind: input, shape index: {}]   ;;  %s1758_s1 = inlined_call_operand.hbm [shape: bf16[640,128], index: 1, kind: input, shape index: {}]   ;;  %s1759_s2 = inlined_call_operand.vmem [shape: f32[1,128], index: 2, kind: input, shape index: {}]   ;;  %s1760_s3 = inlined_call_operand.hbm [shape: bf16[640,128], index: 3, kind: input, shape index: {}]   ;;  %s1761_s4 = inlined_call_operand.vmem [shape: f32[1,128], index: 4, kind: input, shape index: {}]   ;;  %s1762_s5 = inlined_call_operand.vmem [shape: f32[2,4,128], index: 5, kind: output, shape index: {}]  }
   0x1   :  { %11 = vsyncpa [#allocation6], 0  ;;  %s1700_s18 = smov 0  }
   0x2 LB: > { %s169_s21 = sshll.u32 %s1758_s1, 4  ;;  %s1142_s22 = sadd.s32 4294967295, %s1663_s18   ;;  %s1663_s18 = sphi %s1700_s18, %s17_s18   ;;  %s170_s21 = int_to_ptr.hbm [resolvable:$true] %s169_s21 }
   0x3   : > { %p1144_p0 = scmp.ge.s32.totalorder %s1663_s18, 1  ;;  %p158_p1 = scmp.lt.s32.totalorder %s1663_s18, 3 }
   0x4   : > { %p1570_p2 = scmp.eq.s32.totalorder %s1142_s22, 0  ;;  %s1665_s24 = smov [#allocation3]  }
   0x5   : > { %p1711_p3 = pnand %p1144_p0, %p158_p1  ;;  %s171_s25 = sshll.u32 %s1665_s24, 4  ;;  %s172_s25 = int_to_ptr.vmem [resolvable:$true] %s171_s25 }
   0x6   : > { %s186_s28 = sshll.u32 %s1760_s3, 4  ;;  %s1666_s29 = smov [#allocation5]   ;;  %s187_s28 = int_to_ptr.hbm [resolvable:$true] %s186_s28 }
   0x7   : > { %p1563_p4 = pneg %p1711_p3  ;;  %s188_s30 = sshll.u32 %s1666_s29, 4  ;;  %s189_s30 = int_to_ptr.vmem [resolvable:$true] %s188_s30 }
   0x8   : > { %s1667_s6 = smov 64   ;;  %s1668_s7 = smov 4  }
   0x9   : > { %p1564_p5 = pnand %p1570_p2, %p1563_p4  ;;  %214 = sbr.rel (%p1711_p3) target bundleno = 372 (0x174), region = 40 }
   0xb   : > { %1566 = dma.hbm_to_vmem [thread:$0]  (!%p1564_p5), %s170_s21, 5120, %s172_s25, [#allocation4], %s1667_s6, %s1667_s6, %s1668_s7  }
   0xc   : > { %1569 = dma.hbm_to_vmem [thread:$0]  (!%p1564_p5), %s187_s28, 5120, %s189_s30, [#allocation6], %s1667_s6, %s1667_s6, %s1668_s7  }
   0xe   : > { %1654 = dma.done.wait (%p1570_p2), [#allocation4], 5120  }
   0xf   : > { %1656 = vsyncadd (%p1570_p2), [#allocation4], 4294962176 }
  0x10   : > { %1658 = dma.done.wait (%p1570_p2), [#allocation6], 5120  }
  0x11   : > { %1660 = vsyncadd (%p1570_p2), [#allocation6], 4294962176  ;;  %p246_p6 = scmp.lt.s32.totalorder %s1142_s22, 1  ;;  %v1669_v0 = vmov 0.0   ;;  %v1482_v1 = vld [vmem:[#allocation3 + $0x38] sm:$0xff]  ;;  %v1481_v4 = vld [vmem:[#allocation3 + $0x30] sm:$0xff] }
  0x12   : > { %255 = vst [vmem:[#allocation2] sm:$0x3] %v1669_v0  ;;  %v1498_v2 = vld [vmem:[#allocation3 + $0xb8] sm:$0xff]  ;;  %592 = vmatpush.bf16.msra.mxu0 %v1482_v1  ;;  %v1497_v6 = vld [vmem:[#allocation3 + $0xb0] sm:$0xff]  ;;  %v1480_v9 = vld [vmem:[#allocation3 + $0x28] sm:$0xff] }
  0x13   : > { %256 = vst [vmem:[#allocation2 + $0x6] sm:$0x3] %v1669_v0  ;;  %s1765_s22 = smov (!%p246_p6, %s1142_s22), 1  ;;  %v1506_v3 = vld [vmem:[#allocation3 + $0xf8] sm:$0xff]  ;;  %618 = vmatpush.bf16.msra.mxu2 %v1498_v2  ;;  %v1505_v7 = vld [vmem:[#allocation3 + $0xf0] sm:$0xff]  ;;  %v1496_v10 = vld [vmem:[#allocation3 + $0xa8] sm:$0xff] }
  0x14   : > { %v1490_v5 = vld [vmem:[#allocation3 + $0x78] sm:$0xff]  ;;  %631 = vmatpush.bf16.msra.mxu3 %v1506_v3  ;;  %s1151_s8 = sshll.u32 %s1765_s22, 2  ;;  %v1489_v8 = vld [vmem:[#allocation3 + $0x70] sm:$0xff]  ;;  %v1504_v11 = vld [vmem:[#allocation3 + $0xe8] sm:$0xff] }
  0x15   : > { %605 = vmatpush.bf16.msra.mxu1 %v1490_v5  ;;  %s249_s11 = scalar_lea.vmem %s1757_s0, %s1151_s8  ;;  %v1488_v12 = vld [vmem:[#allocation3 + $0x68] sm:$0xff]  ;;  %v1479_v14 = vld [vmem:[#allocation3 + $0x20] sm:$0xff]  ;;  %v1478_v18 = vld [vmem:[#allocation3 + $0x18] sm:$0xff]  ;;  %s253_s19 = scalar_lea.vmem %s1762_s5, %s1151_s8 }
  0x16   : > { %593 = vmatpush.bf16.msra.mxu0 %v1481_v4  ;;  %v1737_v13 = vld [vmem:[%s249_s11] sm:$0xf]  ;;  %v1495_v15 = vld [vmem:[#allocation3 + $0xa0] sm:$0xff]  ;;  %v1477_v22 = vld [vmem:[#allocation3 + $0x10] sm:$0xff] }
  0x17   : > { %619 = vmatpush.bf16.msra.mxu2 %v1497_v6  ;;  %257 = vst [vmem:[#allocation2 + $0x2] sm:$0xf] %v1737_v13  ;;  %v1503_v16 = vld [vmem:[#allocation3 + $0xe0] sm:$0xff]  ;;  %v1494_v19 = vld [vmem:[#allocation3 + $0x98] sm:$0xff]  ;;  %v1493_v25 = vld [vmem:[#allocation3 + $0x90] sm:$0xff] }
  0x18   : > { %632 = vmatpush.bf16.msra.mxu3 %v1505_v7  ;;  %v1487_v17 = vld [vmem:[#allocation3 + $0x60] sm:$0xff]  ;;  %v1502_v20 = vld [vmem:[#allocation3 + $0xd8] sm:$0xff]  ;;  %v1501_v26 = vld [vmem:[#allocation3 + $0xd0] sm:$0xff] }
  0x19   : > { %606 = vmatpush.bf16.msra.mxu1 %v1489_v8  ;;  %v1486_v21 = vld [vmem:[#allocation3 + $0x58] sm:$0xff]  ;;  %v1485_v27 = vld [vmem:[#allocation3 + $0x50] sm:$0xff]  ;;  %v1476_v28 = vld [vmem:[#allocation3 + $0x8] sm:$0xff] }
  0x1a   : > { %594 = vmatpush.bf16.msra.mxu0 %v1480_v9  ;;  %v1492_v29 = vld [vmem:[#allocation3 + $0x88] sm:$0xff]  ;;  %v1475_v32 = vld [vmem:[#allocation3] sm:$0xff]  ;;  %v1514_v33 = vld [vmem:[#allocation3 + $0x138] sm:$0xff] }
  0x1b   : > { %620 = vmatpush.bf16.msra.mxu2 %v1496_v10  ;;  %v1500_v30 = vld [vmem:[#allocation3 + $0xc8] sm:$0xff]  ;;  %v1491_v34 = vld [vmem:[#allocation3 + $0x80] sm:$0xff]  ;;  %v1522_v42 = vld [vmem:[#allocation5 + $0x38] sm:$0xff] }
  0x1c   : > { %633 = vmatpush.bf16.msra.mxu3 %v1504_v11  ;;  %v1484_v31 = vld [vmem:[#allocation3 + $0x48] sm:$0xff]  ;;  %v1499_v38 = vld [vmem:[#allocation3 + $0xc0] sm:$0xff]  ;;  %v1513_v43 = vld [vmem:[#allocation3 + $0x130] sm:$0xff] }
  0x1d   : > { %607 = vmatpush.bf16.msra.mxu1 %v1488_v12  ;;  %v1483_v39 = vld [vmem:[#allocation3 + $0x40] sm:$0xff]  ;;  %v1512_v46 = vld [vmem:[#allocation3 + $0x128] sm:$0xff]  ;;  %v1510_v48 = vld [vmem:[#allocation3 + $0x118] sm:$0xff] }
  0x1e   : > { %595 = vmatpush.bf16.msra.mxu0 %v1479_v14  ;;  %v258_v23 = vld [vmem:[#allocation2] sm:$0xf]  ;;  %v262_v37 = vld [vmem:[#allocation2 + $0x4] sm:$0xf]  ;;  %v1511_v47 = vld [vmem:[#allocation3 + $0x120] sm:$0xff] }
  0x1f   : > { %621 = vmatpush.bf16.msra.mxu2 %v1495_v15  ;;  %v259_v24 = vld [vmem:[#allocation2 + $0x1] sm:$0xf]  ;;  %v343_v40 = vpack.c.bf16 %v258_v23, %v258_v23  ;;  %v1509_v49 = vld [vmem:[#allocation3 + $0x110] sm:$0xff]  ;;  %v1508_v50 = vld [vmem:[#allocation3 + $0x108] sm:$0xff]  ;;  %v347_v52 = vpack.c.bf16 %v262_v37, %v262_v37 }
  0x20   : > { %634 = vmatpush.bf16.msra.mxu3 %v1503_v16  ;;  %660 = vst [vmem:[#allocation2] sm:$0x3] %v1669_v0  ;;  %v260_v35 = vld [vmem:[#allocation2 + $0x2] sm:$0xf]  ;;  %v344_v45 = vpack.c.bf16 %v259_v24, %v259_v24  ;;  %v1507_v51 = vld [vmem:[#allocation3 + $0x100] sm:$0xff]  ;;  %v1521_v53 = vld [vmem:[#allocation5 + $0x30] sm:$0xff] }
  0x21   : > { %608 = vmatpush.bf16.msra.mxu1 %v1487_v17  ;;  %v261_v36 = vld [vmem:[#allocation2 + $0x3] sm:$0xf]  ;;  %v345_v41 = vpack.c.bf16 %v260_v35, %v260_v35  ;;  %v1520_v54 = vld [vmem:[#allocation5 + $0x28] sm:$0xff]  ;;  %v1519_v55 = vld [vmem:[#allocation5 + $0x20] sm:$0xff] }
  0x22   : > { %596 = vmatpush.bf16.msra.mxu0 %v1478_v18  ;;  %661 = vst [vmem:[#allocation2 + $0x6] sm:$0x3] %v1669_v0  ;;  %v346_v44 = vpack.c.bf16 %v261_v36, %v261_v36  ;;  %v1530_v56 = vld [vmem:[#allocation5 + $0x78] sm:$0xff]  ;;  %v1529_v59 = vld [vmem:[#allocation5 + $0x70] sm:$0xff]  ;;  %v1528_v63 = vld [vmem:[#allocation5 + $0x68] sm:$0xff] }
  0x23   : > { %622 = vmatpush.bf16.msra.mxu2 %v1494_v19  ;;  %v1538_v57 = vld [vmem:[#allocation5 + $0xb8] sm:$0xff]  ;;  %v1537_v60 = vld [vmem:[#allocation5 + $0xb0] sm:$0xff]  ;;  %v1536_v0 = vld [vmem:[#allocation5 + $0xa8] sm:$0xff] }
  0x24   : > { %635 = vmatpush.bf16.msra.mxu3 %v1502_v20  ;;  %v1546_v58 = vld [vmem:[#allocation5 + $0xf8] sm:$0xff]  ;;  %v1545_v62 = vld [vmem:[#allocation5 + $0xf0] sm:$0xff]  ;;  %v1544_v2 = vld [vmem:[#allocation5 + $0xe8] sm:$0xff] }
  0x25   : > { %609 = vmatpush.bf16.msra.mxu1 %v1486_v21  ;;  %v1518_v61 = vld [vmem:[#allocation5 + $0x18] sm:$0xff]  ;;  %v1517_v1 = vld [vmem:[#allocation5 + $0x10] sm:$0xff]  ;;  %v1527_v3 = vld [vmem:[#allocation5 + $0x60] sm:$0xff] }
  0x26   : > { %597 = vmatpush.bf16.msra.mxu0 %v1477_v22  ;;  %v1535_v4 = vld [vmem:[#allocation5 + $0xa0] sm:$0xff]  ;;  %v1516_v5 = vld [vmem:[#allocation5 + $0x8] sm:$0xff]  ;;  %v1526_v8 = vld [vmem:[#allocation5 + $0x58] sm:$0xff] }
  0x27   : > { %623 = vmatpush.bf16.msra.mxu2 %v1493_v25  ;;  %v1543_v6 = vld [vmem:[#allocation5 + $0xe0] sm:$0xff]  ;;  %v1534_v9 = vld [vmem:[#allocation5 + $0x98] sm:$0xff]  ;;  %v1525_v14 = vld [vmem:[#allocation5 + $0x50] sm:$0xff] }
  0x28   : > { %636 = vmatpush.bf16.msra.mxu3 %v1501_v26  ;;  %v1515_v7 = vld [vmem:[#allocation5] sm:$0xff]  ;;  %v1542_v10 = vld [vmem:[#allocation5 + $0xd8] sm:$0xff]  ;;  %v1533_v15 = vld [vmem:[#allocation5 + $0x90] sm:$0xff] }
  0x29   : > { %610 = vmatpush.bf16.msra.mxu1 %v1485_v27  ;;  %v1554_v11 = vld [vmem:[#allocation5 + $0x138] sm:$0xff]  ;;  %v1541_v16 = vld [vmem:[#allocation5 + $0xd0] sm:$0xff]  ;;  %v1524_v19 = vld [vmem:[#allocation5 + $0x48] sm:$0xff] }
  0x2a   : > { %598 = vmatpush.bf16.msra.mxu0 %v1476_v28  ;;  %v1553_v17 = vld [vmem:[#allocation5 + $0x130] sm:$0xff]  ;;  %v1532_v20 = vld [vmem:[#allocation5 + $0x88] sm:$0xff]  ;;  %v1523_v23 = vld [vmem:[#allocation5 + $0x40] sm:$0xff] }
  0x2b   : > { %624 = vmatpush.bf16.msra.mxu2 %v1492_v29  ;;  %v1540_v21 = vld [vmem:[#allocation5 + $0xc8] sm:$0xff]  ;;  %v1531_v24 = vld [vmem:[#allocation5 + $0x80] sm:$0xff] }
  0x2c   : > { %637 = vmatpush.bf16.msra.mxu3 %v1500_v30  ;;  %v1552_v22 = vld [vmem:[#allocation5 + $0x128] sm:$0xff]  ;;  %v1539_v26 = vld [vmem:[#allocation5 + $0xc0] sm:$0xff] }
  0x2d   : > { %611 = vmatpush.bf16.msra.mxu1 %v1484_v31  ;;  %v1551_v27 = vld [vmem:[#allocation5 + $0x120] sm:$0xff]  ;;  %v1587_v31 = vld [vmem:[%s1759_s2] ss:$0 sm:$0xff]  ;;  %v1548_v37 = vld [vmem:[#allocation5 + $0x108] sm:$0xff] }
  0x2e   : > { %599 = vmatpush.bf16.msra.mxu0 %v1475_v32  ;;  %v1550_v32 = vld [vmem:[#allocation5 + $0x118] sm:$0xff] }
  0x2f   : > { %625 = vmatpush.bf16.msra.mxu2 %v1491_v34  ;;  %v1549_v34 = vld [vmem:[#allocation5 + $0x110] sm:$0xff] }
  0x30   : > { %638 = vmatpush.bf16.msra.mxu3 %v1499_v38 }
  0x31   : > { %612 = vmatpush.bf16.msra.mxu1 %v1483_v39  ;;  %600 = vmatmul.bf16.vlgmr.msra.gmra.mxu0 %v343_v40  ;;  %v1547_v39 = vld [vmem:[#allocation5 + $0x100] sm:$0xff] }
  0x32   : > { %644 = vmatpush.bf16.msrb.mxu0 %v1514_v33  ;;  %626 = vmatmul.bf16.vlgmr.msra.gmra.mxu2 %v345_v41 }
  0x33   : > { %639 = vmatmul.bf16.vlgmr.msra.gmra.mxu3 %v346_v44  ;;  %1010 = vmatpush.bf16.msrb.mxu2 %v1530_v56 }
  0x34   : > { %613 = vmatmul.bf16.vlgmr.msra.gmra.mxu1 %v344_v45  ;;  %1023 = vmatpush.bf16.msrb.mxu3 %v1538_v57 }
  0x35   : > { %997 = vmatpush.bf16.msrb.mxu1 %v1522_v42 }
  0x36   : > { %645 = vmatpush.bf16.msrb.mxu0 %v1513_v43 }
  0x37   : > { %1011 = vmatpush.bf16.msrb.mxu2 %v1529_v59 }
  0x38   : > { %1024 = vmatpush.bf16.msrb.mxu3 %v1537_v60 }
  0x39   : > { %998 = vmatpush.bf16.msrb.mxu1 %v1521_v53 }
  0x3a   : > { %646 = vmatpush.bf16.msrb.mxu0 %v1512_v46 }
  0x3b   : > { %1012 = vmatpush.bf16.msrb.mxu2 %v1528_v63 }
  0x3c   : > { %1025 = vmatpush.bf16.msrb.mxu3 %v1536_v0 }
  0x3d   : > { %999 = vmatpush.bf16.msrb.mxu1 %v1520_v54 }
  0x3e   : > { %647 = vmatpush.bf16.msrb.mxu0 %v1511_v47 }
  0x3f   : > { %1013 = vmatpush.bf16.msrb.mxu2 %v1527_v3 }
  0x40   : > { %1026 = vmatpush.bf16.msrb.mxu3 %v1535_v4 }
  0x41   : > { %1000 = vmatpush.bf16.msrb.mxu1 %v1519_v55 }
  0x42   : > { %648 = vmatpush.bf16.msrb.mxu0 %v1510_v48 }
  0x43   : > { %1014 = vmatpush.bf16.msrb.mxu2 %v1526_v8 }
  0x44   : > { %1027 = vmatpush.bf16.msrb.mxu3 %v1534_v9 }
  0x45   : > { %1001 = vmatpush.bf16.msrb.mxu1 %v1518_v61 }
  0x46   : > { %649 = vmatpush.bf16.msrb.mxu0 %v1509_v49 }
  0x47   : > { %1015 = vmatpush.bf16.msrb.mxu2 %v1525_v14 }
  0x48   : > { %1028 = vmatpush.bf16.msrb.mxu3 %v1533_v15 }
  0x49   : > { %1002 = vmatpush.bf16.msrb.mxu1 %v1517_v1 }
  0x4a   : > { %650 = vmatpush.bf16.msrb.mxu0 %v1508_v50 }
  0x4b   : > { %1016 = vmatpush.bf16.msrb.mxu2 %v1524_v19 }
  0x4c   : > { %1029 = vmatpush.bf16.msrb.mxu3 %v1532_v20 }
  0x4d   : > { %1003 = vmatpush.bf16.msrb.mxu1 %v1516_v5 }
  0x4e   : > { %651 = vmatpush.bf16.msrb.mxu0 %v1507_v51 }
  0x4f   : > { %1017 = vmatpush.bf16.msrb.mxu2 %v1523_v23 }
  0x50   : > { %1030 = vmatpush.bf16.msrb.mxu3 %v1531_v24 }
  0x51   : > { %652 = vmatmul.bf16.vlgmr.msrb.gmra.mxu0 %v347_v52  ;;  %1004 = vmatpush.bf16.msrb.mxu1 %v1515_v7 }
  0x52   : > { %1036 = vmatpush.bf16.msra.mxu0 %v1546_v58  ;;  %v1588_v58 = vld [vmem:[%s1761_s4] ss:$0 sm:$0xff] }
  0x55   : > { %1049 = vmatpush.bf16.msra.mxu1 %v1554_v11 }
  0x56   : > { %1037 = vmatpush.bf16.msra.mxu0 %v1545_v62 }
  0x59   : > { %1050 = vmatpush.bf16.msra.mxu1 %v1553_v17 }
  0x5a   : > { %1038 = vmatpush.bf16.msra.mxu0 %v1544_v2 }
  0x5d   : > { %1051 = vmatpush.bf16.msra.mxu1 %v1552_v22 }
  0x5e   : > { %1039 = vmatpush.bf16.msra.mxu0 %v1543_v6 }
  0x61   : > { %1052 = vmatpush.bf16.msra.mxu1 %v1551_v27 }
  0x62   : > { %1040 = vmatpush.bf16.msra.mxu0 %v1542_v10 }
  0x65   : > { %1053 = vmatpush.bf16.msra.mxu1 %v1550_v32 }
  0x66   : > { %1041 = vmatpush.bf16.msra.mxu0 %v1541_v16 }
  0x69   : > { %1054 = vmatpush.bf16.msra.mxu1 %v1549_v34 }
  0x6a   : > { %1042 = vmatpush.bf16.msra.mxu0 %v1540_v21 }
  0x6d   : > { %1055 = vmatpush.bf16.msra.mxu1 %v1548_v37 }
  0x6e   : > { %1043 = vmatpush.bf16.msra.mxu0 %v1539_v26 }
  0x71   : > { %1056 = vmatpush.bf16.msra.mxu1 %v1547_v39 }
  0xae   : > { %v601_v12 = vpop.f32.mrf.mxu0 }
  0xaf   : > { %v602_v35 = vadd.f32 %v1587_v31, %v601_v12 }
  0xb1   : > { %v614_v18 = vpop.f32.mrf.mxu1 }
  0xb2   : > { %v615_v38 = vadd.f32 %v614_v18, %v602_v35 }
  0xb5   : > { %v627_v25 = vpop.f32.mrf.mxu2 }
  0xb6   : > { %v603_v28 = vpop.f32.mrf.mxu0  ;;  %v640_v29 = vpop.f32.mrf.mxu3  ;;  %v628_v40 = vadd.f32 %v627_v25, %v615_v38 }
  0xb8   : > { %v641_v41 = vadd.f32 %v640_v29, %v628_v40 }
  0xb9   : > { %v616_v30 = vpop.f32.mrf.mxu1 }
  0xbd   : > { %v629_v33 = vpop.f32.mrf.mxu2 }
  0xbe   : > { %v642_v36 = vpop.f32.mrf.mxu3 }
  0xce   : > { %v653_v42 = vpop.f32.mrf.mxu0 }
  0xcf   : > { %v654_v43 = vadd.f32 %v653_v42, %v641_v41 }
  0xd1   : > { %vm657_vm0 = vcmp.ge.f32.partialorder %v654_v43, 0.0  ;;  %v658_v44 = vmul.f32 0.2, %v654_v43 }
  0xd3   : > { %v659_v45 = vsel %vm657_vm0, %v654_v43, %v658_v44 }
  0xd4   : > { %662 = vst [vmem:[#allocation2 + $0x2] sm:$0xf] %v659_v45 }
  0xd6   : > { %v655_v46 = vpop.f32.mrf.mxu0 }
  0xdb   : > { %v663_v47 = vld [vmem:[#allocation2] sm:$0xf]  ;;  %v667_v55 = vld [vmem:[#allocation2 + $0x4] sm:$0xf] }
  0xdc   : > { %v664_v48 = vld [vmem:[#allocation2 + $0x1] sm:$0xf]  ;;  %v748_v50 = vpack.c.bf16 %v663_v47, %v663_v47  ;;  %v752_v56 = vpack.c.bf16 %v667_v55, %v667_v55 }
  0xdd   : > { %v665_v49 = vld [vmem:[#allocation2 + $0x2] sm:$0xf]  ;;  %v749_v51 = vpack.c.bf16 %v664_v48, %v664_v48 }
  0xde   : > { %v750_v52 = vpack.c.bf16 %v665_v49, %v665_v49  ;;  %v666_v53 = vld [vmem:[#allocation2 + $0x3] sm:$0xf]  ;;  %1005 = vmatmul.bf16.vlgmr.msrb.gmra.mxu1 %v748_v50 }
  0xdf   : > { %v751_v54 = vpack.c.bf16 %v666_v53, %v666_v53  ;;  %1018 = vmatmul.bf16.vlgmr.msrb.gmra.mxu2 %v749_v51 }
  0xe0   : > { %1031 = vmatmul.bf16.vlgmr.msrb.gmra.mxu3 %v750_v52 }
  0xe1   : > { %1044 = vmatmul.bf16.vlgmr.msra.gmra.mxu0 %v751_v54 }
  0xee   : > { %1057 = vmatmul.bf16.vlgmr.msra.gmra.mxu1 %v752_v56 }
 0x15b   : > { %v1006_v57 = vpop.f32.mrf.mxu1 }
 0x15c   : > { %v1007_v60 = vadd.f32 %v1588_v58, %v1006_v57 }
 0x15e   : > { %v1045_v59 = vpop.f32.mrf.mxu0 }
 0x162   : > { %v1019_v61 = vpop.f32.mrf.mxu2 }
 0x163   : > { %v1020_v62 = vadd.f32 %v1019_v61, %v1007_v60  ;;  %v1032_v63 = vpop.f32.mrf.mxu3  ;;  %v1008_v0 = vpop.f32.mrf.mxu1 }
 0x165   : > { %v1033_v2 = vadd.f32 %v1032_v63, %v1020_v62 }
 0x166   : > { %v1047_v1 = vpop.f32.mrf.mxu0 }
 0x167   : > { %v1046_v5 = vadd.f32 %v1045_v59, %v1033_v2 }
 0x16a   : > { %v1021_v3 = vpop.f32.mrf.mxu2 }
 0x16b   : > { %v1034_v4 = vpop.f32.mrf.mxu3  ;;  %v1058_v6 = vpop.f32.mrf.mxu1 }
 0x16c   : > { %v1059_v7 = vadd.f32 %v1058_v6, %v1046_v5 }
 0x16e   : > { %v1062_v8 = vadd.f32 %v1059_v7, %v1737_v13 }
 0x170   : > { %vm1063_vm1 = vcmp.ge.f32.partialorder %v1062_v8, 0.0  ;;  %v1064_v9 = vmul.f32 0.2, %v1062_v8 }
 0x172   : > { %v1065_v10 = vsel %vm1063_vm1, %v1062_v8, %v1064_v9 }
 0x173   : > { %1066 = vst [vmem:[%s253_s19] sm:$0xf] %v1065_v10  ;;  %v1060_v11 = vpop.f32.mrf.mxu1 }
 0x174 PF: > { %s17_s18 = sadd.s32 1, %s1663_s18  }
 0x175   : > { %p14_p7 = scmp.ge.s32.totalorder %s17_s18, 4  }
 0x177   :  { %16 = sbr.rel (!%p14_p7) target bundleno = 2 (0x2), region = 79 }
 0x17c   :  { %1086 = vsyncpa [#allocation4], 1 }
 0x17d   :  { %1088 = vsyncpa [#allocation4 + $0x1], 1 }
 0x17e   :  { %1089 = vsyncpa [#allocation6], 1 }

// kernel: run.9
= control target key start
LH: loop header
LB: loop body
LE: loop exit
PB: predicated region body
PF: predicated region fallthrough
CT: control target
= control target key end

     0   :  { %16 = vsyncpa [#allocation4], 0  ;;  %s2811_s0 = inlined_call_operand.vmem [shape: f32[2,8,128], index: 0, kind: input, shape index: {}]   ;;  %s2812_s1 = inlined_call_operand.hbm [shape: bf16[640,128], index: 1, kind: input, shape index: {}]   ;;  %s2813_s2 = inlined_call_operand.vmem [shape: f32[1,128], index: 2, kind: input, shape index: {}]   ;;  %s2814_s3 = inlined_call_operand.vmem [shape: bf16[128,128], index: 3, kind: input, shape index: {}]   ;;  %s2815_s4 = inlined_call_operand.vmem [shape: f32[1,128], index: 4, kind: input, shape index: {}]   ;;  %s2816_s5 = inlined_call_operand.hbm [shape: bf16[640,128], index: 5, kind: input, shape index: {}]   ;;  %s2817_s6 = inlined_call_operand.vmem [shape: f32[1,128], index: 6, kind: input, shape index: {}]   ;;  %s2818_s7 = inlined_call_operand.hbm [shape: bf16[640,128], index: 7, kind: input, shape index: {}]   ;;  %s2819_s8 = inlined_call_operand.vmem [shape: f32[1,128], index: 8, kind: input, shape index: {}]   ;;  %s2820_s9 = inlined_call_operand.vmem [shape: f32[2,8,128], index: 9, kind: output, shape index: {0}]   ;;  %s2821_s10 = inlined_call_operand.vmem [shape: f32[2,4,128], index: 10, kind: output, shape index: {1}]  }
   0x1   :  { %17 = vsyncpa [#allocation6], 0  ;;  %s2702_s13 = smov 0  }
   0x2 LB: > { %s2708_s14 = sadd.s32 4294967295, %s2639_s13   ;;  %p1835_p0 = scmp.ge.s32.totalorder %s2639_s13, 1  ;;  %s2639_s13 = sphi %s2702_s13, %s23_s13  }
   0x3   : > { %p274_p1 = scmp.lt.s32.totalorder %s2639_s13, 3  ;;  %p2511_p2 = scmp.eq.s32.totalorder %s2708_s14, 0 }
   0x4   : > { %s308_s17 = sshll.u32 %s2816_s5, 4  ;;  %s285_s21 = sshll.u32 %s2812_s1, 4  ;;  %s309_s17 = int_to_ptr.hbm [resolvable:$true] %s308_s17  ;;  %s286_s21 = int_to_ptr.hbm [resolvable:$true] %s285_s21 }
   0x5   : > { %p2716_p3 = pnand %p1835_p0, %p274_p1  ;;  %s2641_s22 = smov [#allocation5]  }
   0x6   : > { %s310_s23 = sshll.u32 %s2641_s22, 4  ;;  %s2642_s24 = smov [#allocation3]   ;;  %s311_s23 = int_to_ptr.vmem [resolvable:$true] %s310_s23 }
   0x7   : > { %p2501_p4 = pneg %p2716_p3  ;;  %s287_s25 = sshll.u32 %s2642_s24, 4  ;;  %s288_s25 = int_to_ptr.vmem [resolvable:$true] %s287_s25 }
   0x8   : > { %s325_s28 = sshll.u32 %s2818_s7, 4  ;;  %s2643_s29 = smov 64   ;;  %s326_s28 = int_to_ptr.hbm [resolvable:$true] %s325_s28 }
   0x9   : > { %p2502_p5 = pnand %p2511_p2, %p2501_p4  ;;  %s2644_s30 = smov 4  }
   0xa   : > { %s2645_s11 = smov [#allocation7]   ;;  %353 = sbr.rel (%p2716_p3) target bundleno = 545 (0x221), region = 56 }
   0xb   : > { %2507 = dma.hbm_to_vmem [thread:$0]  (!%p2502_p5), %s309_s17, 5120, %s311_s23, [#allocation6], %s2643_s29, %s2643_s29, %s2644_s30  }
   0xc   : > { %2504 = dma.hbm_to_vmem [thread:$0]  (!%p2502_p5), %s286_s21, 5120, %s288_s25, [#allocation4], %s2643_s29, %s2643_s29, %s2644_s30  }
   0xd   : > { %s327_s12 = sshll.u32 %s2645_s11, 4  ;;  %s328_s12 = int_to_ptr.vmem [resolvable:$true] %s327_s12 }
   0xe   : > { %2510 = dma.hbm_to_vmem [thread:$0]  (!%p2502_p5), %s326_s28, 5120, %s328_s12, [#allocation6], %s2643_s29, %s2643_s29, %s2644_s30  }
   0xf   : > { %2630 = dma.done.wait (%p2511_p2), [#allocation4], 5120  }
  0x10   : > { %2632 = vsyncadd (%p2511_p2), [#allocation4], 4294962176 }
  0x11   : > { %2634 = dma.done.wait (%p2511_p2), [#allocation6], 10240  }
  0x12   : > { %2636 = vsyncadd (%p2511_p2), [#allocation6], 4294957056  ;;  %p404_p6 = scmp.lt.s32.totalorder %s2708_s14, 1  ;;  %v2646_v0 = vmov 0.0   ;;  %v2368_v1 = vld [vmem:[#allocation3 + $0x38] sm:$0xff]  ;;  %v2367_v4 = vld [vmem:[#allocation3 + $0x30] sm:$0xff] }
  0x13   : > { %417 = vst [vmem:[#allocation2] sm:$0x3] %v2646_v0  ;;  %v2384_v2 = vld [vmem:[#allocation3 + $0xb8] sm:$0xff]  ;;  %754 = vmatpush.bf16.msra.mxu0 %v2368_v1  ;;  %v2383_v6 = vld [vmem:[#allocation3 + $0xb0] sm:$0xff]  ;;  %v2366_v9 = vld [vmem:[#allocation3 + $0x28] sm:$0xff] }
  0x14   : > { %418 = vst [vmem:[#allocation2 + $0xa] sm:$0x3] %v2646_v0  ;;  %s2824_s14 = smov (!%p404_p6, %s2708_s14), 1  ;;  %v2392_v3 = vld [vmem:[#allocation3 + $0xf8] sm:$0xff]  ;;  %780 = vmatpush.bf16.msra.mxu2 %v2384_v2  ;;  %v2391_v7 = vld [vmem:[#allocation3 + $0xf0] sm:$0xff]  ;;  %v2382_v10 = vld [vmem:[#allocation3 + $0xa8] sm:$0xff] }
  0x15   : > { %v2376_v5 = vld [vmem:[#allocation3 + $0x78] sm:$0xff]  ;;  %793 = vmatpush.bf16.msra.mxu3 %v2392_v3  ;;  %s1844_s15 = sshll.u32 %s2824_s14, 3  ;;  %v2375_v8 = vld [vmem:[#allocation3 + $0x70] sm:$0xff]  ;;  %v2390_v11 = vld [vmem:[#allocation3 + $0xe8] sm:$0xff]  ;;  %s1846_s28 = sshll.u32 %s2824_s14, 2 }
  0x16   : > { %767 = vmatpush.bf16.msra.mxu1 %v2376_v5  ;;  %s407_s18 = scalar_lea.vmem %s2811_s0, %s1844_s15  ;;  %v2374_v12 = vld [vmem:[#allocation3 + $0x68] sm:$0xff]  ;;  %v2365_v14 = vld [vmem:[#allocation3 + $0x20] sm:$0xff]  ;;  %v2364_v18 = vld [vmem:[#allocation3 + $0x18] sm:$0xff]  ;;  %s411_s26 = scalar_lea.vmem %s2820_s9, %s1844_s15 }
  0x17   : > { %755 = vmatpush.bf16.msra.mxu0 %v2367_v4  ;;  %v416_v13 = vld [vmem:[%s407_s18] sm:$0xff]  ;;  %v2381_v15 = vld [vmem:[#allocation3 + $0xa0] sm:$0xff]  ;;  %v2380_v19 = vld [vmem:[#allocation3 + $0x98] sm:$0xff]  ;;  %s415_s11 = scalar_lea.vmem %s2821_s10, %s1846_s28 }
  0x18   : > { %781 = vmatpush.bf16.msra.mxu2 %v2383_v6  ;;  %419 = vst [vmem:[#allocation2 + $0x2] sm:$0xff] %v416_v13  ;;  %v2389_v16 = vld [vmem:[#allocation3 + $0xe0] sm:$0xff]  ;;  %v2388_v20 = vld [vmem:[#allocation3 + $0xd8] sm:$0xff]  ;;  %v2363_v24 = vld [vmem:[#allocation3 + $0x10] sm:$0xff]  ;;  %v2754_v40 = vpack.c.bf16 %v416_v13, %v416_v13 }
  0x19   : > { %794 = vmatpush.bf16.msra.mxu3 %v2391_v7  ;;  %v2373_v17 = vld [vmem:[#allocation3 + $0x60] sm:$0xff]  ;;  %v2372_v21 = vld [vmem:[#allocation3 + $0x58] sm:$0xff]  ;;  %v2379_v25 = vld [vmem:[#allocation3 + $0x90] sm:$0xff] }
  0x1a   : > { %768 = vmatpush.bf16.msra.mxu1 %v2375_v8  ;;  %v2387_v26 = vld [vmem:[#allocation3 + $0xd0] sm:$0xff]  ;;  %v2362_v28 = vld [vmem:[#allocation3 + $0x8] sm:$0xff]  ;;  %v2361_v32 = vld [vmem:[#allocation3] sm:$0xff] }
  0x1b   : > { %756 = vmatpush.bf16.msra.mxu0 %v2366_v9  ;;  %v2371_v27 = vld [vmem:[#allocation3 + $0x50] sm:$0xff]  ;;  %v2378_v29 = vld [vmem:[#allocation3 + $0x88] sm:$0xff]  ;;  %v2400_v33 = vld [vmem:[#allocation3 + $0x138] sm:$0xff] }
  0x1c   : > { %782 = vmatpush.bf16.msra.mxu2 %v2382_v10  ;;  %v2386_v30 = vld [vmem:[#allocation3 + $0xc8] sm:$0xff]  ;;  %v2377_v34 = vld [vmem:[#allocation3 + $0x80] sm:$0xff]  ;;  %v2399_v42 = vld [vmem:[#allocation3 + $0x130] sm:$0xff] }
  0x1d   : > { %795 = vmatpush.bf16.msra.mxu3 %v2390_v11  ;;  %v2370_v31 = vld [vmem:[#allocation3 + $0x48] sm:$0xff]  ;;  %v2385_v37 = vld [vmem:[#allocation3 + $0xc0] sm:$0xff]  ;;  %v2416_v45 = vld [vmem:[#allocation5 + $0x38] sm:$0xff] }
  0x1e   : > { %769 = vmatpush.bf16.msra.mxu1 %v2374_v12  ;;  %v2369_v38 = vld [vmem:[#allocation3 + $0x40] sm:$0xff]  ;;  %v2408_v41 = vld [vmem:[%s2814_s3 + $0x38] sm:$0xff]  ;;  %v2406_v48 = vld [vmem:[%s2814_s3 + $0x28] sm:$0xff] }
  0x1f   : > { %757 = vmatpush.bf16.msra.mxu0 %v2365_v14  ;;  %v420_v22 = vld [vmem:[#allocation2] sm:$0xff]  ;;  %v2407_v46 = vld [vmem:[%s2814_s3 + $0x30] sm:$0xff]  ;;  %v2398_v47 = vld [vmem:[#allocation3 + $0x128] sm:$0xff] }
  0x20   : > { %783 = vmatpush.bf16.msra.mxu2 %v2381_v15  ;;  %v421_v23 = vld [vmem:[#allocation2 + $0x1] sm:$0xff]  ;;  %v505_v39 = vpack.c.bf16 %v420_v22, %v420_v22  ;;  %v2397_v49 = vld [vmem:[#allocation3 + $0x120] sm:$0xff]  ;;  %v2404_v52 = vld [vmem:[%s2814_s3 + $0x18] sm:$0xff] }
  0x21   : > { %796 = vmatpush.bf16.msra.mxu3 %v2389_v16  ;;  %904 = vst [vmem:[#allocation2] sm:$0x3] %v2646_v0  ;;  %v423_v35 = vld [vmem:[#allocation2 + $0x3] sm:$0xff]  ;;  %v506_v44 = vpack.c.bf16 %v421_v23, %v421_v23  ;;  %v2394_v54 = vld [vmem:[#allocation3 + $0x108] sm:$0xff]  ;;  %v2393_v55 = vld [vmem:[#allocation3 + $0x100] sm:$0xff] }
  0x22   : > { %770 = vmatpush.bf16.msra.mxu1 %v2373_v17  ;;  %v424_v36 = vld [vmem:[#allocation2 + $0x4] sm:$0xff]  ;;  %v508_v43 = vpack.c.bf16 %v423_v35, %v423_v35  ;;  %v2403_v57 = vld [vmem:[%s2814_s3 + $0x10] sm:$0xff]  ;;  %v2414_v60 = vld [vmem:[#allocation5 + $0x28] sm:$0xff] }
  0x23   : > { %758 = vmatpush.bf16.msra.mxu0 %v2364_v18  ;;  %905 = vst [vmem:[#allocation2 + $0xa] sm:$0x3] %v2646_v0  ;;  %v2405_v50 = vld [vmem:[%s2814_s3 + $0x20] sm:$0xff]  ;;  %v2396_v51 = vld [vmem:[#allocation3 + $0x118] sm:$0xff]  ;;  %v509_v56 = vpack.c.bf16 %v424_v36, %v424_v36  ;;  %v2413_v63 = vld [vmem:[#allocation5 + $0x20] sm:$0xff] }
  0x24   : > { %784 = vmatpush.bf16.msra.mxu2 %v2380_v19  ;;  %v2395_v53 = vld [vmem:[#allocation3 + $0x110] sm:$0xff]  ;;  %v2402_v59 = vld [vmem:[%s2814_s3 + $0x8] sm:$0xff]  ;;  %v2430_v7 = vld [vmem:[#allocation5 + $0xa8] sm:$0xff] }
  0x25   : > { %797 = vmatpush.bf16.msra.mxu3 %v2388_v20  ;;  %v2415_v58 = vld [vmem:[#allocation5 + $0x30] sm:$0xff]  ;;  %v2432_v61 = vld [vmem:[#allocation5 + $0xb8] sm:$0xff]  ;;  %v2422_v8 = vld [vmem:[#allocation5 + $0x68] sm:$0xff] }
  0x26   : > { %771 = vmatpush.bf16.msra.mxu1 %v2372_v21  ;;  %v2401_v62 = vld [vmem:[%s2814_s3] sm:$0xff]  ;;  %v2424_v1 = vld [vmem:[#allocation5 + $0x78] sm:$0xff]  ;;  %v2438_v10 = vld [vmem:[#allocation5 + $0xe8] sm:$0xff] }
  0x27   : > { %759 = vmatpush.bf16.msra.mxu0 %v2363_v24  ;;  %v2440_v2 = vld [vmem:[#allocation5 + $0xf8] sm:$0xff]  ;;  %v2423_v3 = vld [vmem:[#allocation5 + $0x70] sm:$0xff]  ;;  %v2429_v11 = vld [vmem:[#allocation5 + $0xa0] sm:$0xff] }
  0x28   : > { %785 = vmatpush.bf16.msra.mxu2 %v2379_v25  ;;  %v2431_v4 = vld [vmem:[#allocation5 + $0xb0] sm:$0xff]  ;;  %v2412_v5 = vld [vmem:[#allocation5 + $0x18] sm:$0xff]  ;;  %v2421_v12 = vld [vmem:[#allocation5 + $0x60] sm:$0xff] }
  0x29   : > { %798 = vmatpush.bf16.msra.mxu3 %v2387_v26  ;;  %v2439_v6 = vld [vmem:[#allocation5 + $0xf0] sm:$0xff]  ;;  %v2410_v13 = vld [vmem:[#allocation5 + $0x8] sm:$0xff]  ;;  %v2437_v14 = vld [vmem:[#allocation5 + $0xe0] sm:$0xff] }
  0x2a   : > { %772 = vmatpush.bf16.msra.mxu1 %v2371_v27  ;;  %v2411_v9 = vld [vmem:[#allocation5 + $0x10] sm:$0xff]  ;;  %v2428_v15 = vld [vmem:[#allocation5 + $0x98] sm:$0xff]  ;;  %v2409_v17 = vld [vmem:[#allocation5] sm:$0xff] }
  0x2b   : > { %760 = vmatpush.bf16.msra.mxu0 %v2362_v28  ;;  %v2427_v16 = vld [vmem:[#allocation5 + $0x90] sm:$0xff]  ;;  %v2420_v18 = vld [vmem:[#allocation5 + $0x58] sm:$0xff]  ;;  %v2426_v21 = vld [vmem:[#allocation5 + $0x88] sm:$0xff] }
  0x2c   : > { %786 = vmatpush.bf16.msra.mxu2 %v2378_v29  ;;  %v2436_v19 = vld [vmem:[#allocation5 + $0xd8] sm:$0xff]  ;;  %v2419_v23 = vld [vmem:[#allocation5 + $0x50] sm:$0xff]  ;;  %v2425_v26 = vld [vmem:[#allocation5 + $0x80] sm:$0xff] }
  0x2d   : > { %799 = vmatpush.bf16.msra.mxu3 %v2386_v30  ;;  %v2448_v20 = vld [vmem:[#allocation5 + $0x138] sm:$0xff]  ;;  %v2435_v24 = vld [vmem:[#allocation5 + $0xd0] sm:$0xff]  ;;  %v2418_v28 = vld [vmem:[#allocation5 + $0x48] sm:$0xff] }
  0x2e   : > { %773 = vmatpush.bf16.msra.mxu1 %v2370_v31  ;;  %v2447_v25 = vld [vmem:[#allocation5 + $0x130] sm:$0xff]  ;;  %v2434_v29 = vld [vmem:[#allocation5 + $0xc8] sm:$0xff]  ;;  %v2417_v31 = vld [vmem:[#allocation5 + $0x40] sm:$0xff] }
  0x2f   : > { %761 = vmatpush.bf16.msra.mxu0 %v2361_v32  ;;  %v2446_v30 = vld [vmem:[#allocation5 + $0x128] sm:$0xff]  ;;  %v2433_v32 = vld [vmem:[#allocation5 + $0xc0] sm:$0xff] }
  0x30   : > { %787 = vmatpush.bf16.msra.mxu2 %v2377_v34  ;;  %v2445_v34 = vld [vmem:[#allocation5 + $0x120] sm:$0xff] }
  0x31   : > { %800 = vmatpush.bf16.msra.mxu3 %v2385_v37 }
  0x32   : > { %774 = vmatpush.bf16.msra.mxu1 %v2369_v38  ;;  %762 = vmatmul.bf16.vlgmr.msra.gmra.mxu0 %v505_v39  ;;  %v2531_v38 = vld [vmem:[%s2813_s2] ss:$0 sm:$0xff]  ;;  %v2444_v39 = vld [vmem:[#allocation5 + $0x118] sm:$0xff] }
  0x33   : > { %806 = vmatpush.bf16.msrb.mxu0 %v2400_v33  ;;  %788 = vmatmul.bf16.vlgmr.msra.gmra.mxu2 %v2754_v40 }
  0x34   : > { %801 = vmatmul.bf16.vlgmr.msra.gmra.mxu3 %v508_v43  ;;  %1241 = vmatpush.bf16.msrb.mxu2 %v2416_v45 }
  0x35   : > { %775 = vmatmul.bf16.vlgmr.msra.gmra.mxu1 %v506_v44  ;;  %1254 = vmatpush.bf16.msrb.mxu3 %v2424_v1  ;;  %v2442_v44 = vld [vmem:[#allocation5 + $0x108] sm:$0xff] }
  0x36   : > { %891 = vmatpush.bf16.msrb.mxu1 %v2408_v41  ;;  %v2443_v41 = vld [vmem:[#allocation5 + $0x110] sm:$0xff] }
  0x37   : > { %807 = vmatpush.bf16.msrb.mxu0 %v2399_v42 }
  0x38   : > { %1242 = vmatpush.bf16.msrb.mxu2 %v2415_v58 }
  0x39   : > { %1255 = vmatpush.bf16.msrb.mxu3 %v2423_v3  ;;  %v2455_v3 = vld [vmem:[#allocation7 + $0x30] sm:$0xff] }
  0x3a   : > { %892 = vmatpush.bf16.msrb.mxu1 %v2407_v46  ;;  %v2441_v46 = vld [vmem:[#allocation5 + $0x100] sm:$0xff] }
  0x3b   : > { %808 = vmatpush.bf16.msrb.mxu0 %v2398_v47 }
  0x3c   : > { %1243 = vmatpush.bf16.msrb.mxu2 %v2414_v60 }
  0x3d   : > { %1256 = vmatpush.bf16.msrb.mxu3 %v2422_v8  ;;  %v2480_v8 = vld [vmem:[#allocation7 + $0xf8] sm:$0xff] }
  0x3e   : > { %893 = vmatpush.bf16.msrb.mxu1 %v2406_v48 }
  0x3f   : > { %809 = vmatpush.bf16.msrb.mxu0 %v2397_v49 }
  0x40   : > { %1244 = vmatpush.bf16.msrb.mxu2 %v2413_v63  ;;  %v2456_v63 = vld [vmem:[#allocation7 + $0x38] sm:$0xff] }
  0x41   : > { %1257 = vmatpush.bf16.msrb.mxu3 %v2421_v12  ;;  %v2451_v12 = vld [vmem:[#allocation7 + $0x10] sm:$0xff] }
  0x42   : > { %894 = vmatpush.bf16.msrb.mxu1 %v2405_v50 }
  0x43   : > { %810 = vmatpush.bf16.msrb.mxu0 %v2396_v51 }
  0x44   : > { %1245 = vmatpush.bf16.msrb.mxu2 %v2412_v5  ;;  %v2453_v5 = vld [vmem:[#allocation7 + $0x20] sm:$0xff] }
  0x45   : > { %1258 = vmatpush.bf16.msrb.mxu3 %v2420_v18  ;;  %v2469_v18 = vld [vmem:[#allocation7 + $0xa0] sm:$0xff] }
  0x46   : > { %895 = vmatpush.bf16.msrb.mxu1 %v2404_v52 }
  0x47   : > { %811 = vmatpush.bf16.msrb.mxu0 %v2395_v53 }
  0x48   : > { %1246 = vmatpush.bf16.msrb.mxu2 %v2411_v9  ;;  %v2463_v9 = vld [vmem:[#allocation7 + $0x70] sm:$0xff] }
  0x49   : > { %1259 = vmatpush.bf16.msrb.mxu3 %v2419_v23  ;;  %v2468_v23 = vld [vmem:[#allocation7 + $0x98] sm:$0xff] }
  0x4a   : > { %896 = vmatpush.bf16.msrb.mxu1 %v2403_v57 }
  0x4b   : > { %812 = vmatpush.bf16.msrb.mxu0 %v2394_v54 }
  0x4c   : > { %1247 = vmatpush.bf16.msrb.mxu2 %v2410_v13  ;;  %v2462_v13 = vld [vmem:[#allocation7 + $0x68] sm:$0xff] }
  0x4d   : > { %1260 = vmatpush.bf16.msrb.mxu3 %v2418_v28  ;;  %v2475_v28 = vld [vmem:[#allocation7 + $0xd0] sm:$0xff] }
  0x4e   : > { %897 = vmatpush.bf16.msrb.mxu1 %v2402_v59 }
  0x4f   : > { %813 = vmatpush.bf16.msrb.mxu0 %v2393_v55 }
  0x50   : > { %1248 = vmatpush.bf16.msrb.mxu2 %v2409_v17  ;;  %v2461_v17 = vld [vmem:[#allocation7 + $0x60] sm:$0xff] }
  0x51   : > { %1261 = vmatpush.bf16.msrb.mxu3 %v2417_v31  ;;  %v2466_v31 = vld [vmem:[#allocation7 + $0x88] sm:$0xff] }
  0x52   : > { %814 = vmatmul.bf16.vlgmr.msrb.gmra.mxu0 %v509_v56  ;;  %898 = vmatpush.bf16.msrb.mxu1 %v2401_v62 }
  0x53   : > { %1267 = vmatpush.bf16.msra.mxu0 %v2432_v61 }
  0x54   : > { %1293 = vmatpush.bf16.msra.mxu2 %v2448_v20  ;;  %v2449_v20 = vld [vmem:[#allocation7] sm:$0xff] }
  0x55   : > { %899 = vmatmul.bf16.vlgmr.msrb.gmra.mxu1 %v2754_v40  ;;  %1652 = vmatpush.bf16.msra.mxu3 %v2456_v63 }
  0x56   : > { %1280 = vmatpush.bf16.msra.mxu1 %v2440_v2 }
  0x57   : > { %1268 = vmatpush.bf16.msra.mxu0 %v2431_v4  ;;  %v2454_v4 = vld [vmem:[#allocation7 + $0x28] sm:$0xff] }
  0x58   : > { %1294 = vmatpush.bf16.msra.mxu2 %v2447_v25  ;;  %v2488_v25 = vld [vmem:[#allocation7 + $0x138] sm:$0xff] }
  0x59   : > { %1653 = vmatpush.bf16.msra.mxu3 %v2455_v3 }
  0x5a   : > { %1281 = vmatpush.bf16.msra.mxu1 %v2439_v6  ;;  %v2464_v6 = vld [vmem:[#allocation7 + $0x78] sm:$0xff] }
  0x5b   : > { %1269 = vmatpush.bf16.msra.mxu0 %v2430_v7  ;;  %v2472_v7 = vld [vmem:[#allocation7 + $0xb8] sm:$0xff] }
  0x5c   : > { %1295 = vmatpush.bf16.msra.mxu2 %v2446_v30  ;;  %v2458_v30 = vld [vmem:[#allocation7 + $0x48] sm:$0xff] }
  0x5d   : > { %1654 = vmatpush.bf16.msra.mxu3 %v2454_v4 }
  0x5e   : > { %1282 = vmatpush.bf16.msra.mxu1 %v2438_v10  ;;  %v2471_v10 = vld [vmem:[#allocation7 + $0xb0] sm:$0xff] }
  0x5f   : > { %1270 = vmatpush.bf16.msra.mxu0 %v2429_v11  ;;  %v2479_v11 = vld [vmem:[#allocation7 + $0xf0] sm:$0xff] }
  0x60   : > { %1296 = vmatpush.bf16.msra.mxu2 %v2445_v34  ;;  %v2486_v34 = vld [vmem:[#allocation7 + $0x128] sm:$0xff] }
  0x61   : > { %1655 = vmatpush.bf16.msra.mxu3 %v2453_v5 }
  0x62   : > { %1283 = vmatpush.bf16.msra.mxu1 %v2437_v14  ;;  %v2470_v14 = vld [vmem:[#allocation7 + $0xa8] sm:$0xff] }
  0x63   : > { %1271 = vmatpush.bf16.msra.mxu0 %v2428_v15  ;;  %v2478_v15 = vld [vmem:[#allocation7 + $0xe8] sm:$0xff] }
  0x64   : > { %1297 = vmatpush.bf16.msra.mxu2 %v2444_v39  ;;  %v2485_v39 = vld [vmem:[#allocation7 + $0x120] sm:$0xff] }
  0x66   : > { %1284 = vmatpush.bf16.msra.mxu1 %v2436_v19  ;;  %v2477_v19 = vld [vmem:[#allocation7 + $0xe0] sm:$0xff] }
  0x67   : > { %1272 = vmatpush.bf16.msra.mxu0 %v2427_v16  ;;  %v2450_v16 = vld [vmem:[#allocation7 + $0x8] sm:$0xff] }
  0x68   : > { %1298 = vmatpush.bf16.msra.mxu2 %v2443_v41 }
  0x6a   : > { %1285 = vmatpush.bf16.msra.mxu1 %v2435_v24  ;;  %v2476_v24 = vld [vmem:[#allocation7 + $0xd8] sm:$0xff] }
  0x6b   : > { %1273 = vmatpush.bf16.msra.mxu0 %v2426_v21 }
  0x6c   : > { %1299 = vmatpush.bf16.msra.mxu2 %v2442_v44 }
  0x6e   : > { %1286 = vmatpush.bf16.msra.mxu1 %v2434_v29  ;;  %v2487_v29 = vld [vmem:[#allocation7 + $0x130] sm:$0xff] }
  0x6f   : > { %1274 = vmatpush.bf16.msra.mxu0 %v2425_v26  ;;  %v2459_v26 = vld [vmem:[#allocation7 + $0x50] sm:$0xff] }
  0x70   : > { %1300 = vmatpush.bf16.msra.mxu2 %v2441_v46  ;;  %v2483_v46 = vld [vmem:[#allocation7 + $0x110] sm:$0xff] }
  0x72   : > { %1287 = vmatpush.bf16.msra.mxu1 %v2433_v32  ;;  %v2474_v32 = vld [vmem:[#allocation7 + $0xc8] sm:$0xff] }
  0x73   : > { %1665 = vmatpush.bf16.msrb.mxu0 %v2464_v6 }
  0x76   : > { %1678 = vmatpush.bf16.msrb.mxu1 %v2472_v7 }
  0x77   : > { %1666 = vmatpush.bf16.msrb.mxu0 %v2463_v9 }
  0x7a   : > { %1679 = vmatpush.bf16.msrb.mxu1 %v2471_v10  ;;  %v2534_v10 = vld [vmem:[%s2819_s8] ss:$0 sm:$0xff] }
  0x7b   : > { %1667 = vmatpush.bf16.msrb.mxu0 %v2462_v13 }
  0x7e   : > { %1680 = vmatpush.bf16.msrb.mxu1 %v2470_v14 }
  0x7f   : > { %1668 = vmatpush.bf16.msrb.mxu0 %v2461_v17 }
  0x82   : > { %1681 = vmatpush.bf16.msrb.mxu1 %v2469_v18 }
  0x86   : > { %1682 = vmatpush.bf16.msrb.mxu1 %v2468_v23 }
  0xaf   : > { %v763_v22 = vpop.f32.mrf.mxu0 }
  0xb0   : > { %v764_v42 = vadd.f32 %v2531_v38, %v763_v22  ;;  %v2460_v22 = vld [vmem:[#allocation7 + $0x58] sm:$0xff]  ;;  %v2473_v38 = vld [vmem:[#allocation7 + $0xc0] sm:$0xff] }
  0xb1   : > { %1669 = vmatpush.bf16.msrb.mxu0 %v2460_v22 }
  0xb2   : > { %v776_v27 = vpop.f32.mrf.mxu1 }
  0xb3   : > { %v777_v45 = vadd.f32 %v776_v27, %v764_v42  ;;  %v2467_v27 = vld [vmem:[#allocation7 + $0x90] sm:$0xff] }
  0xb4   : > { %1683 = vmatpush.bf16.msrb.mxu1 %v2467_v27 }
  0xb5   : > { %1670 = vmatpush.bf16.msrb.mxu0 %v2459_v26 }
  0xb6   : > { %v789_v33 = vpop.f32.mrf.mxu2 }
  0xb7   : > { %v765_v35 = vpop.f32.mrf.mxu0  ;;  %v802_v36 = vpop.f32.mrf.mxu3  ;;  %v790_v47 = vadd.f32 %v789_v33, %v777_v45  ;;  %v2484_v45 = vld [vmem:[#allocation7 + $0x118] sm:$0xff] }
  0xb8   : > { %1684 = vmatpush.bf16.msrb.mxu1 %v2466_v31 }
  0xb9   : > { %v803_v48 = vadd.f32 %v802_v36, %v790_v47  ;;  %1671 = vmatpush.bf16.msrb.mxu0 %v2458_v30  ;;  %v2457_v36 = vld [vmem:[#allocation7 + $0x40] sm:$0xff] }
  0xba   : > { %v778_v37 = vpop.f32.mrf.mxu1 }
  0xbb   : > { %v2465_v37 = vld [vmem:[#allocation7 + $0x80] sm:$0xff] }
  0xbc   : > { %1685 = vmatpush.bf16.msrb.mxu1 %v2465_v37 }
  0xbd   : > { %1672 = vmatpush.bf16.msrb.mxu0 %v2457_v36 }
  0xbe   : > { %v791_v40 = vpop.f32.mrf.mxu2 }
  0xbf   : > { %v804_v43 = vpop.f32.mrf.mxu3  ;;  %v2533_v40 = vld [vmem:[%s2817_s6] ss:$0 sm:$0xff] }
  0xcf   : > { %v815_v49 = vpop.f32.mrf.mxu0 }
  0xd0   : > { %v816_v50 = vadd.f32 %v815_v49, %v803_v48 }
  0xd2   : > { %vm819_vm0 = vcmp.ge.f32.partialorder %v816_v50, 0.0  ;;  %v820_v51 = vmul.f32 0.2, %v816_v50  ;;  %v2787_v1 = vpop.f32.mrf.mxu1 }
  0xd4   : > { %v821_v52 = vsel %vm819_vm0, %v816_v50, %v820_v51  ;;  %v2482_v50 = vld [vmem:[#allocation7 + $0x108] sm:$0xff] }
  0xd5   : > { %906 = vst [vmem:[#allocation2 + $0x2] sm:$0xff] %v821_v52  ;;  %v994_v53 = vpack.c.bf16 %v821_v52, %v821_v52  ;;  %v2532_v52 = vld [vmem:[%s2815_s4] ss:$0 sm:$0xff] }
  0xd7   : > { %v817_v54 = vpop.f32.mrf.mxu0  ;;  %1275 = vmatmul.bf16.vlgmr.msra.gmra.mxu0 %v994_v53  ;;  %v2481_v53 = vld [vmem:[#allocation7 + $0x100] sm:$0xff] }
  0xda   : > { %v902_v2 = vpop.f32.mrf.mxu1 }
  0xdc   : > { %v907_v55 = vld [vmem:[#allocation2] sm:$0xff] }
  0xdd   : > { %v908_v56 = vld [vmem:[#allocation2 + $0x1] sm:$0xff]  ;;  %v992_v58 = vpack.c.bf16 %v907_v55, %v907_v55 }
  0xde   : > { %v910_v57 = vld [vmem:[#allocation2 + $0x3] sm:$0xff]  ;;  %v993_v59 = vpack.c.bf16 %v908_v56, %v908_v56  ;;  %1311 = vst [vmem:[#allocation2] sm:$0x3] %v2646_v0  ;;  %v901_v56 = vadd.f32 %v2532_v52, %v2787_v1 }
  0xdf   : > { %v995_v60 = vpack.c.bf16 %v910_v57, %v910_v57  ;;  %v911_v61 = vld [vmem:[#allocation2 + $0x4] sm:$0xff]  ;;  %1249 = vmatmul.bf16.vlgmr.msrb.gmra.mxu2 %v992_v58 }
  0xe0   : > { %1312 = vst [vmem:[#allocation2 + $0xa] sm:$0x3] %v2646_v0  ;;  %1262 = vmatmul.bf16.vlgmr.msrb.gmra.mxu3 %v993_v59  ;;  %v996_v62 = vpack.c.bf16 %v911_v61, %v911_v61  ;;  %1691 = vmatpush.bf16.msrb.mxu2 %v2480_v8  ;;  %v2452_v0 = vld [vmem:[#allocation7 + $0x18] sm:$0xff] }
  0xe1   : > { %1288 = vmatmul.bf16.vlgmr.msra.gmra.mxu1 %v995_v60  ;;  %1656 = vmatpush.bf16.msra.mxu3 %v2452_v0 }
  0xe4   : > { %1692 = vmatpush.bf16.msrb.mxu2 %v2479_v11 }
  0xe5   : > { %1657 = vmatpush.bf16.msra.mxu3 %v2451_v12 }
  0xe8   : > { %1693 = vmatpush.bf16.msrb.mxu2 %v2478_v15 }
  0xe9   : > { %1658 = vmatpush.bf16.msra.mxu3 %v2450_v16 }
  0xec   : > { %1694 = vmatpush.bf16.msrb.mxu2 %v2477_v19 }
  0xed   : > { %1659 = vmatpush.bf16.msra.mxu3 %v2449_v20 }
  0xef   : > { %1301 = vmatmul.bf16.vlgmr.msra.gmra.mxu2 %v996_v62 }
  0xf0   : > { %1695 = vmatpush.bf16.msrb.mxu2 %v2476_v24 }
  0xf1   : > { %1704 = vmatpush.bf16.msrb.mxu3 %v2488_v25 }
  0xf4   : > { %1696 = vmatpush.bf16.msrb.mxu2 %v2475_v28 }
  0xf5   : > { %1705 = vmatpush.bf16.msrb.mxu3 %v2487_v29 }
  0xf8   : > { %1697 = vmatpush.bf16.msrb.mxu2 %v2474_v32 }
  0xf9   : > { %1706 = vmatpush.bf16.msrb.mxu3 %v2486_v34 }
  0xfc   : > { %1698 = vmatpush.bf16.msrb.mxu2 %v2473_v38 }
  0xfd   : > { %1707 = vmatpush.bf16.msrb.mxu3 %v2485_v39 }
 0x101   : > { %1708 = vmatpush.bf16.msrb.mxu3 %v2484_v45 }
 0x105   : > { %1709 = vmatpush.bf16.msrb.mxu3 %v2483_v46 }
 0x109   : > { %1710 = vmatpush.bf16.msrb.mxu3 %v2482_v50 }
 0x10d   : > { %1711 = vmatpush.bf16.msrb.mxu3 %v2481_v53 }
 0x154   : > { %v1276_v21 = vpop.f32.mrf.mxu0 }
 0x15c   : > { %v1278_v33 = vpop.f32.mrf.mxu0 }
 0x15e   : > { %v1289_v35 = vpop.f32.mrf.mxu1 }
 0x162   : > { %v1250_v41 = vpop.f32.mrf.mxu2 }
 0x163   : > { %v1263_v42 = vpop.f32.mrf.mxu3  ;;  %v1251_v43 = vadd.f32 %v2533_v40, %v1250_v41 }
 0x165   : > { %v1264_v47 = vadd.f32 %v1263_v42, %v1251_v43 }
 0x166   : > { %v1291_v44 = vpop.f32.mrf.mxu1 }
 0x167   : > { %v1277_v51 = vadd.f32 %v1276_v21, %v1264_v47 }
 0x169   : > { %v1290_v54 = vadd.f32 %v1289_v35, %v1277_v51 }
 0x16a   : > { %v1252_v48 = vpop.f32.mrf.mxu2 }
 0x16b   : > { %v1265_v49 = vpop.f32.mrf.mxu3 }
 0x172   : > { %v1302_v55 = vpop.f32.mrf.mxu2 }
 0x173   : > { %v1303_v57 = vadd.f32 %v1302_v55, %v1290_v54 }
 0x175   : > { %v1306_v58 = vadd.f32 %v1303_v57, %v901_v56 }
 0x177   : > { %vm1307_vm1 = vcmp.ge.f32.partialorder %v1306_v58, 0.0  ;;  %v1308_v59 = vmul.f32 0.2, %v1306_v58 }
 0x179   : > { %v1309_v60 = vsel %vm1307_vm1, %v1306_v58, %v1308_v59 }
 0x17a   : > { %1310 = vst [vmem:[%s411_s26] sm:$0xff] %v1309_v60  ;;  %v1304_v61 = vpop.f32.mrf.mxu2 }
 0x17b   : > { %1313 = vst [vmem:[#allocation2 + $0x2] sm:$0xff] %v1309_v60 }
 0x182   : > { %v1314_v62 = vld [vmem:[#allocation2] ss:$2 sm:$0xf]  ;;  %v1316_v63 = vld [vmem:[#allocation2 + $0x1] ss:$2 sm:$0xf] }
 0x183   : > { %v1403_v2 = vpack.c.bf16 %v1314_v62, %v1314_v62  ;;  %v1404_v3 = vpack.c.bf16 %v1316_v63, %v1316_v63  ;;  %v1318_v4 = vld [vmem:[#allocation2 + $0x2] ss:$2 sm:$0xf]  ;;  %v1320_v1 = vld [vmem:[#allocation2 + $0x3] ss:$2 sm:$0xf] }
 0x184   : > { %v1405_v5 = vpack.c.bf16 %v1318_v4, %v1318_v4  ;;  %v1406_v6 = vpack.c.bf16 %v1320_v1, %v1320_v1  ;;  %v1322_v7 = vld [vmem:[#allocation2 + $0x4] ss:$2 sm:$0xf] }
 0x185   : > { %1660 = vmatmul.bf16.vlgmr.msra.gmra.mxu3 %v1403_v2  ;;  %1673 = vmatmul.bf16.vlgmr.msrb.gmra.mxu0 %v1404_v3  ;;  %v1407_v8 = vpack.c.bf16 %v1322_v7, %v1322_v7 }
 0x186   : > { %1686 = vmatmul.bf16.vlgmr.msrb.gmra.mxu1 %v1405_v5  ;;  %1699 = vmatmul.bf16.vlgmr.msrb.gmra.mxu2 %v1406_v6 }
 0x195   : > { %1712 = vmatmul.bf16.vlgmr.msrb.gmra.mxu3 %v1407_v8 }
 0x202   : > { %v1674_v0 = vpop.f32.mrf.mxu0 }
 0x203   : > { %v1687_v9 = vpop.f32.mrf.mxu1 }
 0x208   : > { %v1661_v11 = vpop.f32.mrf.mxu3 }
 0x209   : > { %v1700_v12 = vpop.f32.mrf.mxu2  ;;  %v1662_v14 = vadd.f32 %v2534_v10, %v1661_v11 }
 0x20a   : > { %v1676_v13 = vpop.f32.mrf.mxu0 }
 0x20b   : > { %v1689_v15 = vpop.f32.mrf.mxu1  ;;  %v1675_v16 = vadd.f32 %v1674_v0, %v1662_v14 }
 0x20d   : > { %v1688_v19 = vadd.f32 %v1687_v9, %v1675_v16 }
 0x20f   : > { %v1701_v20 = vadd.f32 %v1700_v12, %v1688_v19 }
 0x210   : > { %v1663_v17 = vpop.f32.mrf.mxu3 }
 0x211   : > { %v1702_v18 = vpop.f32.mrf.mxu2 }
 0x218   : > { %v1713_v21 = vpop.f32.mrf.mxu3 }
 0x219   : > { %v1714_v22 = vadd.f32 %v1713_v21, %v1701_v20 }
 0x21b   : > { %1717 = vst [vmem:[%s415_s11] sm:$0xf] %v1714_v22 }
 0x220   : > { %v1715_v23 = vpop.f32.mrf.mxu3 }
 0x221 PF: > { %s23_s13 = sadd.s32 1, %s2639_s13  }
 0x222   : > { %p20_p7 = scmp.ge.s32.totalorder %s23_s13, 4  }
 0x224   :  { %22 = sbr.rel (!%p20_p7) target bundleno = 2 (0x2), region = 115 }
 0x229   :  { %1751 = vsyncpa [#allocation4], 1 }
 0x22a   :  { %1753 = vsyncpa [#allocation4 + $0x1], 1 }
 0x22b   :  { %1754 = vsyncpa [#allocation6], 1 }

// kernel: run.8
= control target key start
LH: loop header
LB: loop body
LE: loop exit
PB: predicated region body
PF: predicated region fallthrough
CT: control target
= control target key end

     0   :  { %16 = vsyncpa [#allocation4], 0  ;;  %s3008_s0 = inlined_call_operand.vmem [shape: f32[2,16,128], index: 0, kind: input, shape index: {}]   ;;  %s3009_s1 = inlined_call_operand.hbm [shape: bf16[640,128], index: 1, kind: input, shape index: {}]   ;;  %s3010_s2 = inlined_call_operand.vmem [shape: f32[1,128], index: 2, kind: input, shape index: {}]   ;;  %s3011_s3 = inlined_call_operand.vmem [shape: bf16[128,128], index: 3, kind: input, shape index: {}]   ;;  %s3012_s4 = inlined_call_operand.vmem [shape: f32[1,128], index: 4, kind: input, shape index: {}]   ;;  %s3013_s5 = inlined_call_operand.hbm [shape: bf16[640,128], index: 5, kind: input, shape index: {}]   ;;  %s3014_s6 = inlined_call_operand.hbm [shape: f32[1,128], index: 6, kind: input, shape index: {}]   ;;  %s3015_s7 = inlined_call_operand.hbm [shape: bf16[640,128], index: 7, kind: input, shape index: {}]   ;;  %s3016_s8 = inlined_call_operand.hbm [shape: f32[1,128], index: 8, kind: input, shape index: {}]   ;;  %s3017_s9 = inlined_call_operand.vmem [shape: f32[2,16,128], index: 9, kind: output, shape index: {0}]   ;;  %s3018_s10 = inlined_call_operand.vmem [shape: f32[2,8,128], index: 10, kind: output, shape index: {1}]  }
   0x1   :  { %17 = vsyncpa [#allocation6], 0 }
   0x2   :  { %18 = vsyncpa [#allocation9], 0  ;;  %s2884_s13 = smov 0  }
   0x3 LB: > { %s2890_s14 = sadd.s32 4294967295, %s2819_s13   ;;  %p1923_p0 = scmp.ge.s32.totalorder %s2819_s13, 1  ;;  %s2819_s13 = sphi %s2884_s13, %s24_s13  }
   0x4   : > { %p275_p1 = scmp.lt.s32.totalorder %s2819_s13, 3  ;;  %p2621_p2 = scmp.eq.s32.totalorder %s2890_s14, 0 }
   0x5   : > { %s309_s17 = sshll.u32 %s3013_s5, 4  ;;  %s335_s21 = sshll.u32 %s3015_s7, 4  ;;  %s310_s17 = int_to_ptr.hbm [resolvable:$true] %s309_s17  ;;  %s336_s21 = int_to_ptr.hbm [resolvable:$true] %s335_s21 }
   0x6   : > { %p2898_p3 = pnand %p1923_p0, %p275_p1  ;;  %s2821_s22 = smov [#allocation5]  }
   0x7   : > { %s311_s23 = sshll.u32 %s2821_s22, 4  ;;  %s2822_s25 = smov [#allocation8]   ;;  %s312_s23 = int_to_ptr.vmem [resolvable:$true] %s311_s23 }
   0x8   : > { %p2605_p4 = pneg %p2898_p3  ;;  %s337_s26 = sshll.u32 %s2822_s25, 4  ;;  %s338_s26 = int_to_ptr.vmem [resolvable:$true] %s337_s26 }
   0x9   : > { %s286_s29 = sshll.u32 %s3009_s1, 4  ;;  %s2823_s30 = smov 64   ;;  %s287_s29 = int_to_ptr.hbm [resolvable:$true] %s286_s29 }
   0xa   : > { %p2909_p5 = pnand %p2621_p2, %p2605_p4  ;;  %s2824_s11 = smov 4  }
   0xb   : > { %s2825_s12 = smov [#allocation3]   ;;  %s324_s20 = sshll.u32 %s3014_s6, 4  ;;  %s325_s20 = int_to_ptr.hbm [resolvable:$true] %s324_s20 }
   0xc   : > { %2611 = dma.hbm_to_vmem [thread:$0]  (!%p2909_p5), %s310_s17, 5120, %s312_s23, [#allocation6], %s2823_s30, %s2823_s30, %s2824_s11  }
   0xd   : > { %2617 = dma.hbm_to_vmem [thread:$0]  (!%p2909_p5), %s336_s21, 5120, %s338_s26, [#allocation9], %s2823_s30, %s2823_s30, %s2824_s11  }
   0xe   : > { %s288_s15 = sshll.u32 %s2825_s12, 4  ;;  %s350_s27 = sshll.u32 %s3016_s8, 4  ;;  %s289_s15 = int_to_ptr.vmem [resolvable:$true] %s288_s15  ;;  %s351_s27 = int_to_ptr.hbm [resolvable:$true] %s350_s27 }
   0xf   : > { %2608 = dma.hbm_to_vmem [thread:$0]  (!%p2909_p5), %s287_s29, 5120, %s289_s15, [#allocation4], %s2823_s30, %s2823_s30, %s2824_s11  }
  0x10   : > { %s2826_s28 = smov [#allocation7]   ;;  %s2827_s21 = smov [#allocation10]  }
  0x11   : > { %s326_s17 = sshll.u32 %s2826_s28, 4  ;;  %s352_s23 = sshll.u32 %s2827_s21, 4  ;;  %s327_s17 = int_to_ptr.vmem [resolvable:$true] %s326_s17  ;;  %s353_s23 = int_to_ptr.vmem [resolvable:$true] %s352_s23 }
  0x12   : > { %2614 = dma.hbm_to_vmem [thread:$0]  (!%p2909_p5), %s325_s20, 16, %s327_s17, [#allocation6]  }
  0x13   : > { %2620 = dma.hbm_to_vmem [thread:$0]  (!%p2909_p5), %s351_s27, 16, %s353_s23, [#allocation9]  }
  0x14   : > { %373 = sbr.rel (%p2898_p3) target bundleno = 573 (0x23d), region = 56 }
  0x19   : > { %2806 = dma.done.wait (%p2621_p2), [#allocation4], 5120  }
  0x1a   : > { %2808 = vsyncadd (%p2621_p2), [#allocation4], 4294962176 }
  0x1b   : > { %2810 = dma.done.wait (%p2621_p2), [#allocation6], 5136  }
  0x1c   : > { %2812 = vsyncadd (%p2621_p2), [#allocation6], 4294962160 }
  0x1d   : > { %2814 = dma.done.wait (%p2621_p2), [#allocation9], 5136  }
  0x1e   : > { %2816 = vsyncadd (%p2621_p2), [#allocation9], 4294962160  ;;  %v2828_v0 = vmov 0.0   ;;  %p436_p6 = scmp.lt.s32.totalorder %s2890_s14, 1  ;;  %v2464_v1 = vld [vmem:[#allocation3 + $0x38] sm:$0xff]  ;;  %v2463_v5 = vld [vmem:[#allocation3 + $0x30] sm:$0xff] }
  0x1f   : > { %452 = vst [vmem:[#allocation2] sm:$0x3] %v2828_v0  ;;  %v2480_v2 = vld [vmem:[#allocation3 + $0xb8] sm:$0xff]  ;;  %795 = vmatpush.bf16.msra.mxu0 %v2464_v1  ;;  %v2479_v6 = vld [vmem:[#allocation3 + $0xb0] sm:$0xff]  ;;  %v2462_v9 = vld [vmem:[#allocation3 + $0x28] sm:$0xff] }
  0x20   : > { %453 = vst [vmem:[#allocation2 + $0x12] sm:$0x3] %v2828_v0  ;;  %v2488_v3 = vld [vmem:[#allocation3 + $0xf8] sm:$0xff]  ;;  %s3022_s14 = smov (!%p436_p6, %s2890_s14), 1  ;;  %823 = vmatpush.bf16.msra.mxu2 %v2480_v2  ;;  %v2487_v7 = vld [vmem:[#allocation3 + $0xf0] sm:$0xff]  ;;  %v2478_v10 = vld [vmem:[#allocation3 + $0xa8] sm:$0xff] }
  0x21   : > { %v2472_v4 = vld [vmem:[#allocation3 + $0x78] sm:$0xff]  ;;  %837 = vmatpush.bf16.msra.mxu3 %v2488_v3  ;;  %v2471_v8 = vld [vmem:[#allocation3 + $0x70] sm:$0xff]  ;;  %s2455_s18 = sshll.u32 %s3022_s14, 4  ;;  %v2486_v11 = vld [vmem:[#allocation3 + $0xe8] sm:$0xff] }
  0x22   : > { %809 = vmatpush.bf16.msra.mxu1 %v2472_v4  ;;  %v2470_v12 = vld [vmem:[#allocation3 + $0x68] sm:$0xff]  ;;  %s440_s29 = scalar_lea.vmem %s3008_s0, %s2455_s18  ;;  %v2461_v13 = vld [vmem:[#allocation3 + $0x20] sm:$0xff]  ;;  %v2460_v19 = vld [vmem:[#allocation3 + $0x18] sm:$0xff]  ;;  %s445_s19 = scalar_lea.vmem %s3017_s9, %s2455_s18 }
  0x23   : > { %796 = vmatpush.bf16.msra.mxu0 %v2463_v5  ;;  %v2477_v14 = vld [vmem:[#allocation3 + $0xa0] sm:$0xff]  ;;  %v450_v17 = vld [vmem:[%s440_s29] sm:$0xff]  ;;  %v451_v18 = vld [vmem:[%s440_s29 + $0x8] sm:$0xff]  ;;  %s1940_s18 = sshll.u32 %s3022_s14, 3 }
  0x24   : > { %824 = vmatpush.bf16.msra.mxu2 %v2479_v6  ;;  %v2485_v15 = vld [vmem:[#allocation3 + $0xe0] sm:$0xff]  ;;  %454 = vst [vmem:[#allocation2 + $0x2] sm:$0xff] %v450_v17  ;;  %v2476_v20 = vld [vmem:[#allocation3 + $0x98] sm:$0xff]  ;;  %v2459_v23 = vld [vmem:[#allocation3 + $0x10] sm:$0xff]  ;;  %v2960_v43 = vpack.c.bf16 %v451_v18, %v450_v17  ;;  %s449_s25 = scalar_lea.vmem %s3018_s10, %s1940_s18 }
  0x25   : > { %838 = vmatpush.bf16.msra.mxu3 %v2487_v7  ;;  %v2469_v16 = vld [vmem:[#allocation3 + $0x60] sm:$0xff]  ;;  %455 = vst [vmem:[#allocation2 + $0xa] sm:$0xff] %v451_v18  ;;  %v2484_v21 = vld [vmem:[#allocation3 + $0xd8] sm:$0xff]  ;;  %v2475_v24 = vld [vmem:[#allocation3 + $0x90] sm:$0xff] }
  0x26   : > { %810 = vmatpush.bf16.msra.mxu1 %v2471_v8  ;;  %v2468_v22 = vld [vmem:[#allocation3 + $0x58] sm:$0xff]  ;;  %v2483_v25 = vld [vmem:[#allocation3 + $0xd0] sm:$0xff]  ;;  %v2458_v29 = vld [vmem:[#allocation3 + $0x8] sm:$0xff] }
  0x27   : > { %797 = vmatpush.bf16.msra.mxu0 %v2462_v9  ;;  %v2467_v26 = vld [vmem:[#allocation3 + $0x50] sm:$0xff]  ;;  %v2474_v30 = vld [vmem:[#allocation3 + $0x88] sm:$0xff]  ;;  %v2457_v33 = vld [vmem:[#allocation3] sm:$0xff] }
  0x28   : > { %825 = vmatpush.bf16.msra.mxu2 %v2478_v10  ;;  %v2482_v31 = vld [vmem:[#allocation3 + $0xc8] sm:$0xff]  ;;  %v2496_v34 = vld [vmem:[#allocation3 + $0x138] sm:$0xff]  ;;  %v2473_v35 = vld [vmem:[#allocation3 + $0x80] sm:$0xff] }
  0x29   : > { %839 = vmatpush.bf16.msra.mxu3 %v2486_v11  ;;  %v2466_v32 = vld [vmem:[#allocation3 + $0x48] sm:$0xff]  ;;  %v2481_v36 = vld [vmem:[#allocation3 + $0xc0] sm:$0xff]  ;;  %v2495_v47 = vld [vmem:[#allocation3 + $0x130] sm:$0xff] }
  0x2a   : > { %811 = vmatpush.bf16.msra.mxu1 %v2470_v12  ;;  %v2465_v41 = vld [vmem:[#allocation3 + $0x40] sm:$0xff]  ;;  %v2503_v49 = vld [vmem:[%s3011_s3 + $0x30] sm:$0xff]  ;;  %v2494_v50 = vld [vmem:[#allocation3 + $0x128] sm:$0xff] }
  0x2b   : > { %798 = vmatpush.bf16.msra.mxu0 %v2461_v13  ;;  %v456_v27 = vld [vmem:[#allocation2] sm:$0xff]  ;;  %v2504_v46 = vld [vmem:[%s3011_s3 + $0x38] sm:$0xff]  ;;  %v2502_v51 = vld [vmem:[%s3011_s3 + $0x28] sm:$0xff] }
  0x2c   : > { %826 = vmatpush.bf16.msra.mxu2 %v2477_v14  ;;  %v458_v28 = vld [vmem:[#allocation2 + $0x1] sm:$0xff]  ;;  %v463_v39 = vld [vmem:[#allocation2 + $0xb] sm:$0xff]  ;;  %v2493_v52 = vld [vmem:[#allocation3 + $0x120] sm:$0xff] }
  0x2d   : > { %840 = vmatpush.bf16.msra.mxu3 %v2485_v15  ;;  %954 = vst [vmem:[#allocation2] sm:$0x3] %v2828_v0  ;;  %v457_v37 = vld [vmem:[#allocation2 + $0x8] sm:$0xff]  ;;  %v2492_v53 = vld [vmem:[#allocation3 + $0x118] sm:$0xff]  ;;  %v2490_v55 = vld [vmem:[#allocation3 + $0x108] sm:$0xff] }
  0x2e   : > { %812 = vmatpush.bf16.msra.mxu1 %v2469_v16  ;;  %v462_v38 = vld [vmem:[#allocation2 + $0x3] sm:$0xff]  ;;  %v465_v40 = vld [vmem:[#allocation2 + $0xc] sm:$0xff]  ;;  %v546_v44 = vpack.c.bf16 %v457_v37, %v456_v27  ;;  %v2489_v56 = vld [vmem:[#allocation3 + $0x100] sm:$0xff] }
  0x2f   : > { %799 = vmatpush.bf16.msra.mxu0 %v2460_v19  ;;  %v459_v42 = vld [vmem:[#allocation2 + $0x9] sm:$0xff]  ;;  %955 = vst [vmem:[#allocation2 + $0x12] sm:$0x3] %v2828_v0  ;;  %v549_v45 = vpack.c.bf16 %v463_v39, %v462_v38  ;;  %v2501_v59 = vld [vmem:[%s3011_s3 + $0x20] sm:$0xff]  ;;  %v2500_v60 = vld [vmem:[%s3011_s3 + $0x18] sm:$0xff] }
  0x30   : > { %827 = vmatpush.bf16.msra.mxu2 %v2476_v20  ;;  %v547_v48 = vpack.c.bf16 %v459_v42, %v458_v28  ;;  %v2491_v54 = vld [vmem:[#allocation3 + $0x110] sm:$0xff]  ;;  %v2512_v61 = vld [vmem:[#allocation5 + $0x38] sm:$0xff]  ;;  %v2510_v3 = vld [vmem:[#allocation5 + $0x28] sm:$0xff] }
  0x31   : > { %841 = vmatpush.bf16.msra.mxu3 %v2484_v21  ;;  %v464_v57 = vld [vmem:[#allocation2 + $0x4] sm:$0xff]  ;;  %v2499_v62 = vld [vmem:[%s3011_s3 + $0x10] sm:$0xff]  ;;  %v2509_v6 = vld [vmem:[#allocation5 + $0x20] sm:$0xff] }
  0x32   : > { %813 = vmatpush.bf16.msra.mxu1 %v2468_v22  ;;  %v550_v58 = vpack.c.bf16 %v465_v40, %v464_v57  ;;  %v2511_v63 = vld [vmem:[#allocation5 + $0x30] sm:$0xff]  ;;  %v2528_v1 = vld [vmem:[#allocation5 + $0xb8] sm:$0xff]  ;;  %v2497_v5 = vld [vmem:[%s3011_s3] sm:$0xff] }
  0x33   : > { %800 = vmatpush.bf16.msra.mxu0 %v2459_v23  ;;  %v2498_v2 = vld [vmem:[%s3011_s3 + $0x8] sm:$0xff]  ;;  %v2520_v7 = vld [vmem:[#allocation5 + $0x78] sm:$0xff]  ;;  %v2526_v10 = vld [vmem:[#allocation5 + $0xa8] sm:$0xff] }
  0x34   : > { %828 = vmatpush.bf16.msra.mxu2 %v2475_v24  ;;  %v2527_v4 = vld [vmem:[#allocation5 + $0xb0] sm:$0xff]  ;;  %v2536_v8 = vld [vmem:[#allocation5 + $0xf8] sm:$0xff]  ;;  %v2525_v13 = vld [vmem:[#allocation5 + $0xa0] sm:$0xff] }
  0x35   : > { %842 = vmatpush.bf16.msra.mxu3 %v2483_v25  ;;  %v2519_v9 = vld [vmem:[#allocation5 + $0x70] sm:$0xff]  ;;  %v2508_v11 = vld [vmem:[#allocation5 + $0x18] sm:$0xff]  ;;  %v2518_v15 = vld [vmem:[#allocation5 + $0x68] sm:$0xff] }
  0x36   : > { %814 = vmatpush.bf16.msra.mxu1 %v2467_v26  ;;  %v2535_v12 = vld [vmem:[#allocation5 + $0xf0] sm:$0xff]  ;;  %v2534_v16 = vld [vmem:[#allocation5 + $0xe8] sm:$0xff]  ;;  %v2524_v17 = vld [vmem:[#allocation5 + $0x98] sm:$0xff] }
  0x37   : > { %801 = vmatpush.bf16.msra.mxu0 %v2458_v29  ;;  %v2507_v14 = vld [vmem:[#allocation5 + $0x10] sm:$0xff]  ;;  %v2506_v18 = vld [vmem:[#allocation5 + $0x8] sm:$0xff]  ;;  %v2517_v19 = vld [vmem:[#allocation5 + $0x60] sm:$0xff] }
  0x38   : > { %829 = vmatpush.bf16.msra.mxu2 %v2474_v30  ;;  %v2533_v20 = vld [vmem:[#allocation5 + $0xe0] sm:$0xff]  ;;  %v2523_v21 = vld [vmem:[#allocation5 + $0x90] sm:$0xff]  ;;  %v2516_v23 = vld [vmem:[#allocation5 + $0x58] sm:$0xff] }
  0x39   : > { %843 = vmatpush.bf16.msra.mxu3 %v2482_v31  ;;  %v2505_v22 = vld [vmem:[#allocation5] sm:$0xff]  ;;  %v2532_v24 = vld [vmem:[#allocation5 + $0xd8] sm:$0xff]  ;;  %v2522_v26 = vld [vmem:[#allocation5 + $0x88] sm:$0xff] }
  0x3a   : > { %815 = vmatpush.bf16.msra.mxu1 %v2466_v32  ;;  %v2544_v25 = vld [vmem:[#allocation5 + $0x138] sm:$0xff]  ;;  %v2515_v27 = vld [vmem:[#allocation5 + $0x50] sm:$0xff]  ;;  %v2521_v30 = vld [vmem:[#allocation5 + $0x80] sm:$0xff] }
  0x3b   : > { %802 = vmatpush.bf16.msra.mxu0 %v2457_v33  ;;  %v2531_v28 = vld [vmem:[#allocation5 + $0xd0] sm:$0xff]  ;;  %v2514_v32 = vld [vmem:[#allocation5 + $0x48] sm:$0xff]  ;;  %v2529_v37 = vld [vmem:[#allocation5 + $0xc0] sm:$0xff] }
  0x3c   : > { %830 = vmatpush.bf16.msra.mxu2 %v2473_v35  ;;  %v2543_v29 = vld [vmem:[#allocation5 + $0x130] sm:$0xff]  ;;  %v2530_v33 = vld [vmem:[#allocation5 + $0xc8] sm:$0xff]  ;;  %v2541_v39 = vld [vmem:[#allocation5 + $0x120] sm:$0xff] }
  0x3d   : > { %844 = vmatpush.bf16.msra.mxu3 %v2481_v36  ;;  %v2647_v35 = vld [vmem:[%s3010_s2] ss:$0 sm:$0xff]  ;;  %v2513_v36 = vld [vmem:[#allocation5 + $0x40] sm:$0xff] }
  0x3e   : > { %816 = vmatpush.bf16.msra.mxu1 %v2465_v41  ;;  %803 = vmatmul.bf16.vlgmr.msra.gmra.mxu0 %v546_v44  ;;  %v2540_v44 = vld [vmem:[#allocation5 + $0x118] sm:$0xff] }
  0x3f   : > { %851 = vmatpush.bf16.msrb.mxu0 %v2496_v34  ;;  %831 = vmatmul.bf16.vlgmr.msra.gmra.mxu2 %v2960_v43  ;;  %v2542_v34 = vld [vmem:[#allocation5 + $0x128] sm:$0xff] }
  0x40   : > { %845 = vmatmul.bf16.vlgmr.msra.gmra.mxu3 %v549_v45  ;;  %1297 = vmatpush.bf16.msrb.mxu2 %v2512_v61 }
  0x41   : > { %817 = vmatmul.bf16.vlgmr.msra.gmra.mxu1 %v547_v48  ;;  %1311 = vmatpush.bf16.msrb.mxu3 %v2520_v7 }
  0x42   : > { %940 = vmatpush.bf16.msrb.mxu1 %v2504_v46  ;;  %v2539_v46 = vld [vmem:[#allocation5 + $0x110] sm:$0xff] }
  0x43   : > { %852 = vmatpush.bf16.msrb.mxu0 %v2495_v47 }
  0x44   : > { %1298 = vmatpush.bf16.msrb.mxu2 %v2511_v63 }
  0x45   : > { %1312 = vmatpush.bf16.msrb.mxu3 %v2519_v9 }
  0x46   : > { %941 = vmatpush.bf16.msrb.mxu1 %v2503_v49 }
  0x47   : > { %853 = vmatpush.bf16.msrb.mxu0 %v2494_v50  ;;  %v2538_v50 = vld [vmem:[#allocation5 + $0x108] sm:$0xff] }
  0x48   : > { %1299 = vmatpush.bf16.msrb.mxu2 %v2510_v3 }
  0x49   : > { %1313 = vmatpush.bf16.msrb.mxu3 %v2518_v15 }
  0x4a   : > { %942 = vmatpush.bf16.msrb.mxu1 %v2502_v51 }
  0x4b   : > { %854 = vmatpush.bf16.msrb.mxu0 %v2493_v52 }
  0x4c   : > { %1300 = vmatpush.bf16.msrb.mxu2 %v2509_v6 }
  0x4d   : > { %1314 = vmatpush.bf16.msrb.mxu3 %v2517_v19  ;;  %v2549_v19 = vld [vmem:[#allocation8 + $0x20] sm:$0xff] }
  0x4e   : > { %943 = vmatpush.bf16.msrb.mxu1 %v2501_v59 }
  0x4f   : > { %855 = vmatpush.bf16.msrb.mxu0 %v2492_v53 }
  0x50   : > { %1301 = vmatpush.bf16.msrb.mxu2 %v2508_v11 }
  0x51   : > { %1315 = vmatpush.bf16.msrb.mxu3 %v2516_v23  ;;  %v2559_v23 = vld [vmem:[#allocation8 + $0x70] sm:$0xff] }
  0x52   : > { %944 = vmatpush.bf16.msrb.mxu1 %v2500_v60 }
  0x53   : > { %856 = vmatpush.bf16.msrb.mxu0 %v2491_v54 }
  0x54   : > { %1302 = vmatpush.bf16.msrb.mxu2 %v2507_v14 }
  0x55   : > { %1316 = vmatpush.bf16.msrb.mxu3 %v2515_v27  ;;  %v2558_v27 = vld [vmem:[#allocation8 + $0x68] sm:$0xff] }
  0x56   : > { %945 = vmatpush.bf16.msrb.mxu1 %v2499_v62 }
  0x57   : > { %857 = vmatpush.bf16.msrb.mxu0 %v2490_v55 }
  0x58   : > { %1303 = vmatpush.bf16.msrb.mxu2 %v2506_v18  ;;  %v2550_v18 = vld [vmem:[#allocation8 + $0x28] sm:$0xff] }
  0x59   : > { %1317 = vmatpush.bf16.msrb.mxu3 %v2514_v32  ;;  %v2565_v32 = vld [vmem:[#allocation8 + $0xa0] sm:$0xff] }
  0x5a   : > { %946 = vmatpush.bf16.msrb.mxu1 %v2498_v2 }
  0x5b   : > { %858 = vmatpush.bf16.msrb.mxu0 %v2489_v56  ;;  %v2537_v56 = vld [vmem:[#allocation5 + $0x100] sm:$0xff] }
  0x5c   : > { %1304 = vmatpush.bf16.msrb.mxu2 %v2505_v22  ;;  %v2576_v22 = vld [vmem:[#allocation8 + $0xf8] sm:$0xff] }
  0x5d   : > { %1318 = vmatpush.bf16.msrb.mxu3 %v2513_v36  ;;  %v2556_v36 = vld [vmem:[#allocation8 + $0x58] sm:$0xff] }
  0x5e   : > { %859 = vmatmul.bf16.vlgmr.msrb.gmra.mxu0 %v550_v58  ;;  %947 = vmatpush.bf16.msrb.mxu1 %v2497_v5 }
  0x5f   : > { %1325 = vmatpush.bf16.msra.mxu0 %v2528_v1 }
  0x60   : > { %1353 = vmatpush.bf16.msra.mxu2 %v2544_v25  ;;  %v2575_v25 = vld [vmem:[#allocation8 + $0xf0] sm:$0xff] }
  0x61   : > { %948 = vmatmul.bf16.vlgmr.msrb.gmra.mxu1 %v2960_v43 }
  0x62   : > { %1339 = vmatpush.bf16.msra.mxu1 %v2536_v8 }
  0x63   : > { %1326 = vmatpush.bf16.msra.mxu0 %v2527_v4 }
  0x64   : > { %1354 = vmatpush.bf16.msra.mxu2 %v2543_v29  ;;  %v2574_v29 = vld [vmem:[#allocation8 + $0xe8] sm:$0xff] }
  0x66   : > { %1340 = vmatpush.bf16.msra.mxu1 %v2535_v12 }
  0x67   : > { %1327 = vmatpush.bf16.msra.mxu0 %v2526_v10 }
  0x68   : > { %1355 = vmatpush.bf16.msra.mxu2 %v2542_v34 }
  0x6a   : > { %1341 = vmatpush.bf16.msra.mxu1 %v2534_v16  ;;  %v2552_v16 = vld [vmem:[#allocation8 + $0x38] sm:$0xff] }
  0x6b   : > { %1328 = vmatpush.bf16.msra.mxu0 %v2525_v13  ;;  %1719 = vmatpush.bf16.msra.mxu3 %v2552_v16 }
  0x6c   : > { %1356 = vmatpush.bf16.msra.mxu2 %v2541_v39  ;;  %v2584_v39 = vld [vmem:[#allocation8 + $0x138] sm:$0xff] }
  0x6e   : > { %1342 = vmatpush.bf16.msra.mxu1 %v2533_v20  ;;  %v2560_v20 = vld [vmem:[#allocation8 + $0x78] sm:$0xff] }
  0x6f   : > { %1329 = vmatpush.bf16.msra.mxu0 %v2524_v17  ;;  %v2551_v17 = vld [vmem:[#allocation8 + $0x30] sm:$0xff] }
  0x70   : > { %1357 = vmatpush.bf16.msra.mxu2 %v2540_v44  ;;  %1720 = vmatpush.bf16.msra.mxu3 %v2551_v17  ;;  %v2583_v44 = vld [vmem:[#allocation8 + $0x130] sm:$0xff] }
  0x72   : > { %1343 = vmatpush.bf16.msra.mxu1 %v2532_v24  ;;  %v2567_v24 = vld [vmem:[#allocation8 + $0xb0] sm:$0xff] }
  0x73   : > { %1330 = vmatpush.bf16.msra.mxu0 %v2523_v21  ;;  %v2568_v21 = vld [vmem:[#allocation8 + $0xb8] sm:$0xff] }
  0x74   : > { %1358 = vmatpush.bf16.msra.mxu2 %v2539_v46  ;;  %1721 = vmatpush.bf16.msra.mxu3 %v2550_v18  ;;  %v2554_v46 = vld [vmem:[#allocation8 + $0x48] sm:$0xff] }
  0x76   : > { %1344 = vmatpush.bf16.msra.mxu1 %v2531_v28  ;;  %v2566_v28 = vld [vmem:[#allocation8 + $0xa8] sm:$0xff] }
  0x77   : > { %1331 = vmatpush.bf16.msra.mxu0 %v2522_v26  ;;  %v2547_v26 = vld [vmem:[#allocation8 + $0x10] sm:$0xff] }
  0x78   : > { %1359 = vmatpush.bf16.msra.mxu2 %v2538_v50  ;;  %1722 = vmatpush.bf16.msra.mxu3 %v2549_v19  ;;  %v2582_v50 = vld [vmem:[#allocation8 + $0x128] sm:$0xff] }
  0x7a   : > { %1345 = vmatpush.bf16.msra.mxu1 %v2530_v33  ;;  %v2573_v33 = vld [vmem:[#allocation8 + $0xe0] sm:$0xff] }
  0x7b   : > { %1332 = vmatpush.bf16.msra.mxu0 %v2521_v30  ;;  %v2546_v30 = vld [vmem:[#allocation8 + $0x8] sm:$0xff] }
  0x7c   : > { %1360 = vmatpush.bf16.msra.mxu2 %v2537_v56  ;;  %v2581_v56 = vld [vmem:[#allocation8 + $0x120] sm:$0xff] }
  0x7e   : > { %1346 = vmatpush.bf16.msra.mxu1 %v2529_v37  ;;  %v2564_v37 = vld [vmem:[#allocation8 + $0x98] sm:$0xff] }
  0x7f   : > { %1732 = vmatpush.bf16.msrb.mxu0 %v2560_v20 }
  0x82   : > { %1745 = vmatpush.bf16.msrb.mxu1 %v2568_v21 }
  0x83   : > { %1733 = vmatpush.bf16.msrb.mxu0 %v2559_v23 }
  0x86   : > { %1746 = vmatpush.bf16.msrb.mxu1 %v2567_v24 }
  0x87   : > { %1734 = vmatpush.bf16.msrb.mxu0 %v2558_v27 }
  0x8a   : > { %1747 = vmatpush.bf16.msrb.mxu1 %v2566_v28 }
  0x8e   : > { %1748 = vmatpush.bf16.msrb.mxu1 %v2565_v32 }
  0x92   : > { %1749 = vmatpush.bf16.msrb.mxu1 %v2564_v37 }
  0xbb   : > { %v804_v31 = vpop.f32.mrf.mxu0 }
  0xbc   : > { %v805_v40 = vadd.f32 %v2647_v35, %v804_v31  ;;  %v2557_v31 = vld [vmem:[#allocation8 + $0x60] sm:$0xff] }
  0xbd   : > { %1735 = vmatpush.bf16.msrb.mxu0 %v2557_v31 }
  0xbe   : > { %v818_v38 = vpop.f32.mrf.mxu1 }
  0xbf   : > { %v819_v42 = vadd.f32 %v818_v38, %v805_v40  ;;  %v2572_v38 = vld [vmem:[#allocation8 + $0xd8] sm:$0xff]  ;;  %v2555_v40 = vld [vmem:[#allocation8 + $0x50] sm:$0xff] }
  0xc1   : > { %1736 = vmatpush.bf16.msrb.mxu0 %v2556_v36 }
  0xc2   : > { %v832_v41 = vpop.f32.mrf.mxu2 }
  0xc3   : > { %v806_v43 = vpop.f32.mrf.mxu0  ;;  %v846_v45 = vpop.f32.mrf.mxu3  ;;  %v833_v47 = vadd.f32 %v832_v41, %v819_v42  ;;  %v2563_v41 = vld [vmem:[#allocation8 + $0x90] sm:$0xff] }
  0xc4   : > { %v807_v48 = vadd.f32 %v2647_v35, %v806_v43  ;;  %v2545_v35 = vld [vmem:[#allocation8] sm:$0xff]  ;;  %v2571_v42 = vld [vmem:[#allocation8 + $0xd0] sm:$0xff]  ;;  %v2649_v43 = vld [vmem:[#allocation7] ss:$0 sm:$0xff]  ;;  %1750 = vmatpush.bf16.msrb.mxu1 %v2563_v41 }
  0xc5   : > { %v847_v51 = vadd.f32 %v846_v45, %v833_v47  ;;  %1737 = vmatpush.bf16.msrb.mxu0 %v2555_v40  ;;  %v2562_v47 = vld [vmem:[#allocation8 + $0x88] sm:$0xff] }
  0xc6   : > { %v820_v49 = vpop.f32.mrf.mxu1 }
  0xc7   : > { %v821_v52 = vadd.f32 %v820_v49, %v807_v48  ;;  %v2570_v48 = vld [vmem:[#allocation8 + $0xc8] sm:$0xff] }
  0xc8   : > { %1751 = vmatpush.bf16.msrb.mxu1 %v2562_v47 }
  0xc9   : > { %1738 = vmatpush.bf16.msrb.mxu0 %v2554_v46 }
  0xca   : > { %v834_v53 = vpop.f32.mrf.mxu2 }
  0xcb   : > { %v835_v57 = vadd.f32 %v834_v53, %v821_v52  ;;  %v848_v59 = vpop.f32.mrf.mxu3  ;;  %v2553_v53 = vld [vmem:[#allocation8 + $0x40] sm:$0xff] }
  0xcd   : > { %v849_v61 = vadd.f32 %v848_v59, %v835_v57  ;;  %1739 = vmatpush.bf16.msrb.mxu0 %v2553_v53 }
  0xdb   : > { %v860_v54 = vpop.f32.mrf.mxu0 }
  0xdc   : > { %v861_v55 = vadd.f32 %v860_v54, %v847_v51  ;;  %v2561_v54 = vld [vmem:[#allocation8 + $0x80] sm:$0xff] }
  0xdd   : > { %1752 = vmatpush.bf16.msrb.mxu1 %v2561_v54 }
  0xde   : > { %vm865_vm0 = vcmp.ge.f32.partialorder %v861_v55, 0.0  ;;  %v867_v58 = vmul.f32 0.2, %v861_v55  ;;  %v949_v34 = vpop.f32.mrf.mxu1 }
  0xe0   : > { %v869_v60 = vsel %vm865_vm0, %v861_v55, %v867_v58  ;;  %v2569_v55 = vld [vmem:[#allocation8 + $0xc0] sm:$0xff] }
  0xe1   : > { %956 = vst [vmem:[#allocation2 + $0x2] sm:$0xff] %v869_v60 }
  0xe3   : > { %v862_v62 = vpop.f32.mrf.mxu0 }
  0xe4   : > { %v863_v63 = vadd.f32 %v862_v62, %v849_v61  ;;  %v2580_v62 = vld [vmem:[#allocation8 + $0x118] sm:$0xff] }
  0xe6   : > { %vm866_vm1 = vcmp.ge.f32.partialorder %v863_v63, 0.0  ;;  %v868_v1 = vmul.f32 0.2, %v863_v63  ;;  %v951_v49 = vpop.f32.mrf.mxu1 }
  0xe8   : > { %v870_v2 = vsel %vm866_vm1, %v863_v63, %v868_v1  ;;  %v958_v3 = vld [vmem:[#allocation2] sm:$0xff] }
  0xe9   : > { %957 = vst [vmem:[#allocation2 + $0xa] sm:$0xff] %v870_v2  ;;  %v960_v4 = vld [vmem:[#allocation2 + $0x1] sm:$0xff]  ;;  %v1050_v5 = vpack.c.bf16 %v870_v2, %v869_v60  ;;  %v2648_v1 = vld [vmem:[%s3012_s4] ss:$0 sm:$0xff]  ;;  %v2579_v2 = vld [vmem:[#allocation8 + $0x110] sm:$0xff] }
  0xea   : > { %1377 = vst [vmem:[#allocation2] sm:$0x3] %v2828_v0  ;;  %v952_v19 = vadd.f32 %v2648_v1, %v951_v49 }
  0xeb   : > { %1333 = vmatmul.bf16.vlgmr.msra.gmra.mxu0 %v1050_v5 }
  0xf0   : > { %v959_v6 = vld [vmem:[#allocation2 + $0x8] sm:$0xff] }
  0xf1   : > { %v961_v7 = vld [vmem:[#allocation2 + $0x9] sm:$0xff]  ;;  %v1048_v9 = vpack.c.bf16 %v959_v6, %v958_v3 }
  0xf2   : > { %v964_v8 = vld [vmem:[#allocation2 + $0x3] sm:$0xff]  ;;  %v1049_v10 = vpack.c.bf16 %v961_v7, %v960_v4  ;;  %v965_v11 = vld [vmem:[#allocation2 + $0xb] sm:$0xff]  ;;  %v950_v7 = vadd.f32 %v2648_v1, %v949_v34 }
  0xf3   : > { %v967_v12 = vld [vmem:[#allocation2 + $0xc] sm:$0xff]  ;;  %v1051_v13 = vpack.c.bf16 %v965_v11, %v964_v8  ;;  %1305 = vmatmul.bf16.vlgmr.msrb.gmra.mxu2 %v1048_v9  ;;  %v966_v14 = vld [vmem:[#allocation2 + $0x4] sm:$0xff] }
  0xf4   : > { %1378 = vst [vmem:[#allocation2 + $0x12] sm:$0x3] %v2828_v0  ;;  %1319 = vmatmul.bf16.vlgmr.msrb.gmra.mxu3 %v1049_v10  ;;  %v1052_v15 = vpack.c.bf16 %v967_v12, %v966_v14  ;;  %1758 = vmatpush.bf16.msrb.mxu2 %v2576_v22  ;;  %v2548_v0 = vld [vmem:[#allocation8 + $0x18] sm:$0xff]  ;;  %v2578_v9 = vld [vmem:[#allocation8 + $0x108] sm:$0xff]  ;;  %v2577_v14 = vld [vmem:[#allocation8 + $0x100] sm:$0xff] }
  0xf5   : > { %1347 = vmatmul.bf16.vlgmr.msra.gmra.mxu1 %v1051_v13  ;;  %1723 = vmatpush.bf16.msra.mxu3 %v2548_v0 }
  0xf8   : > { %1759 = vmatpush.bf16.msrb.mxu2 %v2575_v25 }
  0xf9   : > { %1724 = vmatpush.bf16.msra.mxu3 %v2547_v26 }
  0xfc   : > { %1760 = vmatpush.bf16.msrb.mxu2 %v2574_v29 }
  0xfd   : > { %1725 = vmatpush.bf16.msra.mxu3 %v2546_v30 }
 0x100   : > { %1761 = vmatpush.bf16.msrb.mxu2 %v2573_v33 }
 0x101   : > { %1726 = vmatpush.bf16.msra.mxu3 %v2545_v35  ;;  %v2650_v35 = vld [vmem:[#allocation10] ss:$0 sm:$0xff] }
 0x103   : > { %1361 = vmatmul.bf16.vlgmr.msra.gmra.mxu2 %v1052_v15 }
 0x104   : > { %1762 = vmatpush.bf16.msrb.mxu2 %v2572_v38 }
 0x105   : > { %1771 = vmatpush.bf16.msrb.mxu3 %v2584_v39 }
 0x108   : > { %1763 = vmatpush.bf16.msrb.mxu2 %v2571_v42 }
 0x109   : > { %1772 = vmatpush.bf16.msrb.mxu3 %v2583_v44 }
 0x10c   : > { %1764 = vmatpush.bf16.msrb.mxu2 %v2570_v48 }
 0x10d   : > { %1773 = vmatpush.bf16.msrb.mxu3 %v2582_v50 }
 0x110   : > { %1765 = vmatpush.bf16.msrb.mxu2 %v2569_v55 }
 0x111   : > { %1774 = vmatpush.bf16.msrb.mxu3 %v2581_v56 }
 0x115   : > { %1775 = vmatpush.bf16.msrb.mxu3 %v2580_v62 }
 0x119   : > { %1776 = vmatpush.bf16.msrb.mxu3 %v2579_v2 }
 0x11d   : > { %1777 = vmatpush.bf16.msrb.mxu3 %v2578_v9 }
 0x121   : > { %1778 = vmatpush.bf16.msrb.mxu3 %v2577_v14 }
 0x168   : > { %v1334_v58 = vpop.f32.mrf.mxu0 }
 0x170   : > { %v1336_v10 = vpop.f32.mrf.mxu0 }
 0x172   : > { %v1348_v63 = vpop.f32.mrf.mxu1 }
 0x176   : > { %v1306_v45 = vpop.f32.mrf.mxu2 }
 0x177   : > { %v1307_v51 = vadd.f32 %v2649_v43, %v1306_v45  ;;  %v1320_v52 = vpop.f32.mrf.mxu3 }
 0x179   : > { %v1321_v57 = vadd.f32 %v1320_v52, %v1307_v51 }
 0x17a   : > { %v1350_v15 = vpop.f32.mrf.mxu1 }
 0x17b   : > { %v1335_v60 = vadd.f32 %v1334_v58, %v1321_v57 }
 0x17d   : > { %v1349_v5 = vadd.f32 %v1348_v63, %v1335_v60 }
 0x17e   : > { %v1308_v59 = vpop.f32.mrf.mxu2 }
 0x17f   : > { %v1309_v61 = vadd.f32 %v2649_v43, %v1308_v59  ;;  %v1322_v3 = vpop.f32.mrf.mxu3 }
 0x181   : > { %v1323_v4 = vadd.f32 %v1322_v3, %v1309_v61 }
 0x183   : > { %v1337_v11 = vadd.f32 %v1336_v10, %v1323_v4 }
 0x185   : > { %v1351_v17 = vadd.f32 %v1350_v15, %v1337_v11 }
 0x186   : > { %v1362_v6 = vpop.f32.mrf.mxu2 }
 0x187   : > { %v1363_v8 = vadd.f32 %v1362_v6, %v1349_v5 }
 0x189   : > { %v1367_v12 = vadd.f32 %v1363_v8, %v950_v7 }
 0x18b   : > { %vm1369_vm2 = vcmp.ge.f32.partialorder %v1367_v12, 0.0  ;;  %v1371_v13 = vmul.f32 0.2, %v1367_v12 }
 0x18d   : > { %v1373_v16 = vsel %vm1369_vm2, %v1367_v12, %v1371_v13 }
 0x18e   : > { %1375 = vst [vmem:[%s445_s19] sm:$0xff] %v1373_v16  ;;  %v1364_v18 = vpop.f32.mrf.mxu2 }
 0x18f   : > { %1379 = vst [vmem:[#allocation2 + $0x2] sm:$0xff] %v1373_v16  ;;  %v1365_v20 = vadd.f32 %v1364_v18, %v1351_v17 }
 0x191   : > { %v1368_v21 = vadd.f32 %v1365_v20, %v952_v19 }
 0x193   : > { %vm1370_vm3 = vcmp.ge.f32.partialorder %v1368_v21, 0.0  ;;  %v1372_v22 = vmul.f32 0.2, %v1368_v21 }
 0x195   : > { %v1374_v0 = vsel %vm1370_vm3, %v1368_v21, %v1372_v22 }
 0x196   : > { %1376 = vst [vmem:[%s445_s19 + $0x8] sm:$0xff] %v1374_v0 }
 0x197   : > { %1380 = vst [vmem:[#allocation2 + $0xa] sm:$0xff] %v1374_v0 }
 0x19e   : > { %v1381_v23 = vld [vmem:[#allocation2] ss:$2 sm:$0xff]  ;;  %v1383_v24 = vld [vmem:[#allocation2 + $0x1] ss:$2 sm:$0xff] }
 0x19f   : > { %v1385_v25 = vld [vmem:[#allocation2 + $0x2] ss:$2 sm:$0xff]  ;;  %v1470_v26 = vpack.c.bf16 %v1381_v23, %v1381_v23  ;;  %v1471_v27 = vpack.c.bf16 %v1383_v24, %v1383_v24  ;;  %v1387_v29 = vld [vmem:[#allocation2 + $0x3] ss:$2 sm:$0xff] }
 0x1a0   : > { %v1472_v28 = vpack.c.bf16 %v1385_v25, %v1385_v25  ;;  %v1473_v30 = vpack.c.bf16 %v1387_v29, %v1387_v29  ;;  %v1389_v31 = vld [vmem:[#allocation2 + $0x4] ss:$2 sm:$0xff] }
 0x1a1   : > { %1727 = vmatmul.bf16.vlgmr.msra.gmra.mxu3 %v1470_v26  ;;  %1740 = vmatmul.bf16.vlgmr.msrb.gmra.mxu0 %v1471_v27  ;;  %v1474_v32 = vpack.c.bf16 %v1389_v31, %v1389_v31 }
 0x1a2   : > { %1753 = vmatmul.bf16.vlgmr.msrb.gmra.mxu1 %v1472_v28  ;;  %1766 = vmatmul.bf16.vlgmr.msrb.gmra.mxu2 %v1473_v30 }
 0x1b1   : > { %1779 = vmatmul.bf16.vlgmr.msrb.gmra.mxu3 %v1474_v32 }
 0x21e   : > { %v1741_v33 = vpop.f32.mrf.mxu0 }
 0x21f   : > { %v1754_v34 = vpop.f32.mrf.mxu1 }
 0x224   : > { %v1728_v36 = vpop.f32.mrf.mxu3 }
 0x225   : > { %v1767_v37 = vpop.f32.mrf.mxu2  ;;  %v1729_v39 = vadd.f32 %v2650_v35, %v1728_v36 }
 0x226   : > { %v1743_v38 = vpop.f32.mrf.mxu0 }
 0x227   : > { %v1756_v40 = vpop.f32.mrf.mxu1  ;;  %v1742_v41 = vadd.f32 %v1741_v33, %v1729_v39 }
 0x229   : > { %v1755_v44 = vadd.f32 %v1754_v34, %v1742_v41 }
 0x22b   : > { %v1768_v45 = vadd.f32 %v1767_v37, %v1755_v44 }
 0x22c   : > { %v1730_v42 = vpop.f32.mrf.mxu3 }
 0x22d   : > { %v1769_v43 = vpop.f32.mrf.mxu2 }
 0x234   : > { %v1780_v46 = vpop.f32.mrf.mxu3 }
 0x235   : > { %v1781_v47 = vadd.f32 %v1780_v46, %v1768_v45 }
 0x237   : > { %1784 = vst [vmem:[%s449_s25] sm:$0xff] %v1781_v47 }
 0x23c   : > { %v1782_v48 = vpop.f32.mrf.mxu3 }
 0x23d PF: > { %s24_s13 = sadd.s32 1, %s2819_s13  }
 0x23e   : > { %p21_p7 = scmp.ge.s32.totalorder %s24_s13, 4  }
 0x240   :  { %23 = sbr.rel (!%p21_p7) target bundleno = 3 (0x3), region = 123 }
 0x245   :  { %1820 = vsyncpa [#allocation4], 1 }
 0x246   :  { %1822 = vsyncpa [#allocation4 + $0x1], 1 }
 0x247   :  { %1823 = vsyncpa [#allocation6], 1 }
 0x248   :  { %1824 = vsyncpa [#allocation9], 1 }

// kernel: run.11
= control target key start
LH: loop header
LB: loop body
LE: loop exit
PB: predicated region body
PF: predicated region fallthrough
CT: control target
= control target key end

     0   :  { %13 = vsyncpa [#allocation4], 0  ;;  %s2075_s0 = inlined_call_operand.vmem [shape: f32[2,4,128], index: 0, kind: input, shape index: {}]   ;;  %s2076_s1 = inlined_call_operand.vmem [shape: f32[2,8,128], index: 1, kind: input, shape index: {}]   ;;  %s2077_s2 = inlined_call_operand.hbm [shape: bf16[640,128], index: 2, kind: input, shape index: {}]   ;;  %s2078_s3 = inlined_call_operand.vmem [shape: f32[1,128], index: 3, kind: input, shape index: {}]   ;;  %s2079_s4 = inlined_call_operand.vmem [shape: bf16[128,128], index: 4, kind: input, shape index: {}]   ;;  %s2080_s5 = inlined_call_operand.vmem [shape: f32[1,128], index: 5, kind: input, shape index: {}]   ;;  %s2081_s6 = inlined_call_operand.hbm [shape: bf16[640,128], index: 6, kind: input, shape index: {}]   ;;  %s2082_s7 = inlined_call_operand.vmem [shape: f32[1,128], index: 7, kind: input, shape index: {}]   ;;  %s2083_s8 = inlined_call_operand.vmem [shape: f32[2,8,128], index: 8, kind: output, shape index: {}]  }
   0x1   :  { %14 = vsyncpa [#allocation6], 0  ;;  %s1990_s27 = smov 0  }
   0x2 LB: > { %s240_s30 = sshll.u32 %s2077_s2, 4  ;;  %s1373_s9 = sadd.s32 4294967295, %s1938_s27   ;;  %s1938_s27 = sphi %s1990_s27, %s20_s27   ;;  %s241_s30 = int_to_ptr.hbm [resolvable:$true] %s240_s30 }
   0x3   : > { %p1375_p0 = scmp.ge.s32.totalorder %s1938_s27, 1  ;;  %p229_p1 = scmp.lt.s32.totalorder %s1938_s27, 3 }
   0x4   : > { %p1844_p2 = scmp.eq.s32.totalorder %s1373_s9, 0  ;;  %s1940_s11 = smov [#allocation3]  }
   0x5   : > { %p2001_p3 = pnand %p1375_p0, %p229_p1  ;;  %s242_s12 = sshll.u32 %s1940_s11, 4  ;;  %s243_s12 = int_to_ptr.vmem [resolvable:$true] %s242_s12 }
   0x6   : > { %s263_s15 = sshll.u32 %s2081_s6, 4  ;;  %s1941_s16 = smov [#allocation5]   ;;  %s264_s15 = int_to_ptr.hbm [resolvable:$true] %s263_s15 }
   0x7   : > { %p1837_p4 = pneg %p2001_p3  ;;  %s265_s17 = sshll.u32 %s1941_s16, 4  ;;  %s266_s17 = int_to_ptr.vmem [resolvable:$true] %s265_s17 }
   0x8   : > { %s1942_s18 = smov 64   ;;  %s1943_s19 = smov 4  }
   0x9   : > { %p1838_p5 = pnand %p1844_p2, %p1837_p4  ;;  %298 = sbr.rel (%p2001_p3) target bundleno = 479 (0x1df), region = 52 }
   0xb   : > { %1840 = dma.hbm_to_vmem [thread:$0]  (!%p1838_p5), %s241_s30, 5120, %s243_s12, [#allocation4], %s1942_s18, %s1942_s18, %s1943_s19  }
   0xc   : > { %1843 = dma.hbm_to_vmem [thread:$0]  (!%p1838_p5), %s264_s15, 5120, %s266_s17, [#allocation6], %s1942_s18, %s1942_s18, %s1943_s19  }
   0xe   : > { %1929 = dma.done.wait (%p1844_p2), [#allocation4], 5120  }
   0xf   : > { %1931 = vsyncadd (%p1844_p2), [#allocation4], 4294962176 }
  0x10   : > { %1933 = dma.done.wait (%p1844_p2), [#allocation6], 5120  }
  0x11   : > { %1935 = vsyncadd (%p1844_p2), [#allocation6], 4294962176  ;;  %p340_p6 = scmp.lt.s32.totalorder %s1373_s9, 1  ;;  %v354_v0 = vlaneseq  ;;  %v1944_v1 = vmov 0.0   ;;  %vm368_vm0 = vcmask 1043456   ;;  %v1748_v7 = vld [vmem:[#allocation3 + $0x38] sm:$0xff] }
  0x12   : > { %392 = vst [vmem:[#allocation2] sm:$0x3] %v1944_v1  ;;  %v1756_v8 = vld [vmem:[#allocation3 + $0x78] sm:$0xff]  ;;  %vm364_vm3 = vcmask 31744   ;;  %729 = vmatpush.bf16.msra.mxu1 %v1748_v7  ;;  %v1747_v9 = vld [vmem:[#allocation3 + $0x30] sm:$0xff]  ;;  %v1746_v16 = vld [vmem:[#allocation3 + $0x28] sm:$0xff] }
  0x13   : > { %s2086_s9 = smov (!%p340_p6, %s1373_s9), 1  ;;  %v355_v2 = vshrl.u32 %v354_v0, 7  ;;  %v357_v3 = vand.u32 127, %v354_v0  ;;  %393 = vst [vmem:[#allocation2 + $0xa] sm:$0x3] %v1944_v1  ;;  %742 = vmatpush.bf16.msra.mxu2 %v1756_v8  ;;  %v1755_v10 = vld [vmem:[#allocation3 + $0x70] sm:$0xff] }
  0x14   : > { %s1382_s20 = sshll.u32 %s2086_s9, 2  ;;  %v1764_v12 = vld [vmem:[#allocation3 + $0xb8] sm:$0xff]  ;;  %v1763_v14 = vld [vmem:[#allocation3 + $0xb0] sm:$0xff]  ;;  %v1754_v17 = vld [vmem:[#allocation3 + $0x68] sm:$0xff] }
  0x15   : > { %v358_v4 = vmul.u32 2, %v357_v3  ;;  %s343_s23 = scalar_lea.vmem %s2075_s0, %s1382_s20  ;;  %v1772_v13 = vld [vmem:[#allocation3 + $0xf8] sm:$0xff]  ;;  %755 = vmatpush.bf16.msra.mxu3 %v1764_v12  ;;  %v1771_v15 = vld [vmem:[#allocation3 + $0xf0] sm:$0xff]  ;;  %v1745_v18 = vld [vmem:[#allocation3 + $0x20] sm:$0xff]  ;;  %s1383_s20 = sshll.u32 %s2086_s9, 3 }
  0x16   : > { %v352_v6 = vld [vmem:[%s343_s23] sm:$0xf]  ;;  %730 = vmatpush.bf16.msra.mxu1 %v1747_v9  ;;  %v1762_v19 = vld [vmem:[#allocation3 + $0xa8] sm:$0xff]  ;;  %v1753_v21 = vld [vmem:[#allocation3 + $0x60] sm:$0xff]  ;;  %s347_s23 = scalar_lea.vmem %s2076_s1, %s1383_s20  ;;  %s351_s12 = scalar_lea.vmem %s2083_s8, %s1383_s20 }
  0x17   : > { %v359_v5 = vsub.s32 %v355_v2, %v358_v4  ;;  %1385 = vmatpush.msk.msra.mxu0 %vm368_vm0, %v352_v6  ;;  %743 = vmatpush.bf16.msra.mxu2 %v1755_v10  ;;  %v1770_v20 = vld [vmem:[#allocation3 + $0xe8] sm:$0xff]  ;;  %v1761_v22 = vld [vmem:[#allocation3 + $0xa0] sm:$0xff]  ;;  %v1744_v24 = vld [vmem:[#allocation3 + $0x18] sm:$0xff] }
  0x18   : > { %v1769_v23 = vld [vmem:[#allocation3 + $0xe0] sm:$0xff]  ;;  %v1752_v25 = vld [vmem:[#allocation3 + $0x58] sm:$0xff]  ;;  %v1743_v28 = vld [vmem:[#allocation3 + $0x10] sm:$0xff] }
  0x19   : > { %vm360_vm1 = vcmp.eq.s32.totalorder %v359_v5, 0  ;;  %vm361_vm2 = vcmp.eq.s32.totalorder %v359_v5, 1  ;;  %768 = vmatpush.bf16.msrb.mxu0 %v1772_v13  ;;  %756 = vmatpush.bf16.msra.mxu3 %v1763_v14  ;;  %v1760_v26 = vld [vmem:[#allocation3 + $0x98] sm:$0xff]  ;;  %v1751_v29 = vld [vmem:[#allocation3 + $0x50] sm:$0xff]  ;;  %v1742_v30 = vld [vmem:[#allocation3 + $0x8] sm:$0xff] }
  0x1a   : > { %vm362_vm4 = vmor %vm360_vm1, %vm361_vm2  ;;  %731 = vmatpush.bf16.msra.mxu1 %v1746_v16  ;;  %v1768_v27 = vld [vmem:[#allocation3 + $0xd8] sm:$0xff]  ;;  %v1750_v31 = vld [vmem:[#allocation3 + $0x48] sm:$0xff] }
  0x1b   : > { %v363_v11 = vsel %vm362_vm4, 1.0, %v1944_v1  ;;  %744 = vmatpush.bf16.msra.mxu2 %v1754_v17  ;;  %v1741_v32 = vld [vmem:[#allocation3] sm:$0xff]  ;;  %v1780_v34 = vld [vmem:[#allocation3 + $0x138] sm:$0xff]  ;;  %v1788_v35 = vld [vmem:[%s2079_s4 + $0x38] sm:$0xff] }
  0x1c   : > { %1386 = vmatmul.msk.f32.vlgmr.msra.gmra.mxu0 %vm364_vm3, %v363_v11  ;;  %v1749_v33 = vld [vmem:[#allocation3 + $0x40] sm:$0xff]  ;;  %v1759_v36 = vld [vmem:[#allocation3 + $0x90] sm:$0xff]  ;;  %v1758_v37 = vld [vmem:[#allocation3 + $0x88] sm:$0xff] }
  0x1d   : > { %769 = vmatpush.bf16.msrb.mxu0 %v1771_v15  ;;  %757 = vmatpush.bf16.msra.mxu3 %v1762_v19  ;;  %v1767_v38 = vld [vmem:[#allocation3 + $0xd0] sm:$0xff]  ;;  %v1787_v40 = vld [vmem:[%s2079_s4 + $0x30] sm:$0xff]  ;;  %v1766_v42 = vld [vmem:[#allocation3 + $0xc8] sm:$0xff] }
  0x1e   : > { %732 = vmatpush.bf16.msra.mxu1 %v1745_v18  ;;  %v1779_v39 = vld [vmem:[#allocation3 + $0x130] sm:$0xff]  ;;  %v1757_v41 = vld [vmem:[#allocation3 + $0x80] sm:$0xff]  ;;  %v1778_v43 = vld [vmem:[#allocation3 + $0x128] sm:$0xff] }
  0x1f   : > { %745 = vmatpush.bf16.msra.mxu2 %v1753_v21  ;;  %v1786_v44 = vld [vmem:[%s2079_s4 + $0x28] sm:$0xff]  ;;  %v1765_v45 = vld [vmem:[#allocation3 + $0xc0] sm:$0xff]  ;;  %v1785_v47 = vld [vmem:[%s2079_s4 + $0x20] sm:$0xff] }
  0x20   : > { %v1777_v46 = vld [vmem:[#allocation3 + $0x120] sm:$0xff]  ;;  %v1776_v48 = vld [vmem:[#allocation3 + $0x118] sm:$0xff]  ;;  %v1784_v49 = vld [vmem:[%s2079_s4 + $0x18] sm:$0xff] }
  0x21   : > { %770 = vmatpush.bf16.msrb.mxu0 %v1770_v20  ;;  %758 = vmatpush.bf16.msra.mxu3 %v1761_v22  ;;  %v1775_v50 = vld [vmem:[#allocation3 + $0x110] sm:$0xff]  ;;  %v1783_v51 = vld [vmem:[%s2079_s4 + $0x10] sm:$0xff]  ;;  %v1774_v52 = vld [vmem:[#allocation3 + $0x108] sm:$0xff] }
  0x22   : > { %733 = vmatpush.bf16.msra.mxu1 %v1744_v24  ;;  %v1782_v53 = vld [vmem:[%s2079_s4 + $0x8] sm:$0xff]  ;;  %v1773_v54 = vld [vmem:[#allocation3 + $0x100] sm:$0xff]  ;;  %v1781_v55 = vld [vmem:[%s2079_s4] sm:$0xff] }
  0x23   : > { %746 = vmatpush.bf16.msra.mxu2 %v1752_v25  ;;  %v1796_v56 = vld [vmem:[#allocation5 + $0x38] sm:$0xff]  ;;  %v353_v57 = vld [vmem:[%s347_s23] sm:$0xff]  ;;  %v1794_v62 = vld [vmem:[#allocation5 + $0x28] sm:$0xff] }
  0x24   : > { %v1795_v58 = vld [vmem:[#allocation5 + $0x30] sm:$0xff]  ;;  %v1812_v8 = vld [vmem:[#allocation5 + $0xb8] sm:$0xff]  ;;  %v1793_v10 = vld [vmem:[#allocation5 + $0x20] sm:$0xff] }
  0x25   : > { %771 = vmatpush.bf16.msrb.mxu0 %v1769_v23  ;;  %759 = vmatpush.bf16.msra.mxu3 %v1760_v26  ;;  %v1811_v9 = vld [vmem:[#allocation5 + $0xb0] sm:$0xff]  ;;  %v1804_v11 = vld [vmem:[#allocation5 + $0x78] sm:$0xff]  ;;  %v1810_v13 = vld [vmem:[#allocation5 + $0xa8] sm:$0xff] }
  0x26   : > { %734 = vmatpush.bf16.msra.mxu1 %v1743_v28  ;;  %v1820_v12 = vld [vmem:[#allocation5 + $0xf8] sm:$0xff]  ;;  %v1803_v15 = vld [vmem:[#allocation5 + $0x70] sm:$0xff]  ;;  %v1809_v16 = vld [vmem:[#allocation5 + $0xa0] sm:$0xff] }
  0x27   : > { %747 = vmatpush.bf16.msra.mxu2 %v1751_v29  ;;  %v1792_v14 = vld [vmem:[#allocation5 + $0x18] sm:$0xff]  ;;  %v1791_v17 = vld [vmem:[#allocation5 + $0x10] sm:$0xff]  ;;  %v1802_v18 = vld [vmem:[#allocation5 + $0x68] sm:$0xff] }
  0x28   : > { %v1818_v19 = vld [vmem:[#allocation5 + $0xe8] sm:$0xff]  ;;  %v1808_v20 = vld [vmem:[#allocation5 + $0x98] sm:$0xff]  ;;  %v1801_v22 = vld [vmem:[#allocation5 + $0x60] sm:$0xff] }
  0x29   : > { %772 = vmatpush.bf16.msrb.mxu0 %v1768_v27  ;;  %760 = vmatpush.bf16.msra.mxu3 %v1759_v36  ;;  %v1790_v21 = vld [vmem:[#allocation5 + $0x8] sm:$0xff]  ;;  %v1817_v23 = vld [vmem:[#allocation5 + $0xe0] sm:$0xff]  ;;  %v1807_v24 = vld [vmem:[#allocation5 + $0x90] sm:$0xff] }
  0x2a   : > { %735 = vmatpush.bf16.msra.mxu1 %v1742_v30  ;;  %v1789_v25 = vld [vmem:[#allocation5] sm:$0xff]  ;;  %v1800_v26 = vld [vmem:[#allocation5 + $0x58] sm:$0xff]  ;;  %v1806_v29 = vld [vmem:[#allocation5 + $0x88] sm:$0xff] }
  0x2b   : > { %748 = vmatpush.bf16.msra.mxu2 %v1750_v31  ;;  %v1816_v27 = vld [vmem:[#allocation5 + $0xd8] sm:$0xff]  ;;  %v1799_v30 = vld [vmem:[#allocation5 + $0x50] sm:$0xff]  ;;  %v1826_v36 = vld [vmem:[#allocation5 + $0x128] sm:$0xff] }
  0x2c   : > { %v1828_v28 = vld [vmem:[#allocation5 + $0x138] sm:$0xff]  ;;  %v1815_v31 = vld [vmem:[#allocation5 + $0xd0] sm:$0xff] }
  0x2d   : > { %761 = vmatpush.bf16.msra.mxu3 %v1758_v37  ;;  %773 = vmatpush.bf16.msrb.mxu0 %v1767_v38  ;;  %v1797_v37 = vld [vmem:[#allocation5 + $0x40] sm:$0xff] }
  0x2e   : > { %736 = vmatpush.bf16.msra.mxu1 %v1741_v32  ;;  %v1827_v32 = vld [vmem:[#allocation5 + $0x130] sm:$0xff]  ;;  %v1813_v38 = vld [vmem:[#allocation5 + $0xc0] sm:$0xff] }
  0x2f   : > { %749 = vmatpush.bf16.msra.mxu2 %v1749_v33  ;;  %v1805_v33 = vld [vmem:[#allocation5 + $0x80] sm:$0xff] }
  0x31   : > { %762 = vmatpush.bf16.msra.mxu3 %v1757_v41  ;;  %774 = vmatpush.bf16.msrb.mxu0 %v1766_v42  ;;  %v1824_v42 = vld [vmem:[#allocation5 + $0x118] sm:$0xff] }
  0x32   : > { %781 = vmatpush.bf16.msrb.mxu1 %v1780_v34  ;;  %v1798_v34 = vld [vmem:[#allocation5 + $0x48] sm:$0xff] }
  0x33   : > { %866 = vmatpush.bf16.msrb.mxu2 %v1788_v35  ;;  %v1814_v35 = vld [vmem:[#allocation5 + $0xc8] sm:$0xff] }
  0x35   : > { %775 = vmatpush.bf16.msrb.mxu0 %v1765_v45  ;;  %1216 = vmatpush.bf16.msrb.mxu3 %v1796_v56  ;;  %v1823_v45 = vld [vmem:[#allocation5 + $0x110] sm:$0xff] }
  0x36   : > { %782 = vmatpush.bf16.msrb.mxu1 %v1779_v39  ;;  %v1825_v39 = vld [vmem:[#allocation5 + $0x120] sm:$0xff] }
  0x37   : > { %867 = vmatpush.bf16.msrb.mxu2 %v1787_v40 }
  0x39   : > { %1217 = vmatpush.bf16.msrb.mxu3 %v1795_v58  ;;  %1229 = vmatpush.bf16.msra.mxu0 %v1804_v11 }
  0x3a   : > { %783 = vmatpush.bf16.msrb.mxu1 %v1778_v43  ;;  %v1861_v43 = vld [vmem:[%s2078_s3] ss:$0 sm:$0xff] }
  0x3b   : > { %868 = vmatpush.bf16.msrb.mxu2 %v1786_v44 }
  0x3d   : > { %1218 = vmatpush.bf16.msrb.mxu3 %v1794_v62  ;;  %1230 = vmatpush.bf16.msra.mxu0 %v1803_v15 }
  0x3e   : > { %784 = vmatpush.bf16.msrb.mxu1 %v1777_v46 }
  0x3f   : > { %869 = vmatpush.bf16.msrb.mxu2 %v1785_v47 }
  0x41   : > { %1219 = vmatpush.bf16.msrb.mxu3 %v1793_v10  ;;  %1231 = vmatpush.bf16.msra.mxu0 %v1802_v18 }
  0x42   : > { %785 = vmatpush.bf16.msrb.mxu1 %v1776_v48 }
  0x43   : > { %870 = vmatpush.bf16.msrb.mxu2 %v1784_v49 }
  0x45   : > { %1220 = vmatpush.bf16.msrb.mxu3 %v1792_v14  ;;  %1232 = vmatpush.bf16.msra.mxu0 %v1801_v22 }
  0x46   : > { %786 = vmatpush.bf16.msrb.mxu1 %v1775_v50  ;;  %v1822_v50 = vld [vmem:[#allocation5 + $0x108] sm:$0xff] }
  0x47   : > { %871 = vmatpush.bf16.msrb.mxu2 %v1783_v51 }
  0x49   : > { %1221 = vmatpush.bf16.msrb.mxu3 %v1791_v17  ;;  %1233 = vmatpush.bf16.msra.mxu0 %v1800_v26 }
  0x4a   : > { %787 = vmatpush.bf16.msrb.mxu1 %v1774_v52 }
  0x4b   : > { %872 = vmatpush.bf16.msrb.mxu2 %v1782_v53 }
  0x4d   : > { %1222 = vmatpush.bf16.msrb.mxu3 %v1790_v21  ;;  %1234 = vmatpush.bf16.msra.mxu0 %v1799_v30  ;;  %v1862_v21 = vld [vmem:[%s2080_s5] ss:$0 sm:$0xff] }
  0x4e   : > { %788 = vmatpush.bf16.msrb.mxu1 %v1773_v54  ;;  %v1821_v54 = vld [vmem:[#allocation5 + $0x100] sm:$0xff] }
  0x4f   : > { %873 = vmatpush.bf16.msrb.mxu2 %v1781_v55 }
  0x51   : > { %1223 = vmatpush.bf16.msrb.mxu3 %v1789_v25  ;;  %1235 = vmatpush.bf16.msra.mxu0 %v1798_v34 }
  0x55   : > { %1236 = vmatpush.bf16.msra.mxu0 %v1797_v37 }
  0x99   : > { %v389_v59 = vpop.f32.mrf.mxu0 }
  0x9a   : > { %v390_v60 = vadd.f32 %v389_v59, %v353_v57 }
  0x9c   : > { %394 = vst [vmem:[#allocation2 + $0x2] sm:$0xff] %v390_v60  ;;  %v813_v61 = vpack.c.bf16 %v390_v60, %v390_v60 }
  0x9e   : > { %763 = vmatmul.bf16.vlgmr.msra.gmra.mxu3 %v813_v61 }
  0x9f   : > { %1268 = vmatpush.bf16.msra.mxu3 %v1828_v28 }
  0xa3   : > { %v395_v63 = vld [vmem:[#allocation2] sm:$0xff]  ;;  %1269 = vmatpush.bf16.msra.mxu3 %v1827_v32 }
  0xa4   : > { %v396_v0 = vld [vmem:[#allocation2 + $0x1] sm:$0xff]  ;;  %v480_v3 = vpack.c.bf16 %v395_v63, %v395_v63 }
  0xa5   : > { %v398_v2 = vld [vmem:[#allocation2 + $0x3] sm:$0xff]  ;;  %v481_v4 = vpack.c.bf16 %v396_v0, %v396_v0  ;;  %879 = vst [vmem:[#allocation2] sm:$0x3] %v1944_v1 }
  0xa6   : > { %v483_v5 = vpack.c.bf16 %v398_v2, %v398_v2  ;;  %v399_v6 = vld [vmem:[#allocation2 + $0x4] sm:$0xff]  ;;  %737 = vmatmul.bf16.vlgmr.msra.gmra.mxu1 %v480_v3 }
  0xa7   : > { %880 = vst [vmem:[#allocation2 + $0xa] sm:$0x3] %v1944_v1  ;;  %750 = vmatmul.bf16.vlgmr.msra.gmra.mxu2 %v481_v4  ;;  %v484_v7 = vpack.c.bf16 %v399_v6, %v399_v6  ;;  %1242 = vmatpush.bf16.msra.mxu1 %v1812_v8  ;;  %v1819_v1 = vld [vmem:[#allocation5 + $0xf0] sm:$0xff] }
  0xa8   : > { %776 = vmatmul.bf16.vlgmr.msrb.gmra.mxu0 %v483_v5  ;;  %1255 = vmatpush.bf16.msra.mxu2 %v1820_v12 }
  0xa9   : > { %1270 = vmatpush.bf16.msra.mxu3 %v1826_v36 }
  0xab   : > { %1243 = vmatpush.bf16.msra.mxu1 %v1811_v9 }
  0xac   : > { %1256 = vmatpush.bf16.msra.mxu2 %v1819_v1 }
  0xad   : > { %1271 = vmatpush.bf16.msra.mxu3 %v1825_v39 }
  0xaf   : > { %1244 = vmatpush.bf16.msra.mxu1 %v1810_v13  ;;  %v1863_v13 = vld [vmem:[%s2082_s7] ss:$0 sm:$0xff] }
  0xb0   : > { %1257 = vmatpush.bf16.msra.mxu2 %v1818_v19 }
  0xb1   : > { %1272 = vmatpush.bf16.msra.mxu3 %v1824_v42 }
  0xb3   : > { %1245 = vmatpush.bf16.msra.mxu1 %v1809_v16 }
  0xb4   : > { %1258 = vmatpush.bf16.msra.mxu2 %v1817_v23 }
  0xb5   : > { %1273 = vmatpush.bf16.msra.mxu3 %v1823_v45 }
  0xb6   : > { %789 = vmatmul.bf16.vlgmr.msrb.gmra.mxu1 %v484_v7 }
  0xb7   : > { %874 = vmatmul.bf16.vlgmr.msrb.gmra.mxu2 %v813_v61  ;;  %1246 = vmatpush.bf16.msra.mxu1 %v1808_v20 }
  0xb8   : > { %1259 = vmatpush.bf16.msra.mxu2 %v1816_v27 }
  0xb9   : > { %1274 = vmatpush.bf16.msra.mxu3 %v1822_v50 }
  0xbb   : > { %1247 = vmatpush.bf16.msra.mxu1 %v1807_v24 }
  0xbc   : > { %1260 = vmatpush.bf16.msra.mxu2 %v1815_v31 }
  0xbd   : > { %1275 = vmatpush.bf16.msra.mxu3 %v1821_v54 }
  0xbf   : > { %1248 = vmatpush.bf16.msra.mxu1 %v1806_v29 }
  0xc0   : > { %1261 = vmatpush.bf16.msra.mxu2 %v1814_v35 }
  0xc3   : > { %1249 = vmatpush.bf16.msra.mxu1 %v1805_v33 }
  0xc4   : > { %1262 = vmatpush.bf16.msra.mxu2 %v1813_v38 }
 0x121   : > { %v764_v40 = vpop.f32.mrf.mxu3 }
 0x123   : > { %v738_v41 = vpop.f32.mrf.mxu1 }
 0x124   : > { %v739_v46 = vadd.f32 %v1861_v43, %v738_v41 }
 0x125   : > { %v777_v44 = vpop.f32.mrf.mxu0 }
 0x129   : > { %v766_v48 = vpop.f32.mrf.mxu3 }
 0x12a   : > { %v751_v47 = vpop.f32.mrf.mxu2 }
 0x12b   : > { %v752_v49 = vadd.f32 %v751_v47, %v739_v46  ;;  %v740_v51 = vpop.f32.mrf.mxu1 }
 0x12d   : > { %v779_v52 = vpop.f32.mrf.mxu0  ;;  %v765_v53 = vadd.f32 %v764_v40, %v752_v49 }
 0x12f   : > { %v778_v56 = vadd.f32 %v777_v44, %v765_v53 }
 0x132   : > { %v753_v55 = vpop.f32.mrf.mxu2 }
 0x133   : > { %v790_v57 = vpop.f32.mrf.mxu1 }
 0x134   : > { %v791_v58 = vadd.f32 %v790_v57, %v778_v56 }
 0x136   : > { %vm794_vm5 = vcmp.ge.f32.partialorder %v791_v58, 0.0  ;;  %v795_v59 = vmul.f32 0.2, %v791_v58 }
 0x138   : > { %v796_v60 = vsel %vm794_vm5, %v791_v58, %v795_v59 }
 0x139   : > { %881 = vst [vmem:[#allocation2 + $0x2] sm:$0xff] %v796_v60  ;;  %v969_v62 = vpack.c.bf16 %v796_v60, %v796_v60 }
 0x13a   : > { %v875_v61 = vpop.f32.mrf.mxu2 }
 0x13b   : > { %v792_v63 = vpop.f32.mrf.mxu1  ;;  %1250 = vmatmul.bf16.vlgmr.msra.gmra.mxu1 %v969_v62  ;;  %v876_v24 = vadd.f32 %v1862_v21, %v875_v61 }
 0x140   : > { %v882_v0 = vld [vmem:[#allocation2] sm:$0xff] }
 0x141   : > { %v883_v2 = vld [vmem:[#allocation2 + $0x1] sm:$0xff]  ;;  %v967_v5 = vpack.c.bf16 %v882_v0, %v882_v0 }
 0x142   : > { %v885_v3 = vld [vmem:[#allocation2 + $0x3] sm:$0xff]  ;;  %v877_v4 = vpop.f32.mrf.mxu2  ;;  %v968_v6 = vpack.c.bf16 %v883_v2, %v883_v2 }
 0x143   : > { %v970_v7 = vpack.c.bf16 %v885_v3, %v885_v3  ;;  %1224 = vmatmul.bf16.vlgmr.msrb.gmra.mxu3 %v967_v5  ;;  %v886_v8 = vld [vmem:[#allocation2 + $0x4] sm:$0xff] }
 0x144   : > { %1237 = vmatmul.bf16.vlgmr.msra.gmra.mxu0 %v968_v6  ;;  %v971_v9 = vpack.c.bf16 %v886_v8, %v886_v8 }
 0x145   : > { %1263 = vmatmul.bf16.vlgmr.msra.gmra.mxu2 %v970_v7 }
 0x153   : > { %1276 = vmatmul.bf16.vlgmr.msra.gmra.mxu3 %v971_v9 }
 0x1b8   : > { %v1251_v10 = vpop.f32.mrf.mxu1 }
 0x1c0   : > { %v1253_v12 = vpop.f32.mrf.mxu1 }
 0x1c1   : > { %v1238_v11 = vpop.f32.mrf.mxu0 }
 0x1c6   : > { %v1225_v14 = vpop.f32.mrf.mxu3 }
 0x1c7   : > { %v1226_v16 = vadd.f32 %v1863_v13, %v1225_v14 }
 0x1c8   : > { %v1264_v15 = vpop.f32.mrf.mxu2 }
 0x1c9   : > { %v1240_v1 = vpop.f32.mrf.mxu0  ;;  %v1239_v17 = vadd.f32 %v1238_v11, %v1226_v16 }
 0x1cb   : > { %v1252_v20 = vadd.f32 %v1251_v10, %v1239_v17 }
 0x1cd   : > { %v1265_v22 = vadd.f32 %v1264_v15, %v1252_v20 }
 0x1ce   : > { %v1227_v18 = vpop.f32.mrf.mxu3 }
 0x1d0   : > { %v1266_v19 = vpop.f32.mrf.mxu2 }
 0x1d6   : > { %v1277_v23 = vpop.f32.mrf.mxu3 }
 0x1d7   : > { %v1278_v25 = vadd.f32 %v1277_v23, %v1265_v22 }
 0x1d9   : > { %v1281_v26 = vadd.f32 %v1278_v25, %v876_v24 }
 0x1db   : > { %vm1282_vm6 = vcmp.ge.f32.partialorder %v1281_v26, 0.0  ;;  %v1283_v27 = vmul.f32 0.2, %v1281_v26 }
 0x1dd   : > { %v1284_v28 = vsel %vm1282_vm6, %v1281_v26, %v1283_v27 }
 0x1de   : > { %1285 = vst [vmem:[%s351_s12] sm:$0xff] %v1284_v28  ;;  %v1279_v29 = vpop.f32.mrf.mxu3 }
 0x1df PF: > { %s20_s27 = sadd.s32 1, %s1938_s27  }
 0x1e0   : > { %p17_p7 = scmp.ge.s32.totalorder %s20_s27, 4  }
 0x1e2   :  { %19 = sbr.rel (!%p17_p7) target bundleno = 2 (0x2), region = 94 }
 0x1e7   :  { %1305 = vsyncpa [#allocation4], 1 }
 0x1e8   :  { %1307 = vsyncpa [#allocation4 + $0x1], 1 }
 0x1e9   :  { %1308 = vsyncpa [#allocation6], 1 }

// kernel: run.12
= control target key start
LH: loop header
LB: loop body
LE: loop exit
PB: predicated region body
PF: predicated region fallthrough
CT: control target
= control target key end

     0   :  { %13 = vsyncpa [#allocation4], 0  ;;  %s2274_s0 = inlined_call_operand.vmem [shape: f32[2,8,128], index: 0, kind: input, shape index: {}]   ;;  %s2275_s1 = inlined_call_operand.vmem [shape: f32[2,16,128], index: 1, kind: input, shape index: {}]   ;;  %s2276_s2 = inlined_call_operand.hbm [shape: bf16[640,128], index: 2, kind: input, shape index: {}]   ;;  %s2277_s3 = inlined_call_operand.vmem [shape: f32[1,128], index: 3, kind: input, shape index: {}]   ;;  %s2278_s4 = inlined_call_operand.hbm [shape: bf16[128,128], index: 4, kind: input, shape index: {}]   ;;  %s2279_s5 = inlined_call_operand.vmem [shape: f32[1,128], index: 5, kind: input, shape index: {}]   ;;  %s2280_s6 = inlined_call_operand.hbm [shape: bf16[640,128], index: 6, kind: input, shape index: {}]   ;;  %s2281_s7 = inlined_call_operand.hbm [shape: f32[1,128], index: 7, kind: input, shape index: {}]   ;;  %s2282_s8 = inlined_call_operand.vmem [shape: f32[2,16,128], index: 8, kind: output, shape index: {}]  }
   0x1   :  { %14 = vsyncpa [#allocation6], 0 }
   0x2   :  { %15 = vsyncpa [#allocation9], 0  ;;  %s2181_s27 = smov 0  }
   0x3 LB: > { %s2187_s28 = sadd.s32 4294967295, %s2127_s27   ;;  %p1472_p0 = scmp.ge.s32.totalorder %s2127_s27, 1  ;;  %s2127_s27 = sphi %s2181_s27, %s21_s27  }
   0x4   : > { %p230_p1 = scmp.lt.s32.totalorder %s2127_s27, 3  ;;  %p1963_p2 = scmp.eq.s32.totalorder %s2187_s28, 0 }
   0x5   : > { %s258_s9 = sshll.u32 %s2278_s4, 4  ;;  %s241_s13 = sshll.u32 %s2276_s2, 4  ;;  %s259_s9 = int_to_ptr.hbm [resolvable:$true] %s258_s9  ;;  %s242_s13 = int_to_ptr.hbm [resolvable:$true] %s241_s13 }
   0x6   : > { %p2195_p3 = pnand %p1472_p0, %p230_p1  ;;  %s2129_s14 = smov [#allocation5]  }
   0x7   : > { %s260_s15 = sshll.u32 %s2129_s14, 4  ;;  %s2130_s17 = smov [#allocation3]   ;;  %s261_s15 = int_to_ptr.vmem [resolvable:$true] %s260_s15 }
   0x8   : > { %p1950_p4 = pneg %p2195_p3  ;;  %s243_s18 = sshll.u32 %s2130_s17, 4  ;;  %s244_s18 = int_to_ptr.vmem [resolvable:$true] %s243_s18 }
   0x9   : > { %s275_s21 = sshll.u32 %s2280_s6, 4  ;;  %s2131_s22 = smov 64   ;;  %s276_s21 = int_to_ptr.hbm [resolvable:$true] %s275_s21 }
   0xa   : > { %p2206_p5 = pnand %p1963_p2, %p1950_p4  ;;  %s2132_s23 = smov 4  }
   0xb   : > { %s2133_s24 = smov [#allocation7]   ;;  %s290_s30 = sshll.u32 %s2281_s7, 4  ;;  %s291_s30 = int_to_ptr.hbm [resolvable:$true] %s290_s30 }
   0xc   : > { %1956 = dma.hbm_to_vmem [thread:$0]  (!%p2206_p5), %s259_s9, 1024, %s261_s15, [#allocation6], %s2131_s22, %s2131_s22, %s2132_s23  }
   0xd   : > { %1953 = dma.hbm_to_vmem [thread:$0]  (!%p2206_p5), %s242_s13, 5120, %s244_s18, [#allocation4], %s2131_s22, %s2131_s22, %s2132_s23  }
   0xe   : > { %s277_s25 = sshll.u32 %s2133_s24, 4  ;;  %s2134_s11 = smov [#allocation8]   ;;  %s278_s25 = int_to_ptr.vmem [resolvable:$true] %s277_s25 }
   0xf   : > { %1959 = dma.hbm_to_vmem [thread:$0]  (!%p2206_p5), %s276_s21, 5120, %s278_s25, [#allocation6], %s2131_s22, %s2131_s22, %s2132_s23  }
  0x10   : > { %s292_s12 = sshll.u32 %s2134_s11, 4  ;;  %320 = sbr.rel (%p2195_p3) target bundleno = 512 (0x200), region = 52  ;;  %s293_s12 = int_to_ptr.vmem [resolvable:$true] %s292_s12 }
  0x11   : > { %1962 = dma.hbm_to_vmem [thread:$0]  (!%p2206_p5), %s291_s30, 16, %s293_s12, [#allocation9]  }
  0x15   : > { %2114 = dma.done.wait (%p1963_p2), [#allocation4], 5120  }
  0x16   : > { %2116 = vsyncadd (%p1963_p2), [#allocation4], 4294962176 }
  0x17   : > { %2118 = dma.done.wait (%p1963_p2), [#allocation6], 6144  }
  0x18   : > { %2120 = vsyncadd (%p1963_p2), [#allocation6], 4294961152 }
  0x19   : > { %2122 = dma.done.wait (%p1963_p2), [#allocation9], 16  }
  0x1a   : > { %2124 = vsyncadd (%p1963_p2), [#allocation9], 4294967280  ;;  %p374_p6 = scmp.lt.s32.totalorder %s2187_s28, 1  ;;  %v391_v0 = vlaneseq  ;;  %v2135_v1 = vmov 0.0   ;;  %v1853_v9 = vld [vmem:[#allocation3 + $0x38] sm:$0xff]  ;;  %vm407_vm2 = vcmask 64512  }
  0x1b   : > { %437 = vst [vmem:[#allocation2] sm:$0x3] %v2135_v1  ;;  %v1861_v10 = vld [vmem:[#allocation3 + $0x78] sm:$0xff]  ;;  %780 = vmatpush.bf16.msra.mxu1 %v1853_v9  ;;  %v1852_v11 = vld [vmem:[#allocation3 + $0x30] sm:$0xff]  ;;  %v1851_v16 = vld [vmem:[#allocation3 + $0x28] sm:$0xff] }
  0x1c   : > { %s2286_s28 = smov (!%p374_p6, %s2187_s28), 1  ;;  %v392_v2 = vshrl.u32 %v391_v0, 7  ;;  %v395_v3 = vand.u32 127, %v391_v0  ;;  %438 = vst [vmem:[#allocation2 + $0x12] sm:$0x3] %v2135_v1  ;;  %794 = vmatpush.bf16.msra.mxu2 %v1861_v10  ;;  %v1860_v12 = vld [vmem:[#allocation3 + $0x70] sm:$0xff] }
  0x1d   : > { %s1483_s9 = sshll.u32 %s2286_s28, 3  ;;  %v1869_v14 = vld [vmem:[#allocation3 + $0xb8] sm:$0xff]  ;;  %v1859_v17 = vld [vmem:[#allocation3 + $0x68] sm:$0xff]  ;;  %v1868_v18 = vld [vmem:[#allocation3 + $0xb0] sm:$0xff]  ;;  %s1844_s15 = sshll.u32 %s2286_s28, 4 }
  0x1e   : > { %v396_v4 = vmul.u32 2, %v395_v3  ;;  %v393_v5 = vadd.s32 8, %v392_v2  ;;  %s377_s14 = scalar_lea.vmem %s2274_s0, %s1483_s9  ;;  %v1877_v15 = vld [vmem:[#allocation3 + $0xf8] sm:$0xff]  ;;  %808 = vmatpush.bf16.msra.mxu3 %v1869_v14  ;;  %v1876_v19 = vld [vmem:[#allocation3 + $0xf0] sm:$0xff]  ;;  %v1850_v21 = vld [vmem:[#allocation3 + $0x20] sm:$0xff]  ;;  %s382_s18 = scalar_lea.vmem %s2275_s1, %s1844_s15 }
  0x1f   : > { %v388_v8 = vld [vmem:[%s377_s14] sm:$0xff]  ;;  %781 = vmatpush.bf16.msra.mxu1 %v1852_v11  ;;  %v1858_v22 = vld [vmem:[#allocation3 + $0x60] sm:$0xff]  ;;  %v1849_v25 = vld [vmem:[#allocation3 + $0x18] sm:$0xff]  ;;  %s387_s25 = scalar_lea.vmem %s2282_s8, %s1844_s15 }
  0x20   : > { %v397_v6 = vsub.s32 %v392_v2, %v396_v4  ;;  %v398_v7 = vsub.s32 %v393_v5, %v396_v4  ;;  %429 = vmatpush.msra.mxu0 %v388_v8  ;;  %795 = vmatpush.bf16.msra.mxu2 %v1860_v12  ;;  %v1867_v23 = vld [vmem:[#allocation3 + $0xa8] sm:$0xff]  ;;  %v1857_v26 = vld [vmem:[#allocation3 + $0x58] sm:$0xff]  ;;  %v1848_v27 = vld [vmem:[#allocation3 + $0x10] sm:$0xff] }
  0x21   : > { %v1875_v24 = vld [vmem:[#allocation3 + $0xe8] sm:$0xff]  ;;  %v1856_v28 = vld [vmem:[#allocation3 + $0x50] sm:$0xff]  ;;  %v1866_v29 = vld [vmem:[#allocation3 + $0xa0] sm:$0xff] }
  0x22   : > { %vm399_vm0 = vcmp.eq.s32.totalorder %v397_v6, 0  ;;  %vm401_vm1 = vcmp.eq.s32.totalorder %v397_v6, 1  ;;  %vm400_vm4 = vcmp.eq.s32.totalorder %v398_v7, 0  ;;  %vm402_vm5 = vcmp.eq.s32.totalorder %v398_v7, 1  ;;  %822 = vmatpush.bf16.msrb.mxu0 %v1877_v15  ;;  %809 = vmatpush.bf16.msra.mxu3 %v1868_v18  ;;  %v1865_v30 = vld [vmem:[#allocation3 + $0x98] sm:$0xff]  ;;  %v1847_v31 = vld [vmem:[#allocation3 + $0x8] sm:$0xff] }
  0x23   : > { %vm403_vm3 = vmor %vm399_vm0, %vm401_vm1  ;;  %782 = vmatpush.bf16.msra.mxu1 %v1851_v16  ;;  %v1855_v32 = vld [vmem:[#allocation3 + $0x48] sm:$0xff]  ;;  %v1874_v33 = vld [vmem:[#allocation3 + $0xe0] sm:$0xff] }
  0x24   : > { %v405_v13 = vsel %vm403_vm3, 1.0, %v2135_v1  ;;  %vm404_vm6 = vmor %vm400_vm4, %vm402_vm5  ;;  %796 = vmatpush.bf16.msra.mxu2 %v1859_v17  ;;  %v1864_v34 = vld [vmem:[#allocation3 + $0x90] sm:$0xff]  ;;  %v1846_v35 = vld [vmem:[#allocation3] sm:$0xff] }
  0x25   : > { %1488 = vmatmul.msk.f32.vlgmr.msra.gmra.mxu0 %vm407_vm2, %v405_v13  ;;  %v406_v20 = vsel %vm404_vm6, 1.0, %v2135_v1  ;;  %v1854_v36 = vld [vmem:[#allocation3 + $0x40] sm:$0xff]  ;;  %v1873_v37 = vld [vmem:[#allocation3 + $0xd8] sm:$0xff]  ;;  %v1863_v40 = vld [vmem:[#allocation3 + $0x88] sm:$0xff] }
  0x26   : > { %823 = vmatpush.bf16.msrb.mxu0 %v1876_v19  ;;  %810 = vmatpush.bf16.msra.mxu3 %v1867_v23  ;;  %v1885_v38 = vld [vmem:[#allocation3 + $0x138] sm:$0xff]  ;;  %v1872_v41 = vld [vmem:[#allocation3 + $0xd0] sm:$0xff]  ;;  %v1862_v44 = vld [vmem:[#allocation3 + $0x80] sm:$0xff] }
  0x27   : > { %783 = vmatpush.bf16.msra.mxu1 %v1850_v21  ;;  %v1893_v39 = vld [vmem:[#allocation5 + $0x38] sm:$0xff]  ;;  %v1884_v42 = vld [vmem:[#allocation3 + $0x130] sm:$0xff]  ;;  %v1871_v45 = vld [vmem:[#allocation3 + $0xc8] sm:$0xff] }
  0x28   : > { %797 = vmatpush.bf16.msra.mxu2 %v1858_v22  ;;  %v1892_v43 = vld [vmem:[#allocation5 + $0x30] sm:$0xff]  ;;  %v1883_v46 = vld [vmem:[#allocation3 + $0x128] sm:$0xff]  ;;  %v1870_v48 = vld [vmem:[#allocation3 + $0xc0] sm:$0xff] }
  0x29   : > { %v1891_v47 = vld [vmem:[#allocation5 + $0x28] sm:$0xff]  ;;  %v1882_v49 = vld [vmem:[#allocation3 + $0x120] sm:$0xff]  ;;  %v1881_v51 = vld [vmem:[#allocation3 + $0x118] sm:$0xff] }
  0x2a   : > { %824 = vmatpush.bf16.msrb.mxu0 %v1875_v24  ;;  %811 = vmatpush.bf16.msra.mxu3 %v1866_v29  ;;  %v1890_v50 = vld [vmem:[#allocation5 + $0x20] sm:$0xff]  ;;  %v1889_v52 = vld [vmem:[#allocation5 + $0x18] sm:$0xff]  ;;  %v1880_v53 = vld [vmem:[#allocation3 + $0x110] sm:$0xff] }
  0x2b   : > { %784 = vmatpush.bf16.msra.mxu1 %v1849_v25  ;;  %v1888_v54 = vld [vmem:[#allocation5 + $0x10] sm:$0xff]  ;;  %v1879_v55 = vld [vmem:[#allocation3 + $0x108] sm:$0xff]  ;;  %v1878_v58 = vld [vmem:[#allocation3 + $0x100] sm:$0xff] }
  0x2c   : > { %798 = vmatpush.bf16.msra.mxu2 %v1857_v26  ;;  %v1887_v56 = vld [vmem:[#allocation5 + $0x8] sm:$0xff]  ;;  %v1886_v59 = vld [vmem:[#allocation5] sm:$0xff]  ;;  %v1901_v62 = vld [vmem:[#allocation7 + $0x38] sm:$0xff] }
  0x2d   : > { %1489 = vmatmul.msk.f32.gmra.mxu0 %vm407_vm2, %v406_v20  ;;  %v389_v57 = vld [vmem:[%s382_s18] sm:$0xff]  ;;  %v390_v63 = vld [vmem:[%s382_s18 + $0x8] sm:$0xff]  ;;  %v1917_v17 = vld [vmem:[#allocation7 + $0xb8] sm:$0xff] }
  0x2e   : > { %812 = vmatpush.bf16.msra.mxu3 %v1865_v30  ;;  %825 = vmatpush.bf16.msrb.mxu0 %v1874_v33  ;;  %v1900_v16 = vld [vmem:[#allocation7 + $0x30] sm:$0xff]  ;;  %v1899_v18 = vld [vmem:[#allocation7 + $0x28] sm:$0xff]  ;;  %v1898_v20 = vld [vmem:[#allocation7 + $0x20] sm:$0xff] }
  0x2f   : > { %785 = vmatpush.bf16.msra.mxu1 %v1848_v27  ;;  %v1916_v19 = vld [vmem:[#allocation7 + $0xb0] sm:$0xff]  ;;  %v1909_v21 = vld [vmem:[#allocation7 + $0x78] sm:$0xff]  ;;  %v1915_v23 = vld [vmem:[#allocation7 + $0xa8] sm:$0xff] }
  0x30   : > { %799 = vmatpush.bf16.msra.mxu2 %v1856_v28  ;;  %v1925_v22 = vld [vmem:[#allocation7 + $0xf8] sm:$0xff]  ;;  %v1908_v24 = vld [vmem:[#allocation7 + $0x70] sm:$0xff]  ;;  %v1914_v26 = vld [vmem:[#allocation7 + $0xa0] sm:$0xff] }
  0x31   : > { %v1924_v25 = vld [vmem:[#allocation7 + $0xf0] sm:$0xff]  ;;  %v1907_v28 = vld [vmem:[#allocation7 + $0x68] sm:$0xff]  ;;  %v1913_v30 = vld [vmem:[#allocation7 + $0x98] sm:$0xff] }
  0x32   : > { %813 = vmatpush.bf16.msra.mxu3 %v1864_v34  ;;  %826 = vmatpush.bf16.msrb.mxu0 %v1873_v37  ;;  %v1896_v27 = vld [vmem:[#allocation7 + $0x10] sm:$0xff]  ;;  %v1923_v29 = vld [vmem:[#allocation7 + $0xe8] sm:$0xff]  ;;  %v1922_v33 = vld [vmem:[#allocation7 + $0xe0] sm:$0xff] }
  0x33   : > { %786 = vmatpush.bf16.msra.mxu1 %v1847_v31  ;;  %v1895_v31 = vld [vmem:[#allocation7 + $0x8] sm:$0xff]  ;;  %v1912_v34 = vld [vmem:[#allocation7 + $0x90] sm:$0xff]  ;;  %v1921_v37 = vld [vmem:[#allocation7 + $0xd8] sm:$0xff] }
  0x34   : > { %800 = vmatpush.bf16.msra.mxu2 %v1855_v32  ;;  %v1906_v32 = vld [vmem:[#allocation7 + $0x60] sm:$0xff] }
  0x36   : > { %814 = vmatpush.bf16.msra.mxu3 %v1863_v40  ;;  %827 = vmatpush.bf16.msrb.mxu0 %v1872_v41  ;;  %v1904_v40 = vld [vmem:[#allocation7 + $0x50] sm:$0xff] }
  0x37   : > { %787 = vmatpush.bf16.msra.mxu1 %v1846_v35  ;;  %v1894_v35 = vld [vmem:[#allocation7] sm:$0xff]  ;;  %v1920_v41 = vld [vmem:[#allocation7 + $0xd0] sm:$0xff] }
  0x38   : > { %801 = vmatpush.bf16.msra.mxu2 %v1854_v36  ;;  %v1905_v36 = vld [vmem:[#allocation7 + $0x58] sm:$0xff] }
  0x3a   : > { %815 = vmatpush.bf16.msra.mxu3 %v1862_v44  ;;  %828 = vmatpush.bf16.msrb.mxu0 %v1871_v45  ;;  %v1903_v44 = vld [vmem:[#allocation7 + $0x48] sm:$0xff] }
  0x3b   : > { %836 = vmatpush.bf16.msrb.mxu1 %v1885_v38  ;;  %v1933_v38 = vld [vmem:[#allocation7 + $0x138] sm:$0xff]  ;;  %v1919_v45 = vld [vmem:[#allocation7 + $0xc8] sm:$0xff] }
  0x3c   : > { %925 = vmatpush.bf16.msrb.mxu2 %v1893_v39  ;;  %v1911_v39 = vld [vmem:[#allocation7 + $0x88] sm:$0xff] }
  0x3e   : > { %829 = vmatpush.bf16.msrb.mxu0 %v1870_v48  ;;  %1282 = vmatpush.bf16.msrb.mxu3 %v1901_v62  ;;  %v1986_v48 = vld [vmem:[%s2277_s3] ss:$0 sm:$0xff] }
  0x3f   : > { %837 = vmatpush.bf16.msrb.mxu1 %v1884_v42  ;;  %v1932_v42 = vld [vmem:[#allocation7 + $0x130] sm:$0xff] }
  0x40   : > { %926 = vmatpush.bf16.msrb.mxu2 %v1892_v43  ;;  %v1910_v43 = vld [vmem:[#allocation7 + $0x80] sm:$0xff] }
  0x42   : > { %1283 = vmatpush.bf16.msrb.mxu3 %v1900_v16  ;;  %1296 = vmatpush.bf16.msra.mxu0 %v1909_v21 }
  0x43   : > { %838 = vmatpush.bf16.msrb.mxu1 %v1883_v46  ;;  %v1931_v46 = vld [vmem:[#allocation7 + $0x128] sm:$0xff] }
  0x44   : > { %927 = vmatpush.bf16.msrb.mxu2 %v1891_v47 }
  0x46   : > { %1284 = vmatpush.bf16.msrb.mxu3 %v1899_v18  ;;  %1297 = vmatpush.bf16.msra.mxu0 %v1908_v24 }
  0x47   : > { %839 = vmatpush.bf16.msrb.mxu1 %v1882_v49  ;;  %v1902_v49 = vld [vmem:[#allocation7 + $0x40] sm:$0xff] }
  0x48   : > { %928 = vmatpush.bf16.msrb.mxu2 %v1890_v50  ;;  %v1918_v50 = vld [vmem:[#allocation7 + $0xc0] sm:$0xff] }
  0x4a   : > { %1285 = vmatpush.bf16.msrb.mxu3 %v1898_v20  ;;  %1298 = vmatpush.bf16.msra.mxu0 %v1907_v28 }
  0x4b   : > { %840 = vmatpush.bf16.msrb.mxu1 %v1881_v51  ;;  %v1930_v51 = vld [vmem:[#allocation7 + $0x120] sm:$0xff] }
  0x4c   : > { %929 = vmatpush.bf16.msrb.mxu2 %v1889_v52 }
  0x4e   : > { %1299 = vmatpush.bf16.msra.mxu0 %v1906_v32 }
  0x4f   : > { %841 = vmatpush.bf16.msrb.mxu1 %v1880_v53 }
  0x50   : > { %930 = vmatpush.bf16.msrb.mxu2 %v1888_v54 }
  0x52   : > { %1300 = vmatpush.bf16.msra.mxu0 %v1905_v36 }
  0x53   : > { %842 = vmatpush.bf16.msrb.mxu1 %v1879_v55 }
  0x54   : > { %931 = vmatpush.bf16.msrb.mxu2 %v1887_v56 }
  0x56   : > { %1301 = vmatpush.bf16.msra.mxu0 %v1904_v40  ;;  %v1987_v40 = vld [vmem:[%s2279_s5] ss:$0 sm:$0xff] }
  0x57   : > { %843 = vmatpush.bf16.msrb.mxu1 %v1878_v58 }
  0x58   : > { %932 = vmatpush.bf16.msrb.mxu2 %v1886_v59  ;;  %v1928_v59 = vld [vmem:[#allocation7 + $0x110] sm:$0xff] }
  0x5a   : > { %1302 = vmatpush.bf16.msra.mxu0 %v1903_v44 }
  0x5e   : > { %1303 = vmatpush.bf16.msra.mxu0 %v1902_v49 }
  0xa2   : > { %v431_v60 = vpop.f32.mrf.mxu0 }
  0xa3   : > { %v432_v61 = vadd.f32 %v431_v60, %v389_v57  ;;  %v1929_v57 = vld [vmem:[#allocation7 + $0x118] sm:$0xff] }
  0xa5   : > { %439 = vst [vmem:[#allocation2 + $0x2] sm:$0xff] %v432_v61 }
  0xaa   : > { %v434_v0 = vpop.f32.mrf.mxu0 }
  0xab   : > { %v435_v2 = vadd.f32 %v434_v0, %v390_v63 }
  0xac   : > { %v441_v4 = vld [vmem:[#allocation2] sm:$0xff] }
  0xad   : > { %440 = vst [vmem:[#allocation2 + $0xa] sm:$0xff] %v435_v2  ;;  %v872_v3 = vpack.c.bf16 %v435_v2, %v432_v61  ;;  %v443_v5 = vld [vmem:[#allocation2 + $0x1] sm:$0xff] }
  0xae   : > { %939 = vst [vmem:[#allocation2] sm:$0x3] %v2135_v1  ;;  %v1927_v2 = vld [vmem:[#allocation7 + $0x108] sm:$0xff] }
  0xaf   : > { %816 = vmatmul.bf16.vlgmr.msra.gmra.mxu3 %v872_v3 }
  0xb4   : > { %v442_v6 = vld [vmem:[#allocation2 + $0x8] sm:$0xff] }
  0xb5   : > { %v444_v7 = vld [vmem:[#allocation2 + $0x9] sm:$0xff]  ;;  %v531_v9 = vpack.c.bf16 %v442_v6, %v441_v4 }
  0xb6   : > { %v447_v8 = vld [vmem:[#allocation2 + $0x3] sm:$0xff]  ;;  %v532_v10 = vpack.c.bf16 %v444_v7, %v443_v5  ;;  %v448_v11 = vld [vmem:[#allocation2 + $0xb] sm:$0xff] }
  0xb7   : > { %v450_v12 = vld [vmem:[#allocation2 + $0xc] sm:$0xff]  ;;  %v534_v13 = vpack.c.bf16 %v448_v11, %v447_v8  ;;  %788 = vmatmul.bf16.vlgmr.msra.gmra.mxu1 %v531_v9  ;;  %v449_v14 = vld [vmem:[#allocation2 + $0x4] sm:$0xff]  ;;  %v1926_v8 = vld [vmem:[#allocation7 + $0x100] sm:$0xff] }
  0xb8   : > { %940 = vst [vmem:[#allocation2 + $0x12] sm:$0x3] %v2135_v1  ;;  %802 = vmatmul.bf16.vlgmr.msra.gmra.mxu2 %v532_v10  ;;  %v535_v15 = vpack.c.bf16 %v450_v12, %v449_v14  ;;  %1310 = vmatpush.bf16.msra.mxu1 %v1917_v17  ;;  %v1897_v1 = vld [vmem:[#allocation7 + $0x18] sm:$0xff] }
  0xb9   : > { %830 = vmatmul.bf16.vlgmr.msrb.gmra.mxu0 %v534_v13  ;;  %1324 = vmatpush.bf16.msra.mxu2 %v1925_v22 }
  0xba   : > { %1286 = vmatpush.bf16.msrb.mxu3 %v1897_v1 }
  0xbc   : > { %1311 = vmatpush.bf16.msra.mxu1 %v1916_v19 }
  0xbd   : > { %1325 = vmatpush.bf16.msra.mxu2 %v1924_v25 }
  0xbe   : > { %1287 = vmatpush.bf16.msrb.mxu3 %v1896_v27 }
  0xc0   : > { %1312 = vmatpush.bf16.msra.mxu1 %v1915_v23 }
  0xc1   : > { %1326 = vmatpush.bf16.msra.mxu2 %v1923_v29  ;;  %v1988_v29 = vld [vmem:[#allocation8] ss:$0 sm:$0xff] }
  0xc2   : > { %1288 = vmatpush.bf16.msrb.mxu3 %v1895_v31 }
  0xc4   : > { %1313 = vmatpush.bf16.msra.mxu1 %v1914_v26 }
  0xc5   : > { %1327 = vmatpush.bf16.msra.mxu2 %v1922_v33 }
  0xc6   : > { %1289 = vmatpush.bf16.msrb.mxu3 %v1894_v35 }
  0xc7   : > { %844 = vmatmul.bf16.vlgmr.msrb.gmra.mxu1 %v535_v15 }
  0xc8   : > { %933 = vmatmul.bf16.vlgmr.msrb.gmra.mxu2 %v872_v3  ;;  %1314 = vmatpush.bf16.msra.mxu1 %v1913_v30 }
  0xc9   : > { %1328 = vmatpush.bf16.msra.mxu2 %v1921_v37 }
  0xca   : > { %1338 = vmatpush.bf16.msra.mxu3 %v1933_v38 }
  0xcc   : > { %1315 = vmatpush.bf16.msra.mxu1 %v1912_v34 }
  0xcd   : > { %1329 = vmatpush.bf16.msra.mxu2 %v1920_v41 }
  0xce   : > { %1339 = vmatpush.bf16.msra.mxu3 %v1932_v42 }
  0xd0   : > { %1316 = vmatpush.bf16.msra.mxu1 %v1911_v39 }
  0xd1   : > { %1330 = vmatpush.bf16.msra.mxu2 %v1919_v45 }
  0xd2   : > { %1340 = vmatpush.bf16.msra.mxu3 %v1931_v46 }
  0xd4   : > { %1317 = vmatpush.bf16.msra.mxu1 %v1910_v43 }
  0xd5   : > { %1331 = vmatpush.bf16.msra.mxu2 %v1918_v50 }
  0xd6   : > { %1341 = vmatpush.bf16.msra.mxu3 %v1930_v51 }
  0xda   : > { %1342 = vmatpush.bf16.msra.mxu3 %v1929_v57 }
  0xde   : > { %1343 = vmatpush.bf16.msra.mxu3 %v1928_v59 }
  0xe2   : > { %1344 = vmatpush.bf16.msra.mxu3 %v1927_v2 }
  0xe6   : > { %1345 = vmatpush.bf16.msra.mxu3 %v1926_v8 }
 0x132   : > { %v817_v55 = vpop.f32.mrf.mxu3 }
 0x134   : > { %v789_v47 = vpop.f32.mrf.mxu1 }
 0x135   : > { %v790_v52 = vadd.f32 %v1986_v48, %v789_v47 }
 0x136   : > { %v831_v60 = vpop.f32.mrf.mxu0 }
 0x13a   : > { %v819_v5 = vpop.f32.mrf.mxu3 }
 0x13b   : > { %v803_v53 = vpop.f32.mrf.mxu2 }
 0x13c   : > { %v804_v54 = vadd.f32 %v803_v53, %v790_v52  ;;  %v791_v56 = vpop.f32.mrf.mxu1 }
 0x13d   : > { %v792_v61 = vadd.f32 %v1986_v48, %v791_v56 }
 0x13e   : > { %v818_v58 = vadd.f32 %v817_v55, %v804_v54  ;;  %v833_v10 = vpop.f32.mrf.mxu0 }
 0x140   : > { %v832_v0 = vadd.f32 %v831_v60, %v818_v58 }
 0x143   : > { %v805_v62 = vpop.f32.mrf.mxu2 }
 0x144   : > { %v806_v63 = vadd.f32 %v805_v62, %v792_v61  ;;  %v845_v3 = vpop.f32.mrf.mxu1 }
 0x145   : > { %v846_v4 = vadd.f32 %v845_v3, %v832_v0 }
 0x146   : > { %v820_v6 = vadd.f32 %v819_v5, %v806_v63 }
 0x147   : > { %vm850_vm7 = vcmp.ge.f32.partialorder %v846_v4, 0.0  ;;  %v852_v7 = vmul.f32 0.2, %v846_v4 }
 0x148   : > { %v834_v11 = vadd.f32 %v833_v10, %v820_v6 }
 0x149   : > { %v854_v9 = vsel %vm850_vm7, %v846_v4, %v852_v7 }
 0x14a   : > { %941 = vst [vmem:[#allocation2 + $0x2] sm:$0xff] %v854_v9 }
 0x14b   : > { %v934_v28 = vpop.f32.mrf.mxu2 }
 0x14c   : > { %v847_v12 = vpop.f32.mrf.mxu1  ;;  %v935_v45 = vadd.f32 %v1987_v40, %v934_v28 }
 0x14d   : > { %v848_v13 = vadd.f32 %v847_v12, %v834_v11 }
 0x14f   : > { %vm851_vm8 = vcmp.ge.f32.partialorder %v848_v13, 0.0  ;;  %v853_v14 = vmul.f32 0.2, %v848_v13 }
 0x151   : > { %v855_v15 = vsel %vm851_vm8, %v848_v13, %v853_v14  ;;  %v943_v17 = vld [vmem:[#allocation2] sm:$0xff] }
 0x152   : > { %942 = vst [vmem:[#allocation2 + $0xa] sm:$0xff] %v855_v15  ;;  %v1035_v16 = vpack.c.bf16 %v855_v15, %v854_v9  ;;  %v945_v18 = vld [vmem:[#allocation2 + $0x1] sm:$0xff] }
 0x153   : > { %v936_v32 = vpop.f32.mrf.mxu2 }
 0x154   : > { %1318 = vmatmul.bf16.vlgmr.msra.gmra.mxu1 %v1035_v16  ;;  %v937_v55 = vadd.f32 %v1987_v40, %v936_v32 }
 0x159   : > { %v944_v19 = vld [vmem:[#allocation2 + $0x8] sm:$0xff] }
 0x15a   : > { %v946_v20 = vld [vmem:[#allocation2 + $0x9] sm:$0xff]  ;;  %v1033_v22 = vpack.c.bf16 %v944_v19, %v943_v17 }
 0x15b   : > { %v949_v21 = vld [vmem:[#allocation2 + $0x3] sm:$0xff]  ;;  %v1034_v23 = vpack.c.bf16 %v946_v20, %v945_v18  ;;  %v950_v1 = vld [vmem:[#allocation2 + $0xb] sm:$0xff] }
 0x15c   : > { %v1036_v24 = vpack.c.bf16 %v950_v1, %v949_v21  ;;  %1290 = vmatmul.bf16.vlgmr.msrb.gmra.mxu3 %v1033_v22  ;;  %v951_v25 = vld [vmem:[#allocation2 + $0x4] sm:$0xff]  ;;  %v952_v26 = vld [vmem:[#allocation2 + $0xc] sm:$0xff] }
 0x15d   : > { %1304 = vmatmul.bf16.vlgmr.msra.gmra.mxu0 %v1034_v23  ;;  %v1037_v27 = vpack.c.bf16 %v952_v26, %v951_v25 }
 0x15e   : > { %1332 = vmatmul.bf16.vlgmr.msra.gmra.mxu2 %v1036_v24 }
 0x16c   : > { %1346 = vmatmul.bf16.vlgmr.msra.gmra.mxu3 %v1037_v27 }
 0x1d1   : > { %v1319_v35 = vpop.f32.mrf.mxu1 }
 0x1d9   : > { %v1321_v47 = vpop.f32.mrf.mxu1 }
 0x1da   : > { %v1305_v33 = vpop.f32.mrf.mxu0 }
 0x1df   : > { %v1291_v30 = vpop.f32.mrf.mxu3 }
 0x1e0   : > { %v1292_v31 = vadd.f32 %v1988_v29, %v1291_v30 }
 0x1e1   : > { %v1333_v39 = vpop.f32.mrf.mxu2 }
 0x1e2   : > { %v1306_v34 = vadd.f32 %v1305_v33, %v1292_v31  ;;  %v1307_v41 = vpop.f32.mrf.mxu0 }
 0x1e4   : > { %v1320_v37 = vadd.f32 %v1319_v35, %v1306_v34 }
 0x1e6   : > { %v1334_v42 = vadd.f32 %v1333_v39, %v1320_v37 }
 0x1e7   : > { %v1293_v36 = vpop.f32.mrf.mxu3 }
 0x1e8   : > { %v1294_v38 = vadd.f32 %v1988_v29, %v1293_v36 }
 0x1e9   : > { %v1335_v51 = vpop.f32.mrf.mxu2 }
 0x1ea   : > { %v1308_v43 = vadd.f32 %v1307_v41, %v1294_v38 }
 0x1ec   : > { %v1322_v48 = vadd.f32 %v1321_v47, %v1308_v43 }
 0x1ee   : > { %v1336_v52 = vadd.f32 %v1335_v51, %v1322_v48 }
 0x1ef   : > { %v1347_v44 = vpop.f32.mrf.mxu3 }
 0x1f0   : > { %v1348_v46 = vadd.f32 %v1347_v44, %v1334_v42 }
 0x1f2   : > { %v1352_v49 = vadd.f32 %v1348_v46, %v935_v45 }
 0x1f4   : > { %vm1354_vm9 = vcmp.ge.f32.partialorder %v1352_v49, 0.0  ;;  %v1356_v50 = vmul.f32 0.2, %v1352_v49 }
 0x1f6   : > { %v1358_v53 = vsel %vm1354_vm9, %v1352_v49, %v1356_v50 }
 0x1f7   : > { %1360 = vst [vmem:[%s387_s25] sm:$0xff] %v1358_v53  ;;  %v1349_v54 = vpop.f32.mrf.mxu3 }
 0x1f8   : > { %v1350_v56 = vadd.f32 %v1349_v54, %v1336_v52 }
 0x1fa   : > { %v1353_v57 = vadd.f32 %v1350_v56, %v937_v55 }
 0x1fc   : > { %vm1355_vm10 = vcmp.ge.f32.partialorder %v1353_v57, 0.0  ;;  %v1357_v58 = vmul.f32 0.2, %v1353_v57 }
 0x1fe   : > { %v1359_v59 = vsel %vm1355_vm10, %v1353_v57, %v1357_v58 }
 0x1ff   : > { %1361 = vst [vmem:[%s387_s25 + $0x8] sm:$0xff] %v1359_v59 }
 0x200 PF: > { %s21_s27 = sadd.s32 1, %s2127_s27  }
 0x201   : > { %p18_p7 = scmp.ge.s32.totalorder %s21_s27, 4  }
 0x203   :  { %20 = sbr.rel (!%p18_p7) target bundleno = 3 (0x3), region = 102 }
 0x208   :  { %1383 = vsyncpa [#allocation4], 1 }
 0x209   :  { %1385 = vsyncpa [#allocation4 + $0x1], 1 }
 0x20a   :  { %1386 = vsyncpa [#allocation6], 1 }
 0x20b   :  { %1387 = vsyncpa [#allocation9], 1 }

// kernel: run.13
= control target key start
LH: loop header
LB: loop body
LE: loop exit
PB: predicated region body
PF: predicated region fallthrough
CT: control target
= control target key end

     0   :  { %s964_s29 = smov 0   ;;  %s1110_s0 = inlined_call_operand.vmem [shape: f32[2,16,128], index: 0, kind: input, shape index: {}]   ;;  %s1111_s1 = inlined_call_operand.vmem [shape: bf16[128,128], index: 1, kind: input, shape index: {}]   ;;  %s1112_s2 = inlined_call_operand.vmem [shape: f32[1,128], index: 2, kind: input, shape index: {}]   ;;  %s1113_s3 = inlined_call_operand.vmem [shape: bf16[128,128], index: 3, kind: input, shape index: {}]   ;;  %s1114_s4 = inlined_call_operand.vmem [shape: f32[1,128], index: 4, kind: input, shape index: {}]   ;;  %s1115_s5 = inlined_call_operand.vmem [shape: bf16[128,8], index: 5, kind: input, shape index: {}]   ;;  %s1116_s6 = inlined_call_operand.vmem [shape: bf16[128,8], index: 6, kind: input, shape index: {}]   ;;  %s1117_s7 = inlined_call_operand.<no memory space> [shape: f32[1,1], index: 7, kind: input, shape index: {}]   ;;  %s1118_s8 = inlined_call_operand.vmem [shape: f32[2,17,8], index: 8, kind: output, shape index: {}]  }
   0x1   :  { %13 = sst [smem:[#allocation2]] %s1117_s7 }
   0x2 LB: > { %s718_s30 = sadd.s32 4294967295, %s913_s29   ;;  %p722_p0 = scmp.ge.s32.totalorder %s913_s29, 1  ;;  %s913_s29 = sphi %s964_s29, %s19_s29  }
   0x3   : > { %p263_p1 = scmp.lt.s32.totalorder %s913_s29, 3 }
   0x5   : > { %p264_p2 = pnand %p722_p0, %p263_p1 }
   0x6   : > { %p297_p3 = scmp.lt.s32.totalorder (!%p264_p2), %s718_s30, 1 }
   0x7   : > { %267 = sbr.rel (%p264_p2) target bundleno = 493 (0x1ed), region = 52 }
   0xc   : > { %v864_v0 = vld [vmem:[%s1111_s1 + $0x38] sm:$0xff]  ;;  %v863_v1 = vld [vmem:[%s1111_s1 + $0x30] sm:$0xff]  ;;  %v862_v4 = vld [vmem:[%s1111_s1 + $0x28] sm:$0xff]  ;;  %s1120_s30 = smov (!%p297_p3, %s718_s30), 1  ;;  %vm641_vm2 = vcmask 57344   ;;  %v915_v51 = vmov 0.0  }
   0xd   : > { %378 = vmatpush.bf16.msra.mxu0 %v864_v0  ;;  %v872_v2 = vld [vmem:[%s1113_s3 + $0x38] sm:$0xff]  ;;  %v871_v3 = vld [vmem:[%s1113_s3 + $0x30] sm:$0xff]  ;;  %v870_v5 = vld [vmem:[%s1113_s3 + $0x28] sm:$0xff]  ;;  %s856_s28 = sshll.u32 %s1120_s30, 4  ;;  %s889_s17 = smul.u32 24, %s1120_s30  ;;  %vm638_vm3 = vcmask 64512  }
   0xe   : > { %467 = vmatpush.bf16.msra.mxu1 %v872_v2  ;;  %v861_v6 = vld [vmem:[%s1111_s1 + $0x20] sm:$0xff]  ;;  %v860_v8 = vld [vmem:[%s1111_s1 + $0x18] sm:$0xff]  ;;  %v859_v9 = vld [vmem:[%s1111_s1 + $0x10] sm:$0xff]  ;;  %s301_s12 = scalar_lea.vmem %s1110_s0, %s856_s28  ;;  %s652_s30 = sld [smem:[#allocation2]] }
   0xf   : > { %v869_v7 = vld [vmem:[%s1113_s3 + $0x20] sm:$0xff]  ;;  %v858_v10 = vld [vmem:[%s1111_s1 + $0x8] sm:$0xff]  ;;  %v868_v15 = vld [vmem:[%s1113_s3 + $0x18] sm:$0xff]  ;;  %s1084_s20 = scalar_lea.vmem %s1118_s8, %s889_s17 }
  0x10   : > { %v857_v11 = vld [vmem:[%s1111_s1] sm:$0xff]  ;;  %v308_v13 = vld [vmem:[%s301_s12 + $0x8] sm:$0xff]  ;;  %v867_v16 = vld [vmem:[%s1113_s3 + $0x10] sm:$0xff]  ;;  %642 = vst.msk [vmem:[%s1084_s20 + $0x10] sm:$0x1] %vm641_vm2, %v915_v51 }
  0x11   : > { %379 = vmatpush.bf16.msra.mxu0 %v863_v1  ;;  %v307_v12 = vld [vmem:[%s301_s12] sm:$0xff]  ;;  %v866_v17 = vld [vmem:[%s1113_s3 + $0x8] sm:$0xff]  ;;  %v880_v19 = vld [vmem:[%s1115_s5 + $0x38] sm:$0xff] }
  0x12   : > { %468 = vmatpush.bf16.msra.mxu1 %v871_v3  ;;  %v325_v14 = vpack.c.bf16 %v308_v13, %v307_v12  ;;  %v865_v18 = vld [vmem:[%s1113_s3] sm:$0xff]  ;;  %v888_v20 = vld [vmem:[%s1116_s6 + $0x38] sm:$0xff]  ;;  %546 = vmatpush.bf16.msra.mxu2 %v880_v19  ;;  %v879_v21 = vld [vmem:[%s1115_s5 + $0x30] sm:$0xff] }
  0x13   : > { %624 = vmatpush.bf16.msra.mxu3 %v888_v20  ;;  %v887_v22 = vld [vmem:[%s1116_s6 + $0x30] sm:$0xff]  ;;  %v878_v23 = vld [vmem:[%s1115_s5 + $0x28] sm:$0xff]  ;;  %v877_v25 = vld [vmem:[%s1115_s5 + $0x20] sm:$0xff] }
  0x14   : > { %v886_v24 = vld [vmem:[%s1116_s6 + $0x28] sm:$0xff]  ;;  %v885_v26 = vld [vmem:[%s1116_s6 + $0x20] sm:$0xff]  ;;  %v876_v27 = vld [vmem:[%s1115_s5 + $0x18] sm:$0xff]  ;;  %v653_v60 = vstv %s652_s30 }
  0x15   : > { %380 = vmatpush.bf16.msra.mxu0 %v862_v4  ;;  %v884_v28 = vld [vmem:[%s1116_s6 + $0x18] sm:$0xff]  ;;  %v899_v30 = vld [vmem:[%s1112_s2] ss:$0 sm:$0xff]  ;;  %v875_v39 = vld [vmem:[%s1115_s5 + $0x10] sm:$0xff] }
  0x16   : > { %469 = vmatpush.bf16.msra.mxu1 %v870_v5  ;;  %547 = vmatpush.bf16.msra.mxu2 %v879_v21  ;;  %v883_v40 = vld [vmem:[%s1116_s6 + $0x10] sm:$0xff]  ;;  %v874_v41 = vld [vmem:[%s1115_s5 + $0x8] sm:$0xff]  ;;  %v873_v43 = vld [vmem:[%s1115_s5] sm:$0xff] }
  0x17   : > { %625 = vmatpush.bf16.msra.mxu3 %v887_v22  ;;  %v882_v42 = vld [vmem:[%s1116_s6 + $0x8] sm:$0xff]  ;;  %v881_v44 = vld [vmem:[%s1116_s6] sm:$0xff] }
  0x18   : > { %v900_v46 = vld [vmem:[%s1114_s4] ss:$0 sm:$0xff] }
  0x19   : > { %381 = vmatpush.bf16.msra.mxu0 %v861_v6 }
  0x1a   : > { %470 = vmatpush.bf16.msra.mxu1 %v869_v7  ;;  %548 = vmatpush.bf16.msra.mxu2 %v878_v23 }
  0x1b   : > { %626 = vmatpush.bf16.msra.mxu3 %v886_v24 }
  0x1d   : > { %382 = vmatpush.bf16.msra.mxu0 %v860_v8 }
  0x1e   : > { %471 = vmatpush.bf16.msra.mxu1 %v868_v15  ;;  %549 = vmatpush.bf16.msra.mxu2 %v877_v25 }
  0x1f   : > { %627 = vmatpush.bf16.msra.mxu3 %v885_v26 }
  0x21   : > { %383 = vmatpush.bf16.msra.mxu0 %v859_v9 }
  0x22   : > { %472 = vmatpush.bf16.msra.mxu1 %v867_v16  ;;  %550 = vmatpush.bf16.msra.mxu2 %v876_v27 }
  0x23   : > { %628 = vmatpush.bf16.msra.mxu3 %v884_v28 }
  0x25   : > { %384 = vmatpush.bf16.msra.mxu0 %v858_v10 }
  0x26   : > { %473 = vmatpush.bf16.msra.mxu1 %v866_v17  ;;  %551 = vmatpush.bf16.msra.mxu2 %v875_v39 }
  0x27   : > { %629 = vmatpush.bf16.msra.mxu3 %v883_v40 }
  0x29   : > { %385 = vmatpush.bf16.msra.mxu0 %v857_v11 }
  0x2a   : > { %474 = vmatpush.bf16.msra.mxu1 %v865_v18  ;;  %552 = vmatpush.bf16.msra.mxu2 %v874_v41 }
  0x2b   : > { %630 = vmatpush.bf16.msra.mxu3 %v882_v42 }
  0x2c   : > { %386 = vmatmul.bf16.vlgmr.msra.gmra.mxu0 %v325_v14 }
  0x2e   : > { %553 = vmatpush.bf16.msra.mxu2 %v873_v43 }
  0x2f   : > { %631 = vmatpush.bf16.msra.mxu3 %v881_v44 }
  0xa9   : > { %v387_v29 = vpop.f32.mrf.mxu0 }
  0xaa   : > { %v388_v31 = vadd.f32 %v899_v30, %v387_v29 }
  0xac   : > { %v394_v33 = vmul.f32 0.2, %v388_v31  ;;  %vm392_vm0 = vcmp.ge.f32.partialorder %v388_v31, 0.0 }
  0xae   : > { %v396_v36 = vsel %vm392_vm0, %v388_v31, %v394_v33 }
  0xb1   : > { %v389_v32 = vpop.f32.mrf.mxu0 }
  0xb2   : > { %v390_v34 = vadd.f32 %v899_v30, %v389_v32 }
  0xb4   : > { %v395_v35 = vmul.f32 0.2, %v390_v34  ;;  %vm393_vm1 = vcmp.ge.f32.partialorder %v390_v34, 0.0 }
  0xb6   : > { %v397_v37 = vsel %vm393_vm1, %v390_v34, %v395_v35 }
  0xb7   : > { %v414_v38 = vpack.c.bf16 %v397_v37, %v396_v36 }
  0xb9   : > { %475 = vmatmul.bf16.vlgmr.msra.gmra.mxu1 %v414_v38 }
 0x136   : > { %v476_v45 = vpop.f32.mrf.mxu1 }
 0x137   : > { %v477_v48 = vadd.f32 %v900_v46, %v476_v45 }
 0x13e   : > { %v478_v47 = vpop.f32.mrf.mxu1 }
 0x13f   : > { %v479_v49 = vadd.f32 %v900_v46, %v478_v47 }
 0x141   : > { %v481_v50 = vpack.c.bf16 %v479_v49, %v477_v48 }
 0x143   : > { %554 = vmatmul.bf16.vlgmr.msra.gmra.mxu2 %v481_v50  ;;  %632 = vmatmul.bf16.vlgmr.msra.gmra.mxu3 %v481_v50 }
 0x1c6   : > { %v555_v52 = vpop.f32.mrf.mxu2  ;;  %v633_v53 = vpop.f32.mrf.mxu3 }
 0x1c7   : > { %639 = vst.msk [vmem:[%s1084_s20] sm:$0xff] %vm638_vm3, %v555_v52 }
 0x1ce   : > { %v557_v54 = vpop.f32.mrf.mxu2  ;;  %v635_v56 = vpop.f32.mrf.mxu3 }
 0x1cf   : > { %640 = vst.msk [vmem:[%s1084_s20 + $0x8] sm:$0xff] %vm638_vm3, %v557_v54 }
 0x1d6   : > { %v643_v55 = vld [vmem:[%s1084_s20 + $0x1] sm:$0xff]  ;;  %v644_v57 = vld [vmem:[%s1084_s20 + $0x9] sm:$0xff] }
 0x1d7   : > { %v645_v58 = vadd.f32 %v643_v55, %v633_v53  ;;  %v646_v59 = vadd.f32 %v644_v57, %v635_v56 }
 0x1d9   : > { %647 = vst.msk [vmem:[%s1084_s20 + $0x1] sm:$0xff] %vm638_vm3, %v645_v58 }
 0x1da   : > { %648 = vst.msk [vmem:[%s1084_s20 + $0x9] sm:$0xff] %vm638_vm3, %v646_v59 }
 0x1e0   : > { %v649_v61 = vld [vmem:[%s1084_s20] sm:$0xff] }
 0x1e1   : > { %v654_v62 = vadd.f32 %v653_v60, %v649_v61  ;;  %v650_v63 = vld [vmem:[%s1084_s20 + $0x8] sm:$0xff]  ;;  %v651_v0 = vld [vmem:[%s1084_s20 + $0x10] sm:$0x1] }
 0x1e2   : > { %v655_v1 = vadd.f32 %v653_v60, %v650_v63  ;;  %v656_v2 = vadd.f32 %v653_v60, %v651_v0 }
 0x1e3   : > { %901 = vtanh.f32 %v654_v62 }
 0x1e4   : > { %903 = vtanh.f32 %v655_v1 }
 0x1e5   : > { %905 = vtanh.f32 %v656_v2 }
 0x1e9   : > { %v902_v3 = vpop.eup %901 }
 0x1ea   : > { %v904_v4 = vpop.eup %903  ;;  %660 = vst.msk [vmem:[%s1084_s20] sm:$0xff] %vm638_vm3, %v902_v3 }
 0x1eb   : > { %v906_v5 = vpop.eup %905  ;;  %661 = vst.msk [vmem:[%s1084_s20 + $0x8] sm:$0xff] %vm638_vm3, %v904_v4 }
 0x1ec   : > { %662 = vst.msk [vmem:[%s1084_s20 + $0x10] sm:$0x1] %vm641_vm2, %v906_v5 }
 0x1ed PF: > { %s19_s29 = sadd.s32 1, %s913_s29  }
 0x1ee   : > { %p16_p4 = scmp.ge.s32.totalorder %s19_s29, 4  }
 0x1f0   :  { %18 = sbr.rel (!%p16_p4) target bundleno = 2 (0x2), region = 82 }

</bundles_post_ra>
